<compile_context>
chip_gen: v5e
topology: v5e:2x2
jax: 0.10.0
libtpu: 0.0.40
codegen_flags: <defaults>
</compile_context>

<pallas_src>
import jax
import jax.numpy as jnp
from jax.experimental import pallas as pl
from jax.experimental.pallas import tpu as pltpu


# ----------------------------------------------------------------------------
# Fused kernel: num_layers LSTM + final Linear, everything VMEM-resident.
# ----------------------------------------------------------------------------
def _make_fused_kernel(S, B, H, num_layers):
    """Builds the fused (LSTM stack + fc) kernel for static S/B/H/num_layers."""

    def kernel(*refs):
        x_ref = refs[0]                               # (S*B, E) embedded tokens
        layer_refs = refs[1:1 + 3 * num_layers]       # per layer: w_ih, w_hh, b
        fcw_ref = refs[1 + 3 * num_layers]            # (H, 1)
        fcb_ref = refs[2 + 3 * num_layers]            # (1, 1)
        out_ref = refs[3 + 3 * num_layers]            # (B, 1)
        xg_scr = refs[4 + 3 * num_layers]             # (S*B, 4H) scratch
        hseq_scr = refs[5 + 3 * num_layers]           # (S*B, H)  scratch

        f32 = jnp.float32

        def cell(gates, c):
            # PyTorch gate order: i, f, g, o
            i = jax.nn.sigmoid(gates[:, 0 * H:1 * H])
            f = jax.nn.sigmoid(gates[:, 1 * H:2 * H])
            g = jnp.tanh(gates[:, 2 * H:3 * H])
            o = jax.nn.sigmoid(gates[:, 3 * H:4 * H])
            c = f * c + i * g
            h = o * jnp.tanh(c)
            return h, c

        h = None
        src = x_ref
        for layer in range(num_layers):
            w_ih, w_hh, b = layer_refs[3 * layer:3 * layer + 3]

            # Hoisted, time-parallel input projection: one (S*B, K) @ (K, 4H)
            # matmul feeds the MXU far better than S tiny per-step matmuls,
            # halves the MXU work on the serial path and adds the bias once.
            xg_scr[...] = (jnp.dot(src[...], w_ih[...],
                                   preferred_element_type=f32)
                           + b[...])

            h = jnp.zeros((B, H), f32)    # h0 = 0
            c = jnp.zeros((B, H), f32)    # c0 = 0
            last_layer = (layer == num_layers - 1)

            # Fully unrolled time loop (S small & static): only the recurrent
            # h @ W_hh matmul + gate math are on the serial critical path.
            for t in range(S):
                gates = (xg_scr[t * B:(t + 1) * B, :]
                         + jnp.dot(h, w_hh[...], preferred_element_type=f32))
                h, c = cell(gates, c)
                if not last_layer:
                    hseq_scr[t * B:(t + 1) * B, :] = h
            src = hseq_scr

        # Final Linear(H, 1), fused onto the last hidden state (no extra
        # kernel launch / HBM round-trip of the (B, H) last hidden state).
        out_ref[...] = (jnp.dot(h, fcw_ref[...], preferred_element_type=f32)
                        + fcb_ref[...])

    return kernel


# ----------------------------------------------------------------------------
# Full forward pass.
# ----------------------------------------------------------------------------
def rnn_lstm_forward(x_tokens, params):
    """x_tokens: (S, B) int32 token ids (seq-first, PyTorch nn.LSTM default)."""
    S, B = x_tokens.shape
    H = params["lstm"][0][1].shape[0]
    num_layers = len(params["lstm"])

    # Embedding lookup stays as XLA glue; result flattened to (S*B, E) so the
    # kernel sees a lane-dense activation matrix (row order = time-major,
    # matching the per-step t*B:(t+1)*B slices inside the kernel).
    # TODO(synk): could be moved in-kernel (scalar-prefetched token ids + a
    # VMEM-resident 25 KiB table); low priority per the review.
    embedded = jnp.take(params["embedding"], x_tokens.reshape(-1), axis=0)

    args = [embedded]
    for (w_ih, w_hh, b) in params["lstm"]:
        args += [w_ih, w_hh, b]
    args += [params["fc_w"], params["fc_b"]]

    kernel = _make_fused_kernel(S, B, H, num_layers)
    return pl.pallas_call(
        kernel,
        out_shape=jax.ShapeDtypeStruct((B, 1), jnp.float32),
        scratch_shapes=[
            pltpu.VMEM((S * B, 4 * H), jnp.float32),   # hoisted gate pre-acts
            pltpu.VMEM((S * B, H), jnp.float32),       # layer output sequence
        ],
    )(*args)


# ----------------------------------------------------------------------------
# Pure-JAX reference (for correctness check).
# ----------------------------------------------------------------------------
def rnn_lstm_reference(x_tokens, params):
    embedded = jnp.take(params["embedding"], x_tokens, axis=0)   # (S, B, E)

    def run_layer(x_seq, w_ih, w_hh, b):
        B = x_seq.shape[1]
        H = w_hh.shape[0]

        def step(carry, x_t):
            h, c = carry
            gates = x_t @ w_ih + h @ w_hh + b[0]
            i = jax.nn.sigmoid(gates[:, 0 * H:1 * H])
            f = jax.nn.sigmoid(gates[:, 1 * H:2 * H])
            g = jnp.tanh(gates[:, 2 * H:3 * H])
            o = jax.nn.sigmoid(gates[:, 3 * H:4 * H])
            c = f * c + i * g
            h = o * jnp.tanh(c)
            return (h, c), h

        init = (jnp.zeros((B, H), jnp.float32), jnp.zeros((B, H), jnp.float32))
        _, hs = jax.lax.scan(step, init, x_seq)
        return hs

    h = embedded
    for w_ih, w_hh, b in params["lstm"]:
        h = run_layer(h, w_ih, w_hh, b)
    return h[-1] @ params["fc_w"] + params["fc_b"]


# ----------------------------------------------------------------------------
# Deterministic parameter init (PyTorch-style uniform(-1/sqrt(H), 1/sqrt(H))).
# ----------------------------------------------------------------------------
def init_params(key, vocab_size, embed_size, hidden_size, num_layers):
    keys = jax.random.split(key, 2 + 4 * num_layers + 2)
    k_idx = 0

    def nk():
        nonlocal k_idx
        k = keys[k_idx]
        k_idx += 1
        return k

    params = {}
    params["embedding"] = jax.random.normal(
        nk(), (vocab_size, embed_size), jnp.float32)

    bound = 1.0 / jnp.sqrt(hidden_size)
    lstm = []
    for layer in range(num_layers):
        in_dim = embed_size if layer == 0 else hidden_size
        w_ih = jax.random.uniform(nk(), (in_dim, 4 * hidden_size),
                                  jnp.float32, -bound, bound)
        w_hh = jax.random.uniform(nk(), (hidden_size, 4 * hidden_size),
                                  jnp.float32, -bound, bound)
        # combined b_ih + b_hh
        b = (jax.random.uniform(nk(), (1, 4 * hidden_size), jnp.float32,
                                -bound, bound)
             + jax.random.uniform(nk(), (1, 4 * hidden_size), jnp.float32,
                                  -bound, bound))
        lstm.append((w_ih, w_hh, b))
    params["lstm"] = lstm

    params["fc_w"] = jax.random.uniform(nk(), (hidden_size, 1), jnp.float32,
                                        -bound, bound)
    params["fc_b"] = jax.random.uniform(nk(), (1, 1), jnp.float32,
                                        -bound, bound)
    return params


if __name__ == "__main__":
    # Small shapes consistent with the module (seq-first LSTM input).
    vocab_size = 50
    embed_size = 128
    hidden_size = 128
    num_layers = 2
    seq_len = 8
    batch = 8

    key = jax.random.PRNGKey(0)
    k_params, k_tokens = jax.random.split(key)
    params = init_params(k_params, vocab_size, embed_size, hidden_size,
                         num_layers)
    x_tokens = jax.random.randint(k_tokens, (seq_len, batch), 0, vocab_size,
                                  dtype=jnp.int32)

    out = rnn_lstm_forward(x_tokens, params)
    out = jax.block_until_ready(out)
    assert out.shape == (batch, 1)

    ref = jax.block_until_ready(rnn_lstm_reference(x_tokens, params))
    assert jnp.allclose(out, ref, atol=1e-4, rtol=1e-4)

    print("KERNEL_OK")
</pallas_src>

<mosaic_0001>
module attributes {stable_mosaic.version = 11 : i64} {
  func.func @kernel(%arg0: memref<64x128xf32, #tpu.memory_space<vmem>>, %arg1: memref<128x512xf32, #tpu.memory_space<vmem>>, %arg2: memref<128x512xf32, #tpu.memory_space<vmem>>, %arg3: memref<1x512xf32, #tpu.memory_space<vmem>>, %arg4: memref<128x512xf32, #tpu.memory_space<vmem>>, %arg5: memref<128x512xf32, #tpu.memory_space<vmem>>, %arg6: memref<1x512xf32, #tpu.memory_space<vmem>>, %arg7: memref<128x1xf32, #tpu.memory_space<vmem>>, %arg8: memref<1x1xf32, #tpu.memory_space<vmem>>, %arg9: memref<8x1xf32, #tpu.memory_space<vmem>>, %arg10: memref<64x512xf32, #tpu.memory_space<vmem>>, %arg11: memref<64x128xf32, #tpu.memory_space<vmem>>) attributes {dimension_semantics = [], scalar_prefetch = 0 : i64, scratch_operands = 2 : i64, tpu.core_type = #tpu.core_type<tc>} {
    %c0 = arith.constant 0 : index
    %c0_0 = arith.constant 0 : index
    %0 = vector.load %arg0[%c0, %c0_0] : memref<64x128xf32, #tpu.memory_space<vmem>>, vector<64x128xf32>
    %c0_1 = arith.constant 0 : index
    %c0_2 = arith.constant 0 : index
    %1 = vector.load %arg1[%c0_1, %c0_2] : memref<128x512xf32, #tpu.memory_space<vmem>>, vector<128x512xf32>
    %cst = arith.constant dense<0.000000e+00> : vector<64x512xf32>
    %2 = tpu.matmul %0, %1, %cst {dimension_numbers = #tpu.dot_dimension_numbers<[1], [0], [0], [1], [0, 0, 1, 1], [], []>} : vector<64x128xf32>, vector<128x512xf32>, vector<64x512xf32> -> vector<64x512xf32>
    %c0_3 = arith.constant 0 : index
    %c0_4 = arith.constant 0 : index
    %3 = vector.load %arg3[%c0_3, %c0_4] : memref<1x512xf32, #tpu.memory_space<vmem>>, vector<1x512xf32>
    %4 = vector.broadcast %3 : vector<1x512xf32> to vector<64x512xf32>
    %5 = arith.addf %2, %4 : vector<64x512xf32>
    %c0_5 = arith.constant 0 : index
    %c0_6 = arith.constant 0 : index
    %6 = vector.load %arg10[%c0_5, %c0_6] : memref<64x512xf32, #tpu.memory_space<vmem>>, vector<64x512xf32>
    tpu.vector_store %arg10[%c0_5, %c0_6], %5 {strides = array<i32>} : memref<64x512xf32, #tpu.memory_space<vmem>>, vector<64x512xf32>,
    %cst_7 = arith.constant 0.000000e+00 : f32
    %7 = vector.broadcast %cst_7 : f32 to vector<8x128xf32>
    %cst_8 = arith.constant 0.000000e+00 : f32
    %8 = vector.broadcast %cst_8 : f32 to vector<8x128xf32>
    %c0_9 = arith.constant 0 : index
    %c0_10 = arith.constant 0 : index
    %9 = vector.load %arg10[%c0_9, %c0_10] : memref<64x512xf32, #tpu.memory_space<vmem>>, vector<8x512xf32>
    %c0_11 = arith.constant 0 : index
    %c0_12 = arith.constant 0 : index
    %10 = vector.load %arg2[%c0_11, %c0_12] : memref<128x512xf32, #tpu.memory_space<vmem>>, vector<128x512xf32>
    %cst_13 = arith.constant dense<0.000000e+00> : vector<8x512xf32>
    %11 = tpu.matmul %7, %10, %cst_13 {dimension_numbers = #tpu.dot_dimension_numbers<[1], [0], [0], [1], [0, 0, 1, 1], [], []>} : vector<8x128xf32>, vector<128x512xf32>, vector<8x512xf32> -> vector<8x512xf32>
    %12 = arith.addf %9, %11 : vector<8x512xf32>
    %13 = vector.extract_strided_slice %12 {offsets = [0, 0], sizes = [8, 128], strides = [1, 1]} : vector<8x512xf32> to vector<8x128xf32>
    %14 = arith.negf %13 : vector<8x128xf32>
    %15 = math.exp %14 : vector<8x128xf32>
    %cst_14 = arith.constant 1.000000e+00 : f32
    %16 = vector.broadcast %cst_14 : f32 to vector<8x128xf32>
    %17 = arith.addf %16, %15 : vector<8x128xf32>
    %18 = arith.divf %16, %17 : vector<8x128xf32>
    %19 = vector.extract_strided_slice %12 {offsets = [0, 128], sizes = [8, 128], strides = [1, 1]} : vector<8x512xf32> to vector<8x128xf32>
    %20 = arith.negf %19 : vector<8x128xf32>
    %21 = math.exp %20 : vector<8x128xf32>
    %cst_15 = arith.constant 1.000000e+00 : f32
    %22 = vector.broadcast %cst_15 : f32 to vector<8x128xf32>
    %23 = arith.addf %22, %21 : vector<8x128xf32>
    %24 = arith.divf %22, %23 : vector<8x128xf32>
    %25 = vector.extract_strided_slice %12 {offsets = [0, 256], sizes = [8, 128], strides = [1, 1]} : vector<8x512xf32> to vector<8x128xf32>
    %26 = math.tanh %25 : vector<8x128xf32>
    %27 = vector.extract_strided_slice %12 {offsets = [0, 384], sizes = [8, 128], strides = [1, 1]} : vector<8x512xf32> to vector<8x128xf32>
    %28 = arith.negf %27 : vector<8x128xf32>
    %29 = math.exp %28 : vector<8x128xf32>
    %cst_16 = arith.constant 1.000000e+00 : f32
    %30 = vector.broadcast %cst_16 : f32 to vector<8x128xf32>
    %31 = arith.addf %30, %29 : vector<8x128xf32>
    %32 = arith.divf %30, %31 : vector<8x128xf32>
    %33 = arith.mulf %24, %8 : vector<8x128xf32>
    %34 = arith.mulf %18, %26 : vector<8x128xf32>
    %35 = arith.addf %33, %34 : vector<8x128xf32>
    %36 = math.tanh %35 : vector<8x128xf32>
    %37 = arith.mulf %32, %36 : vector<8x128xf32>
    %c0_17 = arith.constant 0 : index
    %c0_18 = arith.constant 0 : index
    %38 = vector.load %arg11[%c0_17, %c0_18] : memref<64x128xf32, #tpu.memory_space<vmem>>, vector<8x128xf32>
    tpu.vector_store %arg11[%c0_17, %c0_18], %37 {strides = array<i32>} : memref<64x128xf32, #tpu.memory_space<vmem>>, vector<8x128xf32>,
    %c8 = arith.constant 8 : index
    %c0_19 = arith.constant 0 : index
    %39 = vector.load %arg10[%c8, %c0_19] : memref<64x512xf32, #tpu.memory_space<vmem>>, vector<8x512xf32>
    %c0_20 = arith.constant 0 : index
    %c0_21 = arith.constant 0 : index
    %40 = vector.load %arg2[%c0_20, %c0_21] : memref<128x512xf32, #tpu.memory_space<vmem>>, vector<128x512xf32>
    %cst_22 = arith.constant dense<0.000000e+00> : vector<8x512xf32>
    %41 = tpu.matmul %37, %40, %cst_22 {dimension_numbers = #tpu.dot_dimension_numbers<[1], [0], [0], [1], [0, 0, 1, 1], [], []>} : vector<8x128xf32>, vector<128x512xf32>, vector<8x512xf32> -> vector<8x512xf32>
    %42 = arith.addf %39, %41 : vector<8x512xf32>
    %43 = vector.extract_strided_slice %42 {offsets = [0, 0], sizes = [8, 128], strides = [1, 1]} : vector<8x512xf32> to vector<8x128xf32>
    %44 = arith.negf %43 : vector<8x128xf32>
    %45 = math.exp %44 : vector<8x128xf32>
    %cst_23 = arith.constant 1.000000e+00 : f32
    %46 = vector.broadcast %cst_23 : f32 to vector<8x128xf32>
    %47 = arith.addf %46, %45 : vector<8x128xf32>
    %48 = arith.divf %46, %47 : vector<8x128xf32>
    %49 = vector.extract_strided_slice %42 {offsets = [0, 128], sizes = [8, 128], strides = [1, 1]} : vector<8x512xf32> to vector<8x128xf32>
    %50 = arith.negf %49 : vector<8x128xf32>
    %51 = math.exp %50 : vector<8x128xf32>
    %cst_24 = arith.constant 1.000000e+00 : f32
    %52 = vector.broadcast %cst_24 : f32 to vector<8x128xf32>
    %53 = arith.addf %52, %51 : vector<8x128xf32>
    %54 = arith.divf %52, %53 : vector<8x128xf32>
    %55 = vector.extract_strided_slice %42 {offsets = [0, 256], sizes = [8, 128], strides = [1, 1]} : vector<8x512xf32> to vector<8x128xf32>
    %56 = math.tanh %55 : vector<8x128xf32>
    %57 = vector.extract_strided_slice %42 {offsets = [0, 384], sizes = [8, 128], strides = [1, 1]} : vector<8x512xf32> to vector<8x128xf32>
    %58 = arith.negf %57 : vector<8x128xf32>
    %59 = math.exp %58 : vector<8x128xf32>
    %cst_25 = arith.constant 1.000000e+00 : f32
    %60 = vector.broadcast %cst_25 : f32 to vector<8x128xf32>
    %61 = arith.addf %60, %59 : vector<8x128xf32>
    %62 = arith.divf %60, %61 : vector<8x128xf32>
    %63 = arith.mulf %54, %35 : vector<8x128xf32>
    %64 = arith.mulf %48, %56 : vector<8x128xf32>
    %65 = arith.addf %63, %64 : vector<8x128xf32>
    %66 = math.tanh %65 : vector<8x128xf32>
    %67 = arith.mulf %62, %66 : vector<8x128xf32>
    %c8_26 = arith.constant 8 : index
    %c0_27 = arith.constant 0 : index
    %68 = vector.load %arg11[%c8_26, %c0_27] : memref<64x128xf32, #tpu.memory_space<vmem>>, vector<8x128xf32>
    tpu.vector_store %arg11[%c8_26, %c0_27], %67 {strides = array<i32>} : memref<64x128xf32, #tpu.memory_space<vmem>>, vector<8x128xf32>,
    %c16 = arith.constant 16 : index
    %c0_28 = arith.constant 0 : index
    %69 = vector.load %arg10[%c16, %c0_28] : memref<64x512xf32, #tpu.memory_space<vmem>>, vector<8x512xf32>
    %c0_29 = arith.constant 0 : index
    %c0_30 = arith.constant 0 : index
    %70 = vector.load %arg2[%c0_29, %c0_30] : memref<128x512xf32, #tpu.memory_space<vmem>>, vector<128x512xf32>
    %cst_31 = arith.constant dense<0.000000e+00> : vector<8x512xf32>
    %71 = tpu.matmul %67, %70, %cst_31 {dimension_numbers = #tpu.dot_dimension_numbers<[1], [0], [0], [1], [0, 0, 1, 1], [], []>} : vector<8x128xf32>, vector<128x512xf32>, vector<8x512xf32> -> vector<8x512xf32>
    %72 = arith.addf %69, %71 : vector<8x512xf32>
    %73 = vector.extract_strided_slice %72 {offsets = [0, 0], sizes = [8, 128], strides = [1, 1]} : vector<8x512xf32> to vector<8x128xf32>
    %74 = arith.negf %73 : vector<8x128xf32>
    %75 = math.exp %74 : vector<8x128xf32>
    %cst_32 = arith.constant 1.000000e+00 : f32
    %76 = vector.broadcast %cst_32 : f32 to vector<8x128xf32>
    %77 = arith.addf %76, %75 : vector<8x128xf32>
    %78 = arith.divf %76, %77 : vector<8x128xf32>
    %79 = vector.extract_strided_slice %72 {offsets = [0, 128], sizes = [8, 128], strides = [1, 1]} : vector<8x512xf32> to vector<8x128xf32>
    %80 = arith.negf %79 : vector<8x128xf32>
    %81 = math.exp %80 : vector<8x128xf32>
    %cst_33 = arith.constant 1.000000e+00 : f32
    %82 = vector.broadcast %cst_33 : f32 to vector<8x128xf32>
    %83 = arith.addf %82, %81 : vector<8x128xf32>
    %84 = arith.divf %82, %83 : vector<8x128xf32>
    %85 = vector.extract_strided_slice %72 {offsets = [0, 256], sizes = [8, 128], strides = [1, 1]} : vector<8x512xf32> to vector<8x128xf32>
    %86 = math.tanh %85 : vector<8x128xf32>
    %87 = vector.extract_strided_slice %72 {offsets = [0, 384], sizes = [8, 128], strides = [1, 1]} : vector<8x512xf32> to vector<8x128xf32>
    %88 = arith.negf %87 : vector<8x128xf32>
    %89 = math.exp %88 : vector<8x128xf32>
    %cst_34 = arith.constant 1.000000e+00 : f32
    %90 = vector.broadcast %cst_34 : f32 to vector<8x128xf32>
    %91 = arith.addf %90, %89 : vector<8x128xf32>
    %92 = arith.divf %90, %91 : vector<8x128xf32>
    %93 = arith.mulf %84, %65 : vector<8x128xf32>
    %94 = arith.mulf %78, %86 : vector<8x128xf32>
    %95 = arith.addf %93, %94 : vector<8x128xf32>
    %96 = math.tanh %95 : vector<8x128xf32>
    %97 = arith.mulf %92, %96 : vector<8x128xf32>
    %c16_35 = arith.constant 16 : index
    %c0_36 = arith.constant 0 : index
    %98 = vector.load %arg11[%c16_35, %c0_36] : memref<64x128xf32, #tpu.memory_space<vmem>>, vector<8x128xf32>
    tpu.vector_store %arg11[%c16_35, %c0_36], %97 {strides = array<i32>} : memref<64x128xf32, #tpu.memory_space<vmem>>, vector<8x128xf32>,
    %c24 = arith.constant 24 : index
    %c0_37 = arith.constant 0 : index
    %99 = vector.load %arg10[%c24, %c0_37] : memref<64x512xf32, #tpu.memory_space<vmem>>, vector<8x512xf32>
    %c0_38 = arith.constant 0 : index
    %c0_39 = arith.constant 0 : index
    %100 = vector.load %arg2[%c0_38, %c0_39] : memref<128x512xf32, #tpu.memory_space<vmem>>, vector<128x512xf32>
    %cst_40 = arith.constant dense<0.000000e+00> : vector<8x512xf32>
    %101 = tpu.matmul %97, %100, %cst_40 {dimension_numbers = #tpu.dot_dimension_numbers<[1], [0], [0], [1], [0, 0, 1, 1], [], []>} : vector<8x128xf32>, vector<128x512xf32>, vector<8x512xf32> -> vector<8x512xf32>
    %102 = arith.addf %99, %101 : vector<8x512xf32>
    %103 = vector.extract_strided_slice %102 {offsets = [0, 0], sizes = [8, 128], strides = [1, 1]} : vector<8x512xf32> to vector<8x128xf32>
    %104 = arith.negf %103 : vector<8x128xf32>
    %105 = math.exp %104 : vector<8x128xf32>
    %cst_41 = arith.constant 1.000000e+00 : f32
    %106 = vector.broadcast %cst_41 : f32 to vector<8x128xf32>
    %107 = arith.addf %106, %105 : vector<8x128xf32>
    %108 = arith.divf %106, %107 : vector<8x128xf32>
    %109 = vector.extract_strided_slice %102 {offsets = [0, 128], sizes = [8, 128], strides = [1, 1]} : vector<8x512xf32> to vector<8x128xf32>
    %110 = arith.negf %109 : vector<8x128xf32>
    %111 = math.exp %110 : vector<8x128xf32>
    %cst_42 = arith.constant 1.000000e+00 : f32
    %112 = vector.broadcast %cst_42 : f32 to vector<8x128xf32>
    %113 = arith.addf %112, %111 : vector<8x128xf32>
    %114 = arith.divf %112, %113 : vector<8x128xf32>
    %115 = vector.extract_strided_slice %102 {offsets = [0, 256], sizes = [8, 128], strides = [1, 1]} : vector<8x512xf32> to vector<8x128xf32>
    %116 = math.tanh %115 : vector<8x128xf32>
    %117 = vector.extract_strided_slice %102 {offsets = [0, 384], sizes = [8, 128], strides = [1, 1]} : vector<8x512xf32> to vector<8x128xf32>
    %118 = arith.negf %117 : vector<8x128xf32>
    %119 = math.exp %118 : vector<8x128xf32>
    %cst_43 = arith.constant 1.000000e+00 : f32
    %120 = vector.broadcast %cst_43 : f32 to vector<8x128xf32>
    %121 = arith.addf %120, %119 : vector<8x128xf32>
    %122 = arith.divf %120, %121 : vector<8x128xf32>
    %123 = arith.mulf %114, %95 : vector<8x128xf32>
    %124 = arith.mulf %108, %116 : vector<8x128xf32>
    %125 = arith.addf %123, %124 : vector<8x128xf32>
    %126 = math.tanh %125 : vector<8x128xf32>
    %127 = arith.mulf %122, %126 : vector<8x128xf32>
    %c24_44 = arith.constant 24 : index
    %c0_45 = arith.constant 0 : index
    %128 = vector.load %arg11[%c24_44, %c0_45] : memref<64x128xf32, #tpu.memory_space<vmem>>, vector<8x128xf32>
    tpu.vector_store %arg11[%c24_44, %c0_45], %127 {strides = array<i32>} : memref<64x128xf32, #tpu.memory_space<vmem>>, vector<8x128xf32>,
    %c32 = arith.constant 32 : index
    %c0_46 = arith.constant 0 : index
    %129 = vector.load %arg10[%c32, %c0_46] : memref<64x512xf32, #tpu.memory_space<vmem>>, vector<8x512xf32>
    %c0_47 = arith.constant 0 : index
    %c0_48 = arith.constant 0 : index
    %130 = vector.load %arg2[%c0_47, %c0_48] : memref<128x512xf32, #tpu.memory_space<vmem>>, vector<128x512xf32>
    %cst_49 = arith.constant dense<0.000000e+00> : vector<8x512xf32>
    %131 = tpu.matmul %127, %130, %cst_49 {dimension_numbers = #tpu.dot_dimension_numbers<[1], [0], [0], [1], [0, 0, 1, 1], [], []>} : vector<8x128xf32>, vector<128x512xf32>, vector<8x512xf32> -> vector<8x512xf32>
    %132 = arith.addf %129, %131 : vector<8x512xf32>
    %133 = vector.extract_strided_slice %132 {offsets = [0, 0], sizes = [8, 128], strides = [1, 1]} : vector<8x512xf32> to vector<8x128xf32>
    %134 = arith.negf %133 : vector<8x128xf32>
    %135 = math.exp %134 : vector<8x128xf32>
    %cst_50 = arith.constant 1.000000e+00 : f32
    %136 = vector.broadcast %cst_50 : f32 to vector<8x128xf32>
    %137 = arith.addf %136, %135 : vector<8x128xf32>
    %138 = arith.divf %136, %137 : vector<8x128xf32>
    %139 = vector.extract_strided_slice %132 {offsets = [0, 128], sizes = [8, 128], strides = [1, 1]} : vector<8x512xf32> to vector<8x128xf32>
    %140 = arith.negf %139 : vector<8x128xf32>
    %141 = math.exp %140 : vector<8x128xf32>
    %cst_51 = arith.constant 1.000000e+00 : f32
    %142 = vector.broadcast %cst_51 : f32 to vector<8x128xf32>
    %143 = arith.addf %142, %141 : vector<8x128xf32>
    %144 = arith.divf %142, %143 : vector<8x128xf32>
    %145 = vector.extract_strided_slice %132 {offsets = [0, 256], sizes = [8, 128], strides = [1, 1]} : vector<8x512xf32> to vector<8x128xf32>
    %146 = math.tanh %145 : vector<8x128xf32>
    %147 = vector.extract_strided_slice %132 {offsets = [0, 384], sizes = [8, 128], strides = [1, 1]} : vector<8x512xf32> to vector<8x128xf32>
    %148 = arith.negf %147 : vector<8x128xf32>
    %149 = math.exp %148 : vector<8x128xf32>
    %cst_52 = arith.constant 1.000000e+00 : f32
    %150 = vector.broadcast %cst_52 : f32 to vector<8x128xf32>
    %151 = arith.addf %150, %149 : vector<8x128xf32>
    %152 = arith.divf %150, %151 : vector<8x128xf32>
    %153 = arith.mulf %144, %125 : vector<8x128xf32>
    %154 = arith.mulf %138, %146 : vector<8x128xf32>
    %155 = arith.addf %153, %154 : vector<8x128xf32>
    %156 = math.tanh %155 : vector<8x128xf32>
    %157 = arith.mulf %152, %156 : vector<8x128xf32>
    %c32_53 = arith.constant 32 : index
    %c0_54 = arith.constant 0 : index
    %158 = vector.load %arg11[%c32_53, %c0_54] : memref<64x128xf32, #tpu.memory_space<vmem>>, vector<8x128xf32>
    tpu.vector_store %arg11[%c32_53, %c0_54], %157 {strides = array<i32>} : memref<64x128xf32, #tpu.memory_space<vmem>>, vector<8x128xf32>,
    %c40 = arith.constant 40 : index
    %c0_55 = arith.constant 0 : index
    %159 = vector.load %arg10[%c40, %c0_55] : memref<64x512xf32, #tpu.memory_space<vmem>>, vector<8x512xf32>
    %c0_56 = arith.constant 0 : index
    %c0_57 = arith.constant 0 : index
    %160 = vector.load %arg2[%c0_56, %c0_57] : memref<128x512xf32, #tpu.memory_space<vmem>>, vector<128x512xf32>
    %cst_58 = arith.constant dense<0.000000e+00> : vector<8x512xf32>
    %161 = tpu.matmul %157, %160, %cst_58 {dimension_numbers = #tpu.dot_dimension_numbers<[1], [0], [0], [1], [0, 0, 1, 1], [], []>} : vector<8x128xf32>, vector<128x512xf32>, vector<8x512xf32> -> vector<8x512xf32>
    %162 = arith.addf %159, %161 : vector<8x512xf32>
    %163 = vector.extract_strided_slice %162 {offsets = [0, 0], sizes = [8, 128], strides = [1, 1]} : vector<8x512xf32> to vector<8x128xf32>
    %164 = arith.negf %163 : vector<8x128xf32>
    %165 = math.exp %164 : vector<8x128xf32>
    %cst_59 = arith.constant 1.000000e+00 : f32
    %166 = vector.broadcast %cst_59 : f32 to vector<8x128xf32>
    %167 = arith.addf %166, %165 : vector<8x128xf32>
    %168 = arith.divf %166, %167 : vector<8x128xf32>
    %169 = vector.extract_strided_slice %162 {offsets = [0, 128], sizes = [8, 128], strides = [1, 1]} : vector<8x512xf32> to vector<8x128xf32>
    %170 = arith.negf %169 : vector<8x128xf32>
    %171 = math.exp %170 : vector<8x128xf32>
    %cst_60 = arith.constant 1.000000e+00 : f32
    %172 = vector.broadcast %cst_60 : f32 to vector<8x128xf32>
    %173 = arith.addf %172, %171 : vector<8x128xf32>
    %174 = arith.divf %172, %173 : vector<8x128xf32>
    %175 = vector.extract_strided_slice %162 {offsets = [0, 256], sizes = [8, 128], strides = [1, 1]} : vector<8x512xf32> to vector<8x128xf32>
    %176 = math.tanh %175 : vector<8x128xf32>
    %177 = vector.extract_strided_slice %162 {offsets = [0, 384], sizes = [8, 128], strides = [1, 1]} : vector<8x512xf32> to vector<8x128xf32>
    %178 = arith.negf %177 : vector<8x128xf32>
    %179 = math.exp %178 : vector<8x128xf32>
    %cst_61 = arith.constant 1.000000e+00 : f32
    %180 = vector.broadcast %cst_61 : f32 to vector<8x128xf32>
    %181 = arith.addf %180, %179 : vector<8x128xf32>
    %182 = arith.divf %180, %181 : vector<8x128xf32>
    %183 = arith.mulf %174, %155 : vector<8x128xf32>
    %184 = arith.mulf %168, %176 : vector<8x128xf32>
    %185 = arith.addf %183, %184 : vector<8x128xf32>
    %186 = math.tanh %185 : vector<8x128xf32>
    %187 = arith.mulf %182, %186 : vector<8x128xf32>
    %c40_62 = arith.constant 40 : index
    %c0_63 = arith.constant 0 : index
    %188 = vector.load %arg11[%c40_62, %c0_63] : memref<64x128xf32, #tpu.memory_space<vmem>>, vector<8x128xf32>
    tpu.vector_store %arg11[%c40_62, %c0_63], %187 {strides = array<i32>} : memref<64x128xf32, #tpu.memory_space<vmem>>, vector<8x128xf32>,
    %c48 = arith.constant 48 : index
    %c0_64 = arith.constant 0 : index
    %189 = vector.load %arg10[%c48, %c0_64] : memref<64x512xf32, #tpu.memory_space<vmem>>, vector<8x512xf32>
    %c0_65 = arith.constant 0 : index
    %c0_66 = arith.constant 0 : index
    %190 = vector.load %arg2[%c0_65, %c0_66] : memref<128x512xf32, #tpu.memory_space<vmem>>, vector<128x512xf32>
    %cst_67 = arith.constant dense<0.000000e+00> : vector<8x512xf32>
    %191 = tpu.matmul %187, %190, %cst_67 {dimension_numbers = #tpu.dot_dimension_numbers<[1], [0], [0], [1], [0, 0, 1, 1], [], []>} : vector<8x128xf32>, vector<128x512xf32>, vector<8x512xf32> -> vector<8x512xf32>
    %192 = arith.addf %189, %191 : vector<8x512xf32>
    %193 = vector.extract_strided_slice %192 {offsets = [0, 0], sizes = [8, 128], strides = [1, 1]} : vector<8x512xf32> to vector<8x128xf32>
    %194 = arith.negf %193 : vector<8x128xf32>
    %195 = math.exp %194 : vector<8x128xf32>
    %cst_68 = arith.constant 1.000000e+00 : f32
    %196 = vector.broadcast %cst_68 : f32 to vector<8x128xf32>
    %197 = arith.addf %196, %195 : vector<8x128xf32>
    %198 = arith.divf %196, %197 : vector<8x128xf32>
    %199 = vector.extract_strided_slice %192 {offsets = [0, 128], sizes = [8, 128], strides = [1, 1]} : vector<8x512xf32> to vector<8x128xf32>
    %200 = arith.negf %199 : vector<8x128xf32>
    %201 = math.exp %200 : vector<8x128xf32>
    %cst_69 = arith.constant 1.000000e+00 : f32
    %202 = vector.broadcast %cst_69 : f32 to vector<8x128xf32>
    %203 = arith.addf %202, %201 : vector<8x128xf32>
    %204 = arith.divf %202, %203 : vector<8x128xf32>
    %205 = vector.extract_strided_slice %192 {offsets = [0, 256], sizes = [8, 128], strides = [1, 1]} : vector<8x512xf32> to vector<8x128xf32>
    %206 = math.tanh %205 : vector<8x128xf32>
    %207 = vector.extract_strided_slice %192 {offsets = [0, 384], sizes = [8, 128], strides = [1, 1]} : vector<8x512xf32> to vector<8x128xf32>
    %208 = arith.negf %207 : vector<8x128xf32>
    %209 = math.exp %208 : vector<8x128xf32>
    %cst_70 = arith.constant 1.000000e+00 : f32
    %210 = vector.broadcast %cst_70 : f32 to vector<8x128xf32>
    %211 = arith.addf %210, %209 : vector<8x128xf32>
    %212 = arith.divf %210, %211 : vector<8x128xf32>
    %213 = arith.mulf %204, %185 : vector<8x128xf32>
    %214 = arith.mulf %198, %206 : vector<8x128xf32>
    %215 = arith.addf %213, %214 : vector<8x128xf32>
    %216 = math.tanh %215 : vector<8x128xf32>
    %217 = arith.mulf %212, %216 : vector<8x128xf32>
    %c48_71 = arith.constant 48 : index
    %c0_72 = arith.constant 0 : index
    %218 = vector.load %arg11[%c48_71, %c0_72] : memref<64x128xf32, #tpu.memory_space<vmem>>, vector<8x128xf32>
    tpu.vector_store %arg11[%c48_71, %c0_72], %217 {strides = array<i32>} : memref<64x128xf32, #tpu.memory_space<vmem>>, vector<8x128xf32>,
    %c56 = arith.constant 56 : index
    %c0_73 = arith.constant 0 : index
    %219 = vector.load %arg10[%c56, %c0_73] : memref<64x512xf32, #tpu.memory_space<vmem>>, vector<8x512xf32>
    %c0_74 = arith.constant 0 : index
    %c0_75 = arith.constant 0 : index
    %220 = vector.load %arg2[%c0_74, %c0_75] : memref<128x512xf32, #tpu.memory_space<vmem>>, vector<128x512xf32>
    %cst_76 = arith.constant dense<0.000000e+00> : vector<8x512xf32>
    %221 = tpu.matmul %217, %220, %cst_76 {dimension_numbers = #tpu.dot_dimension_numbers<[1], [0], [0], [1], [0, 0, 1, 1], [], []>} : vector<8x128xf32>, vector<128x512xf32>, vector<8x512xf32> -> vector<8x512xf32>
    %222 = arith.addf %219, %221 : vector<8x512xf32>
    %223 = vector.extract_strided_slice %222 {offsets = [0, 0], sizes = [8, 128], strides = [1, 1]} : vector<8x512xf32> to vector<8x128xf32>
    %224 = arith.negf %223 : vector<8x128xf32>
    %225 = math.exp %224 : vector<8x128xf32>
    %cst_77 = arith.constant 1.000000e+00 : f32
    %226 = vector.broadcast %cst_77 : f32 to vector<8x128xf32>
    %227 = arith.addf %226, %225 : vector<8x128xf32>
    %228 = arith.divf %226, %227 : vector<8x128xf32>
    %229 = vector.extract_strided_slice %222 {offsets = [0, 128], sizes = [8, 128], strides = [1, 1]} : vector<8x512xf32> to vector<8x128xf32>
    %230 = arith.negf %229 : vector<8x128xf32>
    %231 = math.exp %230 : vector<8x128xf32>
    %cst_78 = arith.constant 1.000000e+00 : f32
    %232 = vector.broadcast %cst_78 : f32 to vector<8x128xf32>
    %233 = arith.addf %232, %231 : vector<8x128xf32>
    %234 = arith.divf %232, %233 : vector<8x128xf32>
    %235 = vector.extract_strided_slice %222 {offsets = [0, 256], sizes = [8, 128], strides = [1, 1]} : vector<8x512xf32> to vector<8x128xf32>
    %236 = math.tanh %235 : vector<8x128xf32>
    %237 = vector.extract_strided_slice %222 {offsets = [0, 384], sizes = [8, 128], strides = [1, 1]} : vector<8x512xf32> to vector<8x128xf32>
    %238 = arith.negf %237 : vector<8x128xf32>
    %239 = math.exp %238 : vector<8x128xf32>
    %cst_79 = arith.constant 1.000000e+00 : f32
    %240 = vector.broadcast %cst_79 : f32 to vector<8x128xf32>
    %241 = arith.addf %240, %239 : vector<8x128xf32>
    %242 = arith.divf %240, %241 : vector<8x128xf32>
    %243 = arith.mulf %234, %215 : vector<8x128xf32>
    %244 = arith.mulf %228, %236 : vector<8x128xf32>
    %245 = arith.addf %243, %244 : vector<8x128xf32>
    %246 = math.tanh %245 : vector<8x128xf32>
    %247 = arith.mulf %242, %246 : vector<8x128xf32>
    %c56_80 = arith.constant 56 : index
    %c0_81 = arith.constant 0 : index
    %248 = vector.load %arg11[%c56_80, %c0_81] : memref<64x128xf32, #tpu.memory_space<vmem>>, vector<8x128xf32>
    tpu.vector_store %arg11[%c56_80, %c0_81], %247 {strides = array<i32>} : memref<64x128xf32, #tpu.memory_space<vmem>>, vector<8x128xf32>,
    %c0_82 = arith.constant 0 : index
    %c0_83 = arith.constant 0 : index
    %249 = vector.load %arg11[%c0_82, %c0_83] : memref<64x128xf32, #tpu.memory_space<vmem>>, vector<64x128xf32>
    %c0_84 = arith.constant 0 : index
    %c0_85 = arith.constant 0 : index
    %250 = vector.load %arg4[%c0_84, %c0_85] : memref<128x512xf32, #tpu.memory_space<vmem>>, vector<128x512xf32>
    %cst_86 = arith.constant dense<0.000000e+00> : vector<64x512xf32>
    %251 = tpu.matmul %249, %250, %cst_86 {dimension_numbers = #tpu.dot_dimension_numbers<[1], [0], [0], [1], [0, 0, 1, 1], [], []>} : vector<64x128xf32>, vector<128x512xf32>, vector<64x512xf32> -> vector<64x512xf32>
    %c0_87 = arith.constant 0 : index
    %c0_88 = arith.constant 0 : index
    %252 = vector.load %arg6[%c0_87, %c0_88] : memref<1x512xf32, #tpu.memory_space<vmem>>, vector<1x512xf32>
    %253 = vector.broadcast %252 : vector<1x512xf32> to vector<64x512xf32>
    %254 = arith.addf %251, %253 : vector<64x512xf32>
    %c0_89 = arith.constant 0 : index
    %c0_90 = arith.constant 0 : index
    %255 = vector.load %arg10[%c0_89, %c0_90] : memref<64x512xf32, #tpu.memory_space<vmem>>, vector<64x512xf32>
    tpu.vector_store %arg10[%c0_89, %c0_90], %254 {strides = array<i32>} : memref<64x512xf32, #tpu.memory_space<vmem>>, vector<64x512xf32>,
    %cst_91 = arith.constant 0.000000e+00 : f32
    %256 = vector.broadcast %cst_91 : f32 to vector<8x128xf32>
    %cst_92 = arith.constant 0.000000e+00 : f32
    %257 = vector.broadcast %cst_92 : f32 to vector<8x128xf32>
    %c0_93 = arith.constant 0 : index
    %c0_94 = arith.constant 0 : index
    %258 = vector.load %arg10[%c0_93, %c0_94] : memref<64x512xf32, #tpu.memory_space<vmem>>, vector<8x512xf32>
    %c0_95 = arith.constant 0 : index
    %c0_96 = arith.constant 0 : index
    %259 = vector.load %arg5[%c0_95, %c0_96] : memref<128x512xf32, #tpu.memory_space<vmem>>, vector<128x512xf32>
    %cst_97 = arith.constant dense<0.000000e+00> : vector<8x512xf32>
    %260 = tpu.matmul %256, %259, %cst_97 {dimension_numbers = #tpu.dot_dimension_numbers<[1], [0], [0], [1], [0, 0, 1, 1], [], []>} : vector<8x128xf32>, vector<128x512xf32>, vector<8x512xf32> -> vector<8x512xf32>
    %261 = arith.addf %258, %260 : vector<8x512xf32>
    %262 = vector.extract_strided_slice %261 {offsets = [0, 0], sizes = [8, 128], strides = [1, 1]} : vector<8x512xf32> to vector<8x128xf32>
    %263 = arith.negf %262 : vector<8x128xf32>
    %264 = math.exp %263 : vector<8x128xf32>
    %cst_98 = arith.constant 1.000000e+00 : f32
    %265 = vector.broadcast %cst_98 : f32 to vector<8x128xf32>
    %266 = arith.addf %265, %264 : vector<8x128xf32>
    %267 = arith.divf %265, %266 : vector<8x128xf32>
    %268 = vector.extract_strided_slice %261 {offsets = [0, 128], sizes = [8, 128], strides = [1, 1]} : vector<8x512xf32> to vector<8x128xf32>
    %269 = arith.negf %268 : vector<8x128xf32>
    %270 = math.exp %269 : vector<8x128xf32>
    %cst_99 = arith.constant 1.000000e+00 : f32
    %271 = vector.broadcast %cst_99 : f32 to vector<8x128xf32>
    %272 = arith.addf %271, %270 : vector<8x128xf32>
    %273 = arith.divf %271, %272 : vector<8x128xf32>
    %274 = vector.extract_strided_slice %261 {offsets = [0, 256], sizes = [8, 128], strides = [1, 1]} : vector<8x512xf32> to vector<8x128xf32>
    %275 = math.tanh %274 : vector<8x128xf32>
    %276 = vector.extract_strided_slice %261 {offsets = [0, 384], sizes = [8, 128], strides = [1, 1]} : vector<8x512xf32> to vector<8x128xf32>
    %277 = arith.negf %276 : vector<8x128xf32>
    %278 = math.exp %277 : vector<8x128xf32>
    %cst_100 = arith.constant 1.000000e+00 : f32
    %279 = vector.broadcast %cst_100 : f32 to vector<8x128xf32>
    %280 = arith.addf %279, %278 : vector<8x128xf32>
    %281 = arith.divf %279, %280 : vector<8x128xf32>
    %282 = arith.mulf %273, %257 : vector<8x128xf32>
    %283 = arith.mulf %267, %275 : vector<8x128xf32>
    %284 = arith.addf %282, %283 : vector<8x128xf32>
    %285 = math.tanh %284 : vector<8x128xf32>
    %286 = arith.mulf %281, %285 : vector<8x128xf32>
    %c8_101 = arith.constant 8 : index
    %c0_102 = arith.constant 0 : index
    %287 = vector.load %arg10[%c8_101, %c0_102] : memref<64x512xf32, #tpu.memory_space<vmem>>, vector<8x512xf32>
    %c0_103 = arith.constant 0 : index
    %c0_104 = arith.constant 0 : index
    %288 = vector.load %arg5[%c0_103, %c0_104] : memref<128x512xf32, #tpu.memory_space<vmem>>, vector<128x512xf32>
    %cst_105 = arith.constant dense<0.000000e+00> : vector<8x512xf32>
    %289 = tpu.matmul %286, %288, %cst_105 {dimension_numbers = #tpu.dot_dimension_numbers<[1], [0], [0], [1], [0, 0, 1, 1], [], []>} : vector<8x128xf32>, vector<128x512xf32>, vector<8x512xf32> -> vector<8x512xf32>
    %290 = arith.addf %287, %289 : vector<8x512xf32>
    %291 = vector.extract_strided_slice %290 {offsets = [0, 0], sizes = [8, 128], strides = [1, 1]} : vector<8x512xf32> to vector<8x128xf32>
    %292 = arith.negf %291 : vector<8x128xf32>
    %293 = math.exp %292 : vector<8x128xf32>
    %cst_106 = arith.constant 1.000000e+00 : f32
    %294 = vector.broadcast %cst_106 : f32 to vector<8x128xf32>
    %295 = arith.addf %294, %293 : vector<8x128xf32>
    %296 = arith.divf %294, %295 : vector<8x128xf32>
    %297 = vector.extract_strided_slice %290 {offsets = [0, 128], sizes = [8, 128], strides = [1, 1]} : vector<8x512xf32> to vector<8x128xf32>
    %298 = arith.negf %297 : vector<8x128xf32>
    %299 = math.exp %298 : vector<8x128xf32>
    %cst_107 = arith.constant 1.000000e+00 : f32
    %300 = vector.broadcast %cst_107 : f32 to vector<8x128xf32>
    %301 = arith.addf %300, %299 : vector<8x128xf32>
    %302 = arith.divf %300, %301 : vector<8x128xf32>
    %303 = vector.extract_strided_slice %290 {offsets = [0, 256], sizes = [8, 128], strides = [1, 1]} : vector<8x512xf32> to vector<8x128xf32>
    %304 = math.tanh %303 : vector<8x128xf32>
    %305 = vector.extract_strided_slice %290 {offsets = [0, 384], sizes = [8, 128], strides = [1, 1]} : vector<8x512xf32> to vector<8x128xf32>
    %306 = arith.negf %305 : vector<8x128xf32>
    %307 = math.exp %306 : vector<8x128xf32>
    %cst_108 = arith.constant 1.000000e+00 : f32
    %308 = vector.broadcast %cst_108 : f32 to vector<8x128xf32>
    %309 = arith.addf %308, %307 : vector<8x128xf32>
    %310 = arith.divf %308, %309 : vector<8x128xf32>
    %311 = arith.mulf %302, %284 : vector<8x128xf32>
    %312 = arith.mulf %296, %304 : vector<8x128xf32>
    %313 = arith.addf %311, %312 : vector<8x128xf32>
    %314 = math.tanh %313 : vector<8x128xf32>
    %315 = arith.mulf %310, %314 : vector<8x128xf32>
    %c16_109 = arith.constant 16 : index
    %c0_110 = arith.constant 0 : index
    %316 = vector.load %arg10[%c16_109, %c0_110] : memref<64x512xf32, #tpu.memory_space<vmem>>, vector<8x512xf32>
    %c0_111 = arith.constant 0 : index
    %c0_112 = arith.constant 0 : index
    %317 = vector.load %arg5[%c0_111, %c0_112] : memref<128x512xf32, #tpu.memory_space<vmem>>, vector<128x512xf32>
    %cst_113 = arith.constant dense<0.000000e+00> : vector<8x512xf32>
    %318 = tpu.matmul %315, %317, %cst_113 {dimension_numbers = #tpu.dot_dimension_numbers<[1], [0], [0], [1], [0, 0, 1, 1], [], []>} : vector<8x128xf32>, vector<128x512xf32>, vector<8x512xf32> -> vector<8x512xf32>
    %319 = arith.addf %316, %318 : vector<8x512xf32>
    %320 = vector.extract_strided_slice %319 {offsets = [0, 0], sizes = [8, 128], strides = [1, 1]} : vector<8x512xf32> to vector<8x128xf32>
    %321 = arith.negf %320 : vector<8x128xf32>
    %322 = math.exp %321 : vector<8x128xf32>
    %cst_114 = arith.constant 1.000000e+00 : f32
    %323 = vector.broadcast %cst_114 : f32 to vector<8x128xf32>
    %324 = arith.addf %323, %322 : vector<8x128xf32>
    %325 = arith.divf %323, %324 : vector<8x128xf32>
    %326 = vector.extract_strided_slice %319 {offsets = [0, 128], sizes = [8, 128], strides = [1, 1]} : vector<8x512xf32> to vector<8x128xf32>
    %327 = arith.negf %326 : vector<8x128xf32>
    %328 = math.exp %327 : vector<8x128xf32>
    %cst_115 = arith.constant 1.000000e+00 : f32
    %329 = vector.broadcast %cst_115 : f32 to vector<8x128xf32>
    %330 = arith.addf %329, %328 : vector<8x128xf32>
    %331 = arith.divf %329, %330 : vector<8x128xf32>
    %332 = vector.extract_strided_slice %319 {offsets = [0, 256], sizes = [8, 128], strides = [1, 1]} : vector<8x512xf32> to vector<8x128xf32>
    %333 = math.tanh %332 : vector<8x128xf32>
    %334 = vector.extract_strided_slice %319 {offsets = [0, 384], sizes = [8, 128], strides = [1, 1]} : vector<8x512xf32> to vector<8x128xf32>
    %335 = arith.negf %334 : vector<8x128xf32>
    %336 = math.exp %335 : vector<8x128xf32>
    %cst_116 = arith.constant 1.000000e+00 : f32
    %337 = vector.broadcast %cst_116 : f32 to vector<8x128xf32>
    %338 = arith.addf %337, %336 : vector<8x128xf32>
    %339 = arith.divf %337, %338 : vector<8x128xf32>
    %340 = arith.mulf %331, %313 : vector<8x128xf32>
    %341 = arith.mulf %325, %333 : vector<8x128xf32>
    %342 = arith.addf %340, %341 : vector<8x128xf32>
    %343 = math.tanh %342 : vector<8x128xf32>
    %344 = arith.mulf %339, %343 : vector<8x128xf32>
    %c24_117 = arith.constant 24 : index
    %c0_118 = arith.constant 0 : index
    %345 = vector.load %arg10[%c24_117, %c0_118] : memref<64x512xf32, #tpu.memory_space<vmem>>, vector<8x512xf32>
    %c0_119 = arith.constant 0 : index
    %c0_120 = arith.constant 0 : index
    %346 = vector.load %arg5[%c0_119, %c0_120] : memref<128x512xf32, #tpu.memory_space<vmem>>, vector<128x512xf32>
    %cst_121 = arith.constant dense<0.000000e+00> : vector<8x512xf32>
    %347 = tpu.matmul %344, %346, %cst_121 {dimension_numbers = #tpu.dot_dimension_numbers<[1], [0], [0], [1], [0, 0, 1, 1], [], []>} : vector<8x128xf32>, vector<128x512xf32>, vector<8x512xf32> -> vector<8x512xf32>
    %348 = arith.addf %345, %347 : vector<8x512xf32>
    %349 = vector.extract_strided_slice %348 {offsets = [0, 0], sizes = [8, 128], strides = [1, 1]} : vector<8x512xf32> to vector<8x128xf32>
    %350 = arith.negf %349 : vector<8x128xf32>
    %351 = math.exp %350 : vector<8x128xf32>
    %cst_122 = arith.constant 1.000000e+00 : f32
    %352 = vector.broadcast %cst_122 : f32 to vector<8x128xf32>
    %353 = arith.addf %352, %351 : vector<8x128xf32>
    %354 = arith.divf %352, %353 : vector<8x128xf32>
    %355 = vector.extract_strided_slice %348 {offsets = [0, 128], sizes = [8, 128], strides = [1, 1]} : vector<8x512xf32> to vector<8x128xf32>
    %356 = arith.negf %355 : vector<8x128xf32>
    %357 = math.exp %356 : vector<8x128xf32>
    %cst_123 = arith.constant 1.000000e+00 : f32
    %358 = vector.broadcast %cst_123 : f32 to vector<8x128xf32>
    %359 = arith.addf %358, %357 : vector<8x128xf32>
    %360 = arith.divf %358, %359 : vector<8x128xf32>
    %361 = vector.extract_strided_slice %348 {offsets = [0, 256], sizes = [8, 128], strides = [1, 1]} : vector<8x512xf32> to vector<8x128xf32>
    %362 = math.tanh %361 : vector<8x128xf32>
    %363 = vector.extract_strided_slice %348 {offsets = [0, 384], sizes = [8, 128], strides = [1, 1]} : vector<8x512xf32> to vector<8x128xf32>
    %364 = arith.negf %363 : vector<8x128xf32>
    %365 = math.exp %364 : vector<8x128xf32>
    %cst_124 = arith.constant 1.000000e+00 : f32
    %366 = vector.broadcast %cst_124 : f32 to vector<8x128xf32>
    %367 = arith.addf %366, %365 : vector<8x128xf32>
    %368 = arith.divf %366, %367 : vector<8x128xf32>
    %369 = arith.mulf %360, %342 : vector<8x128xf32>
    %370 = arith.mulf %354, %362 : vector<8x128xf32>
    %371 = arith.addf %369, %370 : vector<8x128xf32>
    %372 = math.tanh %371 : vector<8x128xf32>
    %373 = arith.mulf %368, %372 : vector<8x128xf32>
    %c32_125 = arith.constant 32 : index
    %c0_126 = arith.constant 0 : index
    %374 = vector.load %arg10[%c32_125, %c0_126] : memref<64x512xf32, #tpu.memory_space<vmem>>, vector<8x512xf32>
    %c0_127 = arith.constant 0 : index
    %c0_128 = arith.constant 0 : index
    %375 = vector.load %arg5[%c0_127, %c0_128] : memref<128x512xf32, #tpu.memory_space<vmem>>, vector<128x512xf32>
    %cst_129 = arith.constant dense<0.000000e+00> : vector<8x512xf32>
    %376 = tpu.matmul %373, %375, %cst_129 {dimension_numbers = #tpu.dot_dimension_numbers<[1], [0], [0], [1], [0, 0, 1, 1], [], []>} : vector<8x128xf32>, vector<128x512xf32>, vector<8x512xf32> -> vector<8x512xf32>
    %377 = arith.addf %374, %376 : vector<8x512xf32>
    %378 = vector.extract_strided_slice %377 {offsets = [0, 0], sizes = [8, 128], strides = [1, 1]} : vector<8x512xf32> to vector<8x128xf32>
    %379 = arith.negf %378 : vector<8x128xf32>
    %380 = math.exp %379 : vector<8x128xf32>
    %cst_130 = arith.constant 1.000000e+00 : f32
    %381 = vector.broadcast %cst_130 : f32 to vector<8x128xf32>
    %382 = arith.addf %381, %380 : vector<8x128xf32>
    %383 = arith.divf %381, %382 : vector<8x128xf32>
    %384 = vector.extract_strided_slice %377 {offsets = [0, 128], sizes = [8, 128], strides = [1, 1]} : vector<8x512xf32> to vector<8x128xf32>
    %385 = arith.negf %384 : vector<8x128xf32>
    %386 = math.exp %385 : vector<8x128xf32>
    %cst_131 = arith.constant 1.000000e+00 : f32
    %387 = vector.broadcast %cst_131 : f32 to vector<8x128xf32>
    %388 = arith.addf %387, %386 : vector<8x128xf32>
    %389 = arith.divf %387, %388 : vector<8x128xf32>
    %390 = vector.extract_strided_slice %377 {offsets = [0, 256], sizes = [8, 128], strides = [1, 1]} : vector<8x512xf32> to vector<8x128xf32>
    %391 = math.tanh %390 : vector<8x128xf32>
    %392 = vector.extract_strided_slice %377 {offsets = [0, 384], sizes = [8, 128], strides = [1, 1]} : vector<8x512xf32> to vector<8x128xf32>
    %393 = arith.negf %392 : vector<8x128xf32>
    %394 = math.exp %393 : vector<8x128xf32>
    %cst_132 = arith.constant 1.000000e+00 : f32
    %395 = vector.broadcast %cst_132 : f32 to vector<8x128xf32>
    %396 = arith.addf %395, %394 : vector<8x128xf32>
    %397 = arith.divf %395, %396 : vector<8x128xf32>
    %398 = arith.mulf %389, %371 : vector<8x128xf32>
    %399 = arith.mulf %383, %391 : vector<8x128xf32>
    %400 = arith.addf %398, %399 : vector<8x128xf32>
    %401 = math.tanh %400 : vector<8x128xf32>
    %402 = arith.mulf %397, %401 : vector<8x128xf32>
    %c40_133 = arith.constant 40 : index
    %c0_134 = arith.constant 0 : index
    %403 = vector.load %arg10[%c40_133, %c0_134] : memref<64x512xf32, #tpu.memory_space<vmem>>, vector<8x512xf32>
    %c0_135 = arith.constant 0 : index
    %c0_136 = arith.constant 0 : index
    %404 = vector.load %arg5[%c0_135, %c0_136] : memref<128x512xf32, #tpu.memory_space<vmem>>, vector<128x512xf32>
    %cst_137 = arith.constant dense<0.000000e+00> : vector<8x512xf32>
    %405 = tpu.matmul %402, %404, %cst_137 {dimension_numbers = #tpu.dot_dimension_numbers<[1], [0], [0], [1], [0, 0, 1, 1], [], []>} : vector<8x128xf32>, vector<128x512xf32>, vector<8x512xf32> -> vector<8x512xf32>
    %406 = arith.addf %403, %405 : vector<8x512xf32>
    %407 = vector.extract_strided_slice %406 {offsets = [0, 0], sizes = [8, 128], strides = [1, 1]} : vector<8x512xf32> to vector<8x128xf32>
    %408 = arith.negf %407 : vector<8x128xf32>
    %409 = math.exp %408 : vector<8x128xf32>
    %cst_138 = arith.constant 1.000000e+00 : f32
    %410 = vector.broadcast %cst_138 : f32 to vector<8x128xf32>
    %411 = arith.addf %410, %409 : vector<8x128xf32>
    %412 = arith.divf %410, %411 : vector<8x128xf32>
    %413 = vector.extract_strided_slice %406 {offsets = [0, 128], sizes = [8, 128], strides = [1, 1]} : vector<8x512xf32> to vector<8x128xf32>
    %414 = arith.negf %413 : vector<8x128xf32>
    %415 = math.exp %414 : vector<8x128xf32>
    %cst_139 = arith.constant 1.000000e+00 : f32
    %416 = vector.broadcast %cst_139 : f32 to vector<8x128xf32>
    %417 = arith.addf %416, %415 : vector<8x128xf32>
    %418 = arith.divf %416, %417 : vector<8x128xf32>
    %419 = vector.extract_strided_slice %406 {offsets = [0, 256], sizes = [8, 128], strides = [1, 1]} : vector<8x512xf32> to vector<8x128xf32>
    %420 = math.tanh %419 : vector<8x128xf32>
    %421 = vector.extract_strided_slice %406 {offsets = [0, 384], sizes = [8, 128], strides = [1, 1]} : vector<8x512xf32> to vector<8x128xf32>
    %422 = arith.negf %421 : vector<8x128xf32>
    %423 = math.exp %422 : vector<8x128xf32>
    %cst_140 = arith.constant 1.000000e+00 : f32
    %424 = vector.broadcast %cst_140 : f32 to vector<8x128xf32>
    %425 = arith.addf %424, %423 : vector<8x128xf32>
    %426 = arith.divf %424, %425 : vector<8x128xf32>
    %427 = arith.mulf %418, %400 : vector<8x128xf32>
    %428 = arith.mulf %412, %420 : vector<8x128xf32>
    %429 = arith.addf %427, %428 : vector<8x128xf32>
    %430 = math.tanh %429 : vector<8x128xf32>
    %431 = arith.mulf %426, %430 : vector<8x128xf32>
    %c48_141 = arith.constant 48 : index
    %c0_142 = arith.constant 0 : index
    %432 = vector.load %arg10[%c48_141, %c0_142] : memref<64x512xf32, #tpu.memory_space<vmem>>, vector<8x512xf32>
    %c0_143 = arith.constant 0 : index
    %c0_144 = arith.constant 0 : index
    %433 = vector.load %arg5[%c0_143, %c0_144] : memref<128x512xf32, #tpu.memory_space<vmem>>, vector<128x512xf32>
    %cst_145 = arith.constant dense<0.000000e+00> : vector<8x512xf32>
    %434 = tpu.matmul %431, %433, %cst_145 {dimension_numbers = #tpu.dot_dimension_numbers<[1], [0], [0], [1], [0, 0, 1, 1], [], []>} : vector<8x128xf32>, vector<128x512xf32>, vector<8x512xf32> -> vector<8x512xf32>
    %435 = arith.addf %432, %434 : vector<8x512xf32>
    %436 = vector.extract_strided_slice %435 {offsets = [0, 0], sizes = [8, 128], strides = [1, 1]} : vector<8x512xf32> to vector<8x128xf32>
    %437 = arith.negf %436 : vector<8x128xf32>
    %438 = math.exp %437 : vector<8x128xf32>
    %cst_146 = arith.constant 1.000000e+00 : f32
    %439 = vector.broadcast %cst_146 : f32 to vector<8x128xf32>
    %440 = arith.addf %439, %438 : vector<8x128xf32>
    %441 = arith.divf %439, %440 : vector<8x128xf32>
    %442 = vector.extract_strided_slice %435 {offsets = [0, 128], sizes = [8, 128], strides = [1, 1]} : vector<8x512xf32> to vector<8x128xf32>
    %443 = arith.negf %442 : vector<8x128xf32>
    %444 = math.exp %443 : vector<8x128xf32>
    %cst_147 = arith.constant 1.000000e+00 : f32
    %445 = vector.broadcast %cst_147 : f32 to vector<8x128xf32>
    %446 = arith.addf %445, %444 : vector<8x128xf32>
    %447 = arith.divf %445, %446 : vector<8x128xf32>
    %448 = vector.extract_strided_slice %435 {offsets = [0, 256], sizes = [8, 128], strides = [1, 1]} : vector<8x512xf32> to vector<8x128xf32>
    %449 = math.tanh %448 : vector<8x128xf32>
    %450 = vector.extract_strided_slice %435 {offsets = [0, 384], sizes = [8, 128], strides = [1, 1]} : vector<8x512xf32> to vector<8x128xf32>
    %451 = arith.negf %450 : vector<8x128xf32>
    %452 = math.exp %451 : vector<8x128xf32>
    %cst_148 = arith.constant 1.000000e+00 : f32
    %453 = vector.broadcast %cst_148 : f32 to vector<8x128xf32>
    %454 = arith.addf %453, %452 : vector<8x128xf32>
    %455 = arith.divf %453, %454 : vector<8x128xf32>
    %456 = arith.mulf %447, %429 : vector<8x128xf32>
    %457 = arith.mulf %441, %449 : vector<8x128xf32>
    %458 = arith.addf %456, %457 : vector<8x128xf32>
    %459 = math.tanh %458 : vector<8x128xf32>
    %460 = arith.mulf %455, %459 : vector<8x128xf32>
    %c56_149 = arith.constant 56 : index
    %c0_150 = arith.constant 0 : index
    %461 = vector.load %arg10[%c56_149, %c0_150] : memref<64x512xf32, #tpu.memory_space<vmem>>, vector<8x512xf32>
    %c0_151 = arith.constant 0 : index
    %c0_152 = arith.constant 0 : index
    %462 = vector.load %arg5[%c0_151, %c0_152] : memref<128x512xf32, #tpu.memory_space<vmem>>, vector<128x512xf32>
    %cst_153 = arith.constant dense<0.000000e+00> : vector<8x512xf32>
    %463 = tpu.matmul %460, %462, %cst_153 {dimension_numbers = #tpu.dot_dimension_numbers<[1], [0], [0], [1], [0, 0, 1, 1], [], []>} : vector<8x128xf32>, vector<128x512xf32>, vector<8x512xf32> -> vector<8x512xf32>
    %464 = arith.addf %461, %463 : vector<8x512xf32>
    %465 = vector.extract_strided_slice %464 {offsets = [0, 0], sizes = [8, 128], strides = [1, 1]} : vector<8x512xf32> to vector<8x128xf32>
    %466 = arith.negf %465 : vector<8x128xf32>
    %467 = math.exp %466 : vector<8x128xf32>
    %cst_154 = arith.constant 1.000000e+00 : f32
    %468 = vector.broadcast %cst_154 : f32 to vector<8x128xf32>
    %469 = arith.addf %468, %467 : vector<8x128xf32>
    %470 = arith.divf %468, %469 : vector<8x128xf32>
    %471 = vector.extract_strided_slice %464 {offsets = [0, 128], sizes = [8, 128], strides = [1, 1]} : vector<8x512xf32> to vector<8x128xf32>
    %472 = arith.negf %471 : vector<8x128xf32>
    %473 = math.exp %472 : vector<8x128xf32>
    %cst_155 = arith.constant 1.000000e+00 : f32
    %474 = vector.broadcast %cst_155 : f32 to vector<8x128xf32>
    %475 = arith.addf %474, %473 : vector<8x128xf32>
    %476 = arith.divf %474, %475 : vector<8x128xf32>
    %477 = vector.extract_strided_slice %464 {offsets = [0, 256], sizes = [8, 128], strides = [1, 1]} : vector<8x512xf32> to vector<8x128xf32>
    %478 = math.tanh %477 : vector<8x128xf32>
    %479 = vector.extract_strided_slice %464 {offsets = [0, 384], sizes = [8, 128], strides = [1, 1]} : vector<8x512xf32> to vector<8x128xf32>
    %480 = arith.negf %479 : vector<8x128xf32>
    %481 = math.exp %480 : vector<8x128xf32>
    %cst_156 = arith.constant 1.000000e+00 : f32
    %482 = vector.broadcast %cst_156 : f32 to vector<8x128xf32>
    %483 = arith.addf %482, %481 : vector<8x128xf32>
    %484 = arith.divf %482, %483 : vector<8x128xf32>
    %485 = arith.mulf %476, %458 : vector<8x128xf32>
    %486 = arith.mulf %470, %478 : vector<8x128xf32>
    %487 = arith.addf %485, %486 : vector<8x128xf32>
    %488 = math.tanh %487 : vector<8x128xf32>
    %489 = arith.mulf %484, %488 : vector<8x128xf32>
    %c0_157 = arith.constant 0 : index
    %c0_158 = arith.constant 0 : index
    %490 = vector.load %arg7[%c0_157, %c0_158] : memref<128x1xf32, #tpu.memory_space<vmem>>, vector<128x1xf32>
    %cst_159 = arith.constant dense<0.000000e+00> : vector<8x1xf32>
    %491 = tpu.matmul %489, %490, %cst_159 {dimension_numbers = #tpu.dot_dimension_numbers<[1], [0], [0], [1], [0, 0, 1, 1], [], []>} : vector<8x128xf32>, vector<128x1xf32>, vector<8x1xf32> -> vector<8x1xf32>
    %c0_160 = arith.constant 0 : index
    %c0_161 = arith.constant 0 : index
    %492 = vector.load %arg8[%c0_160, %c0_161] : memref<1x1xf32, #tpu.memory_space<vmem>>, vector<1x1xf32>
    %493 = vector.broadcast %492 : vector<1x1xf32> to vector<8x1xf32>
    %494 = arith.addf %491, %493 : vector<8x1xf32>
    %c0_162 = arith.constant 0 : index
    %c0_163 = arith.constant 0 : index
    %495 = vector.load %arg9[%c0_162, %c0_163] : memref<8x1xf32, #tpu.memory_space<vmem>>, vector<8x1xf32>
    tpu.vector_store %arg9[%c0_162, %c0_163], %494 {strides = array<i32>} : memref<8x1xf32, #tpu.memory_space<vmem>>, vector<8x1xf32>,
    return
  }
}

</mosaic_0001>

<bundles_post_ra>
// kernel: tpu_custom_call.1
= control target key start
LH: loop header
LB: loop body
LE: loop exit
PB: predicated region body
PF: predicated region fallthrough
CT: control target
= control target key end

     0   :  { %s6473_s0 = inlined_call_operand.vmem [shape: f32[64,128], index: 0, kind: input, shape index: {}]   ;;  %s6474_s1 = inlined_call_operand.hbm [shape: f32[128,512], index: 1, kind: input, shape index: {}]   ;;  %s6475_s2 = inlined_call_operand.hbm [shape: f32[128,512], index: 2, kind: input, shape index: {}]   ;;  %s6476_s3 = inlined_call_operand.vmem [shape: f32[1,512], index: 3, kind: input, shape index: {}]   ;;  %s6477_s4 = inlined_call_operand.hbm [shape: f32[128,512], index: 4, kind: input, shape index: {}]   ;;  %s6478_s5 = inlined_call_operand.hbm [shape: f32[128,512], index: 5, kind: input, shape index: {}]   ;;  %s6479_s6 = inlined_call_operand.vmem [shape: f32[1,512], index: 6, kind: input, shape index: {}]   ;;  %s6480_s7 = inlined_call_operand.vmem [shape: f32[128,1], index: 7, kind: input, shape index: {}]   ;;  %s6481_s8 = inlined_call_operand.<no memory space> [shape: f32[1,1], index: 8, kind: input, shape index: {}]   ;;  %s6482_s9 = inlined_call_operand.vmem [shape: f32[8,1], index: 9, kind: output, shape index: {}]  }
   0x1   :  { %v14_v0 = vstv %s6481_s8 }
   0x2   :  { %15 = vst [vmem:[#allocation4] sm:$0x1] %v14_v0 }
   0x3   :  { %16 = vsyncpa [#allocation6], 0 }
   0x4   :  { %17 = vsyncpa [#allocation8], 0 }
   0x5   :  { %18 = vsyncpa [#allocation11], 0  ;;  %s38_s13 = sshll.u32 %s6475_s2, 4  ;;  %s4180_s14 = smov [#allocation7]   ;;  %s39_s13 = int_to_ptr.hbm [resolvable:$true] %s38_s13 }
   0x6   :  { %s40_s15 = sshll.u32 %s4180_s14, 4  ;;  %s25_s18 = sshll.u32 %s6474_s1, 4  ;;  %s41_s15 = int_to_ptr.vmem [resolvable:$true] %s40_s15  ;;  %s26_s18 = int_to_ptr.hbm [resolvable:$true] %s25_s18 }
   0x7   :  { %s4181_s19 = smov 512   ;;  %s4182_s20 = smov 32  }
   0x8   :  { %46 = dma.hbm_to_vmem [thread:$0]  %s39_s13, 8192, %s41_s15, [#allocation8], %s4181_s19, %s4181_s19, %s4182_s20  }
   0x9   :  { %s4183_s8 = smov [#allocation5]   ;;  %s53_s24 = sshll.u32 %s6477_s4, 4  ;;  %s54_s24 = int_to_ptr.hbm [resolvable:$true] %s53_s24 }
   0xa   :  { %s27_s21 = sshll.u32 %s4183_s8, 4  ;;  %s66_s26 = sshll.u32 %s6478_s5, 4  ;;  %s28_s21 = int_to_ptr.vmem [resolvable:$true] %s27_s21  ;;  %s67_s26 = int_to_ptr.hbm [resolvable:$true] %s66_s26 }
   0xb   :  { %33 = dma.hbm_to_vmem [thread:$0]  %s26_s18, 8192, %s28_s21, [#allocation6], %s4181_s19, %s4181_s19, %s4182_s20  }
   0xc   :  { %s4184_s27 = smov [#allocation9]   ;;  %s4185_s1 = smov [#allocation10]  }
   0xd   :  { %s55_s28 = sshll.u32 %s4184_s27, 4  ;;  %s68_s29 = sshll.u32 %s4185_s1, 4  ;;  %s56_s28 = int_to_ptr.vmem [resolvable:$true] %s55_s28  ;;  %s69_s29 = int_to_ptr.vmem [resolvable:$true] %s68_s29 }
   0xe   :  { %61 = dma.hbm_to_vmem [thread:$0]  %s54_s24, 8192, %s56_s28, [#allocation8], %s4181_s19, %s4181_s19, %s4182_s20  }
   0xf   :  { %74 = dma.hbm_to_vmem [thread:$0]  %s67_s26, 8192, %s69_s29, [#allocation11], %s4181_s19, %s4181_s19, %s4182_s20  }
  0x10   :  { %4174 = dma.done.wait [#allocation6], 8192  }
  0x11   :  { %4175 = vsyncadd [#allocation6], 4294959104 }
  0x12   :  { %4176 = dma.done.wait [#allocation8], 16384  }
  0x13   :  { %4177 = vsyncadd [#allocation8], 4294950912 }
  0x14   :  { %4178 = dma.done.wait [#allocation11], 8192  }
  0x15   :  { %4179 = vsyncadd [#allocation11], 4294959104  ;;  %v165_v1 = vld [vmem:[#allocation5 + $0x1e0] sm:$0xff]  ;;  %v166_v2 = vld [vmem:[#allocation5 + $0x1e8] sm:$0xff] }
  0x16   :  { %v167_v3 = vld [vmem:[#allocation5 + $0x1f0] sm:$0xff]  ;;  %179 = vmatpush.msra.mxu0 %v165_v1  ;;  %220 = vmatpush.msra.mxu1 %v166_v2  ;;  %v168_v4 = vld [vmem:[#allocation5 + $0x1f8] sm:$0xff]  ;;  %v161_v5 = vld [vmem:[#allocation5 + $0x1c0] sm:$0xff] }
  0x17   :  { %v162_v6 = vld [vmem:[#allocation5 + $0x1c8] sm:$0xff]  ;;  %261 = vmatpush.msra.mxu2 %v167_v3  ;;  %302 = vmatpush.msra.mxu3 %v168_v4  ;;  %v163_v7 = vld [vmem:[#allocation5 + $0x1d0] sm:$0xff]  ;;  %v164_v8 = vld [vmem:[#allocation5 + $0x1d8] sm:$0xff] }
  0x18   :  { %v157_v9 = vld [vmem:[#allocation5 + $0x1a0] sm:$0xff]  ;;  %180 = vmatpush.msra.mxu0 %v161_v5  ;;  %221 = vmatpush.msra.mxu1 %v162_v6  ;;  %v158_v10 = vld [vmem:[#allocation5 + $0x1a8] sm:$0xff]  ;;  %v159_v11 = vld [vmem:[#allocation5 + $0x1b0] sm:$0xff] }
  0x19   :  { %v160_v12 = vld [vmem:[#allocation5 + $0x1b8] sm:$0xff]  ;;  %262 = vmatpush.msra.mxu2 %v163_v7  ;;  %303 = vmatpush.msra.mxu3 %v164_v8  ;;  %v153_v13 = vld [vmem:[#allocation5 + $0x180] sm:$0xff]  ;;  %v154_v14 = vld [vmem:[#allocation5 + $0x188] sm:$0xff] }
  0x1a   :  { %181 = vmatpush.msra.mxu0 %v157_v9  ;;  %222 = vmatpush.msra.mxu1 %v158_v10  ;;  %v155_v15 = vld [vmem:[#allocation5 + $0x190] sm:$0xff]  ;;  %v156_v16 = vld [vmem:[#allocation5 + $0x198] sm:$0xff]  ;;  %v149_v17 = vld [vmem:[#allocation5 + $0x160] sm:$0xff] }
  0x1b   :  { %263 = vmatpush.msra.mxu2 %v159_v11  ;;  %304 = vmatpush.msra.mxu3 %v160_v12  ;;  %v150_v18 = vld [vmem:[#allocation5 + $0x168] sm:$0xff]  ;;  %v151_v19 = vld [vmem:[#allocation5 + $0x170] sm:$0xff]  ;;  %v152_v20 = vld [vmem:[#allocation5 + $0x178] sm:$0xff] }
  0x1c   :  { %182 = vmatpush.msra.mxu0 %v153_v13  ;;  %223 = vmatpush.msra.mxu1 %v154_v14  ;;  %v145_v21 = vld [vmem:[#allocation5 + $0x140] sm:$0xff]  ;;  %v146_v22 = vld [vmem:[#allocation5 + $0x148] sm:$0xff]  ;;  %v147_v23 = vld [vmem:[#allocation5 + $0x150] sm:$0xff] }
  0x1d   :  { %264 = vmatpush.msra.mxu2 %v155_v15  ;;  %305 = vmatpush.msra.mxu3 %v156_v16  ;;  %v148_v24 = vld [vmem:[#allocation5 + $0x158] sm:$0xff]  ;;  %v141_v25 = vld [vmem:[#allocation5 + $0x120] sm:$0xff]  ;;  %v142_v26 = vld [vmem:[#allocation5 + $0x128] sm:$0xff] }
  0x1e   :  { %183 = vmatpush.msra.mxu0 %v149_v17  ;;  %224 = vmatpush.msra.mxu1 %v150_v18  ;;  %v143_v27 = vld [vmem:[#allocation5 + $0x130] sm:$0xff]  ;;  %v144_v28 = vld [vmem:[#allocation5 + $0x138] sm:$0xff]  ;;  %v137_v29 = vld [vmem:[#allocation5 + $0x100] sm:$0xff] }
  0x1f   :  { %265 = vmatpush.msra.mxu2 %v151_v19  ;;  %306 = vmatpush.msra.mxu3 %v152_v20  ;;  %v138_v30 = vld [vmem:[#allocation5 + $0x108] sm:$0xff]  ;;  %v139_v31 = vld [vmem:[#allocation5 + $0x110] sm:$0xff]  ;;  %v140_v32 = vld [vmem:[#allocation5 + $0x118] sm:$0xff] }
  0x20   :  { %184 = vmatpush.msra.mxu0 %v145_v21  ;;  %225 = vmatpush.msra.mxu1 %v146_v22  ;;  %v133_v33 = vld [vmem:[#allocation5 + $0xe0] sm:$0xff]  ;;  %v134_v34 = vld [vmem:[#allocation5 + $0xe8] sm:$0xff]  ;;  %v135_v35 = vld [vmem:[#allocation5 + $0xf0] sm:$0xff] }
  0x21   :  { %266 = vmatpush.msra.mxu2 %v147_v23  ;;  %307 = vmatpush.msra.mxu3 %v148_v24  ;;  %v136_v36 = vld [vmem:[#allocation5 + $0xf8] sm:$0xff]  ;;  %v129_v37 = vld [vmem:[#allocation5 + $0xc0] sm:$0xff]  ;;  %v130_v38 = vld [vmem:[#allocation5 + $0xc8] sm:$0xff] }
  0x22   :  { %185 = vmatpush.msra.mxu0 %v141_v25  ;;  %226 = vmatpush.msra.mxu1 %v142_v26  ;;  %v131_v39 = vld [vmem:[#allocation5 + $0xd0] sm:$0xff]  ;;  %v132_v40 = vld [vmem:[#allocation5 + $0xd8] sm:$0xff]  ;;  %v125_v41 = vld [vmem:[#allocation5 + $0xa0] sm:$0xff] }
  0x23   :  { %267 = vmatpush.msra.mxu2 %v143_v27  ;;  %308 = vmatpush.msra.mxu3 %v144_v28  ;;  %v126_v42 = vld [vmem:[#allocation5 + $0xa8] sm:$0xff]  ;;  %v127_v43 = vld [vmem:[#allocation5 + $0xb0] sm:$0xff]  ;;  %v128_v44 = vld [vmem:[#allocation5 + $0xb8] sm:$0xff] }
  0x24   :  { %186 = vmatpush.msra.mxu0 %v137_v29  ;;  %227 = vmatpush.msra.mxu1 %v138_v30  ;;  %v121_v45 = vld [vmem:[#allocation5 + $0x80] sm:$0xff]  ;;  %v122_v46 = vld [vmem:[#allocation5 + $0x88] sm:$0xff]  ;;  %v123_v47 = vld [vmem:[#allocation5 + $0x90] sm:$0xff] }
  0x25   :  { %268 = vmatpush.msra.mxu2 %v139_v31  ;;  %309 = vmatpush.msra.mxu3 %v140_v32  ;;  %v124_v48 = vld [vmem:[#allocation5 + $0x98] sm:$0xff]  ;;  %v117_v49 = vld [vmem:[#allocation5 + $0x60] sm:$0xff]  ;;  %v118_v50 = vld [vmem:[#allocation5 + $0x68] sm:$0xff] }
  0x26   :  { %187 = vmatpush.msra.mxu0 %v133_v33  ;;  %228 = vmatpush.msra.mxu1 %v134_v34  ;;  %v119_v51 = vld [vmem:[#allocation5 + $0x70] sm:$0xff]  ;;  %v120_v52 = vld [vmem:[#allocation5 + $0x78] sm:$0xff]  ;;  %v113_v53 = vld [vmem:[#allocation5 + $0x40] sm:$0xff] }
  0x27   :  { %269 = vmatpush.msra.mxu2 %v135_v35  ;;  %310 = vmatpush.msra.mxu3 %v136_v36  ;;  %v114_v54 = vld [vmem:[#allocation5 + $0x48] sm:$0xff]  ;;  %v115_v55 = vld [vmem:[#allocation5 + $0x50] sm:$0xff]  ;;  %v116_v56 = vld [vmem:[#allocation5 + $0x58] sm:$0xff] }
  0x28   :  { %188 = vmatpush.msra.mxu0 %v129_v37  ;;  %229 = vmatpush.msra.mxu1 %v130_v38  ;;  %v109_v57 = vld [vmem:[#allocation5 + $0x20] sm:$0xff]  ;;  %v110_v58 = vld [vmem:[#allocation5 + $0x28] sm:$0xff]  ;;  %v111_v59 = vld [vmem:[#allocation5 + $0x30] sm:$0xff] }
  0x29   :  { %270 = vmatpush.msra.mxu2 %v131_v39  ;;  %311 = vmatpush.msra.mxu3 %v132_v40  ;;  %v112_v60 = vld [vmem:[#allocation5 + $0x38] sm:$0xff]  ;;  %v105_v61 = vld [vmem:[#allocation5] sm:$0xff]  ;;  %v106_v62 = vld [vmem:[#allocation5 + $0x8] sm:$0xff] }
  0x2a   :  { %189 = vmatpush.msra.mxu0 %v125_v41  ;;  %230 = vmatpush.msra.mxu1 %v126_v42  ;;  %v107_v63 = vld [vmem:[#allocation5 + $0x10] sm:$0xff]  ;;  %v108_v0 = vld [vmem:[#allocation5 + $0x18] sm:$0xff]  ;;  %v4255_v2 = vld [vmem:[#allocation7 + $0x1e0] sm:$0xff] }
  0x2b   :  { %271 = vmatpush.msra.mxu2 %v127_v43  ;;  %312 = vmatpush.msra.mxu3 %v128_v44  ;;  %v97_v1 = vld [vmem:[%s6473_s0] sm:$0xff]  ;;  %v4257_v3 = vld [vmem:[#allocation7 + $0x1e8] sm:$0xff]  ;;  %v4261_v5 = vld [vmem:[#allocation7 + $0x1f0] sm:$0xff] }
  0x2c   :  { %190 = vmatpush.msra.mxu0 %v121_v45  ;;  %231 = vmatpush.msra.mxu1 %v122_v46  ;;  %v4259_v4 = vld [vmem:[#allocation7 + $0x1f8] sm:$0xff]  ;;  %v4263_v6 = vld [vmem:[#allocation7 + $0x1c0] sm:$0xff]  ;;  %v4265_v7 = vld [vmem:[#allocation7 + $0x1c8] sm:$0xff] }
  0x2d   :  { %272 = vmatpush.msra.mxu2 %v123_v47  ;;  %313 = vmatpush.msra.mxu3 %v124_v48  ;;  %v4269_v8 = vld [vmem:[#allocation7 + $0x1d8] sm:$0xff]  ;;  %v4271_v9 = vld [vmem:[#allocation7 + $0x1d0] sm:$0xff]  ;;  %v4274_v10 = vld [vmem:[#allocation7 + $0x1a0] sm:$0xff] }
  0x2e   :  { %191 = vmatpush.msra.mxu0 %v117_v49  ;;  %232 = vmatpush.msra.mxu1 %v118_v50  ;;  %v4276_v11 = vld [vmem:[#allocation7 + $0x1a8] sm:$0xff]  ;;  %v4281_v12 = vld [vmem:[#allocation7 + $0x1b8] sm:$0xff]  ;;  %v4283_v13 = vld [vmem:[#allocation7 + $0x1b0] sm:$0xff] }
  0x2f   :  { %273 = vmatpush.msra.mxu2 %v119_v51  ;;  %314 = vmatpush.msra.mxu3 %v120_v52  ;;  %v98_v14 = vld [vmem:[%s6473_s0 + $0x8] sm:$0xff]  ;;  %v4298_v17 = vld [vmem:[#allocation7 + $0x198] sm:$0xff]  ;;  %v4300_v18 = vld [vmem:[#allocation7 + $0x190] sm:$0xff] }
  0x30   :  { %192 = vmatpush.msra.mxu0 %v113_v53  ;;  %233 = vmatpush.msra.mxu1 %v114_v54  ;;  %v4292_v15 = vld [vmem:[#allocation7 + $0x180] sm:$0xff]  ;;  %v4294_v16 = vld [vmem:[#allocation7 + $0x188] sm:$0xff]  ;;  %v4308_v21 = vld [vmem:[#allocation7 + $0x178] sm:$0xff] }
  0x31   :  { %274 = vmatpush.msra.mxu2 %v115_v55  ;;  %315 = vmatpush.msra.mxu3 %v116_v56  ;;  %v4302_v19 = vld [vmem:[#allocation7 + $0x160] sm:$0xff]  ;;  %v4304_v20 = vld [vmem:[#allocation7 + $0x168] sm:$0xff]  ;;  %v4310_v22 = vld [vmem:[#allocation7 + $0x170] sm:$0xff] }
  0x32   :  { %193 = vmatpush.msra.mxu0 %v109_v57  ;;  %234 = vmatpush.msra.mxu1 %v110_v58  ;;  %v4313_v23 = vld [vmem:[#allocation7 + $0x140] sm:$0xff]  ;;  %v4315_v24 = vld [vmem:[#allocation7 + $0x148] sm:$0xff]  ;;  %v4320_v25 = vld [vmem:[#allocation7 + $0x158] sm:$0xff] }
  0x33   :  { %275 = vmatpush.msra.mxu2 %v111_v59  ;;  %316 = vmatpush.msra.mxu3 %v112_v60  ;;  %v4322_v26 = vld [vmem:[#allocation7 + $0x150] sm:$0xff]  ;;  %v4331_v28 = vld [vmem:[#allocation7 + $0x120] sm:$0xff]  ;;  %v4333_v29 = vld [vmem:[#allocation7 + $0x128] sm:$0xff] }
  0x34   :  { %194 = vmatpush.msra.mxu0 %v105_v61  ;;  %235 = vmatpush.msra.mxu1 %v106_v62  ;;  %v99_v27 = vld [vmem:[%s6473_s0 + $0x10] sm:$0xff]  ;;  %v4337_v30 = vld [vmem:[#allocation7 + $0x138] sm:$0xff]  ;;  %v4341_v32 = vld [vmem:[#allocation7 + $0x100] sm:$0xff] }
  0x35   :  { %276 = vmatpush.msra.mxu2 %v107_v63  ;;  %317 = vmatpush.msra.mxu3 %v108_v0  ;;  %v4339_v31 = vld [vmem:[#allocation7 + $0x130] sm:$0xff]  ;;  %v4343_v33 = vld [vmem:[#allocation7 + $0x108] sm:$0xff]  ;;  %v4347_v34 = vld [vmem:[#allocation7 + $0x118] sm:$0xff] }
  0x36   :  { %195 = vmatmul.f32.vlgmr.msra.gmra.mxu0 %v97_v1  ;;  %236 = vmatmul.f32.vlgmr.msra.gmra.mxu1 %v97_v1  ;;  %v4349_v35 = vld [vmem:[#allocation7 + $0x110] sm:$0xff]  ;;  %v4352_v36 = vld [vmem:[#allocation7 + $0xe0] sm:$0xff]  ;;  %v4354_v37 = vld [vmem:[#allocation7 + $0xe8] sm:$0xff] }
  0x37   :  { %277 = vmatmul.f32.vlgmr.msra.gmra.mxu2 %v97_v1  ;;  %318 = vmatmul.f32.vlgmr.msra.gmra.mxu3 %v97_v1  ;;  %v4359_v38 = vld [vmem:[#allocation7 + $0xf8] sm:$0xff]  ;;  %v4361_v39 = vld [vmem:[#allocation7 + $0xf0] sm:$0xff]  ;;  %v4370_v41 = vld [vmem:[#allocation7 + $0xc0] sm:$0xff] }
  0x38   :  { %443 = vmatpush.msrb.mxu0 %v4255_v2  ;;  %463 = vmatpush.msrb.mxu1 %v4257_v3  ;;  %v100_v40 = vld [vmem:[%s6473_s0 + $0x18] sm:$0xff]  ;;  %v4372_v42 = vld [vmem:[#allocation7 + $0xc8] sm:$0xff]  ;;  %v4380_v45 = vld [vmem:[#allocation7 + $0xa0] sm:$0xff] }
  0x39   :  { %503 = vmatpush.msrb.mxu3 %v4259_v4  ;;  %483 = vmatpush.msrb.mxu2 %v4261_v5  ;;  %v4376_v43 = vld [vmem:[#allocation7 + $0xd8] sm:$0xff]  ;;  %v4378_v44 = vld [vmem:[#allocation7 + $0xd0] sm:$0xff]  ;;  %v4382_v46 = vld [vmem:[#allocation7 + $0xa8] sm:$0xff] }
  0x3a   :  { %444 = vmatpush.msrb.mxu0 %v4263_v6  ;;  %464 = vmatpush.msrb.mxu1 %v4265_v7  ;;  %v4386_v47 = vld [vmem:[#allocation7 + $0xb8] sm:$0xff]  ;;  %v4388_v48 = vld [vmem:[#allocation7 + $0xb0] sm:$0xff]  ;;  %v4391_v49 = vld [vmem:[#allocation7 + $0x80] sm:$0xff] }
  0x3b   :  { %504 = vmatpush.msrb.mxu3 %v4269_v8  ;;  %484 = vmatpush.msrb.mxu2 %v4271_v9  ;;  %v4393_v50 = vld [vmem:[#allocation7 + $0x88] sm:$0xff]  ;;  %v4398_v51 = vld [vmem:[#allocation7 + $0x98] sm:$0xff]  ;;  %v4400_v52 = vld [vmem:[#allocation7 + $0x90] sm:$0xff] }
  0x3c   :  { %445 = vmatpush.msrb.mxu0 %v4274_v10  ;;  %465 = vmatpush.msrb.mxu1 %v4276_v11  ;;  %v101_v53 = vld [vmem:[%s6473_s0 + $0x20] sm:$0xff]  ;;  %v4411_v55 = vld [vmem:[#allocation7 + $0x68] sm:$0xff]  ;;  %v4417_v57 = vld [vmem:[#allocation7 + $0x70] sm:$0xff] }
  0x3d   :  { %505 = vmatpush.msrb.mxu3 %v4281_v12  ;;  %485 = vmatpush.msrb.mxu2 %v4283_v13  ;;  %v4409_v54 = vld [vmem:[#allocation7 + $0x60] sm:$0xff]  ;;  %v4415_v56 = vld [vmem:[#allocation7 + $0x78] sm:$0xff]  ;;  %v4421_v59 = vld [vmem:[#allocation7 + $0x48] sm:$0xff] }
  0x3e   :  { %198 = vmatmul.f32.gmra.mxu0 %v98_v14  ;;  %239 = vmatmul.f32.gmra.mxu1 %v98_v14  ;;  %v4419_v58 = vld [vmem:[#allocation7 + $0x40] sm:$0xff]  ;;  %6677 = vst [vmem:[#allocation15_spill] sm:$0xff] %v4421_v59  ;;  %v4425_v60 = vld [vmem:[#allocation7 + $0x58] sm:$0xff]  ;;  %v4427_v61 = vld [vmem:[#allocation7 + $0x50] sm:$0xff] }
  0x3f   :  { %280 = vmatmul.f32.gmra.mxu2 %v98_v14  ;;  %321 = vmatmul.f32.gmra.mxu3 %v98_v14  ;;  %v4430_v62 = vld [vmem:[#allocation7 + $0x20] sm:$0xff]  ;;  %v4432_v63 = vld [vmem:[#allocation7 + $0x28] sm:$0xff]  ;;  %v4437_v0 = vld [vmem:[#allocation7 + $0x30] sm:$0xff] }
  0x40   :  { %446 = vmatpush.msrb.mxu0 %v4292_v15  ;;  %466 = vmatpush.msrb.mxu1 %v4294_v16  ;;  %v4439_v1 = vld [vmem:[#allocation7 + $0x38] sm:$0xff]  ;;  %v102_v14 = vld [vmem:[%s6473_s0 + $0x28] sm:$0xff] }
  0x41   :  { %506 = vmatpush.msrb.mxu3 %v4298_v17  ;;  %486 = vmatpush.msrb.mxu2 %v4300_v18  ;;  %6678 = vst [vmem:[#allocation16_spill] sm:$0xff] %v4439_v1 }
  0x42   :  { %447 = vmatpush.msrb.mxu0 %v4302_v19  ;;  %467 = vmatpush.msrb.mxu1 %v4304_v20 }
  0x43   :  { %507 = vmatpush.msrb.mxu3 %v4308_v21  ;;  %487 = vmatpush.msrb.mxu2 %v4310_v22 }
  0x44   :  { %448 = vmatpush.msrb.mxu0 %v4313_v23  ;;  %468 = vmatpush.msrb.mxu1 %v4315_v24 }
  0x45   :  { %508 = vmatpush.msrb.mxu3 %v4320_v25  ;;  %488 = vmatpush.msrb.mxu2 %v4322_v26 }
  0x46   :  { %201 = vmatmul.f32.gmra.mxu0 %v99_v27  ;;  %242 = vmatmul.f32.gmra.mxu1 %v99_v27 }
  0x47   :  { %283 = vmatmul.f32.gmra.mxu2 %v99_v27  ;;  %324 = vmatmul.f32.gmra.mxu3 %v99_v27  ;;  %v4448_v27 = vld [vmem:[#allocation7] sm:$0xff] }
  0x48   :  { %449 = vmatpush.msrb.mxu0 %v4331_v28  ;;  %469 = vmatpush.msrb.mxu1 %v4333_v29 }
  0x49   :  { %509 = vmatpush.msrb.mxu3 %v4337_v30  ;;  %489 = vmatpush.msrb.mxu2 %v4339_v31 }
  0x4a   :  { %450 = vmatpush.msrb.mxu0 %v4341_v32  ;;  %470 = vmatpush.msrb.mxu1 %v4343_v33 }
  0x4b   :  { %510 = vmatpush.msrb.mxu3 %v4347_v34  ;;  %490 = vmatpush.msrb.mxu2 %v4349_v35 }
  0x4c   :  { %451 = vmatpush.msrb.mxu0 %v4352_v36  ;;  %471 = vmatpush.msrb.mxu1 %v4354_v37 }
  0x4d   :  { %511 = vmatpush.msrb.mxu3 %v4359_v38  ;;  %491 = vmatpush.msrb.mxu2 %v4361_v39 }
  0x4e   :  { %204 = vmatmul.f32.gmra.mxu0 %v100_v40  ;;  %245 = vmatmul.f32.gmra.mxu1 %v100_v40 }
  0x4f   :  { %286 = vmatmul.f32.gmra.mxu2 %v100_v40  ;;  %327 = vmatmul.f32.gmra.mxu3 %v100_v40  ;;  %v4450_v40 = vld [vmem:[#allocation7 + $0x8] sm:$0xff] }
  0x50   :  { %452 = vmatpush.msrb.mxu0 %v4370_v41  ;;  %472 = vmatpush.msrb.mxu1 %v4372_v42 }
  0x51   :  { %512 = vmatpush.msrb.mxu3 %v4376_v43  ;;  %492 = vmatpush.msrb.mxu2 %v4378_v44 }
  0x52   :  { %453 = vmatpush.msrb.mxu0 %v4380_v45  ;;  %473 = vmatpush.msrb.mxu1 %v4382_v46 }
  0x53   :  { %513 = vmatpush.msrb.mxu3 %v4386_v47  ;;  %493 = vmatpush.msrb.mxu2 %v4388_v48 }
  0x54   :  { %454 = vmatpush.msrb.mxu0 %v4391_v49  ;;  %474 = vmatpush.msrb.mxu1 %v4393_v50 }
  0x55   :  { %514 = vmatpush.msrb.mxu3 %v4398_v51  ;;  %494 = vmatpush.msrb.mxu2 %v4400_v52 }
  0x56   :  { %207 = vmatmul.f32.gmra.mxu0 %v101_v53  ;;  %248 = vmatmul.f32.gmra.mxu1 %v101_v53 }
  0x57   :  { %289 = vmatmul.f32.gmra.mxu2 %v101_v53  ;;  %330 = vmatmul.f32.gmra.mxu3 %v101_v53  ;;  %v4454_v53 = vld [vmem:[#allocation7 + $0x10] sm:$0xff] }
  0x58   :  { %455 = vmatpush.msrb.mxu0 %v4409_v54  ;;  %475 = vmatpush.msrb.mxu1 %v4411_v55 }
  0x59   :  { %515 = vmatpush.msrb.mxu3 %v4415_v56  ;;  %495 = vmatpush.msrb.mxu2 %v4417_v57 }
  0x5a   :  { %456 = vmatpush.msrb.mxu0 %v4419_v58  ;;  %476 = vmatpush.msrb.mxu1 %v4421_v59  ;;  %v4456_v59 = vld [vmem:[#allocation7 + $0x18] sm:$0xff] }
  0x5b   :  { %516 = vmatpush.msrb.mxu3 %v4425_v60  ;;  %496 = vmatpush.msrb.mxu2 %v4427_v61 }
  0x5c   :  { %457 = vmatpush.msrb.mxu0 %v4430_v62  ;;  %477 = vmatpush.msrb.mxu1 %v4432_v63 }
  0x5d   :  { %497 = vmatpush.msrb.mxu2 %v4437_v0  ;;  %517 = vmatpush.msrb.mxu3 %v4439_v1  ;;  %v103_v1 = vld [vmem:[%s6473_s0 + $0x30] sm:$0xff] }
  0x5e   :  { %210 = vmatmul.f32.gmra.mxu0 %v102_v14  ;;  %251 = vmatmul.f32.gmra.mxu1 %v102_v14 }
  0x5f   :  { %292 = vmatmul.f32.gmra.mxu2 %v102_v14  ;;  %333 = vmatmul.f32.gmra.mxu3 %v102_v14  ;;  %v104_v14 = vld [vmem:[%s6473_s0 + $0x38] sm:$0xff] }
  0x60   :  { %458 = vmatpush.msrb.mxu0 %v4448_v27  ;;  %478 = vmatpush.msrb.mxu1 %v4450_v40 }
  0x61   :  { %498 = vmatpush.msrb.mxu2 %v4454_v53  ;;  %518 = vmatpush.msrb.mxu3 %v4456_v59 }
  0x62   :  { %659 = vmatpush.msra.mxu0 %v4255_v2  ;;  %679 = vmatpush.msra.mxu1 %v4257_v3 }
  0x63   :  { %699 = vmatpush.msra.mxu2 %v4261_v5  ;;  %719 = vmatpush.msra.mxu3 %v4259_v4 }
  0x64   :  { %660 = vmatpush.msra.mxu0 %v4263_v6  ;;  %680 = vmatpush.msra.mxu1 %v4265_v7 }
  0x65   :  { %700 = vmatpush.msra.mxu2 %v4271_v9  ;;  %720 = vmatpush.msra.mxu3 %v4269_v8 }
  0x66   :  { %213 = vmatmul.f32.gmra.mxu0 %v103_v1  ;;  %254 = vmatmul.f32.gmra.mxu1 %v103_v1 }
  0x67   :  { %295 = vmatmul.f32.gmra.mxu2 %v103_v1  ;;  %336 = vmatmul.f32.gmra.mxu3 %v103_v1  ;;  %v6487_v1 = vmov 0.0  }
  0x68   :  { %661 = vmatpush.msra.mxu0 %v4274_v10  ;;  %681 = vmatpush.msra.mxu1 %v4276_v11 }
  0x69   :  { %701 = vmatpush.msra.mxu2 %v4283_v13  ;;  %721 = vmatpush.msra.mxu3 %v4281_v12 }
  0x6a   :  { %662 = vmatpush.msra.mxu0 %v4292_v15  ;;  %682 = vmatpush.msra.mxu1 %v4294_v16 }
  0x6b   :  { %702 = vmatpush.msra.mxu2 %v4300_v18  ;;  %722 = vmatpush.msra.mxu3 %v4298_v17 }
  0x6c   :  { %663 = vmatpush.msra.mxu0 %v4302_v19  ;;  %683 = vmatpush.msra.mxu1 %v4304_v20 }
  0x6d   :  { %703 = vmatpush.msra.mxu2 %v4310_v22  ;;  %723 = vmatpush.msra.mxu3 %v4308_v21 }
  0x6e   :  { %216 = vmatmul.f32.gmra.mxu0 %v104_v14  ;;  %257 = vmatmul.f32.gmra.mxu1 %v104_v14 }
  0x6f   :  { %298 = vmatmul.f32.gmra.mxu2 %v104_v14  ;;  %339 = vmatmul.f32.gmra.mxu3 %v104_v14  ;;  %v6679_v14 = vld [vmem:[#allocation15_spill] sm:$0xff] }
  0x70   :  { %664 = vmatpush.msra.mxu0 %v4313_v23  ;;  %684 = vmatpush.msra.mxu1 %v4315_v24 }
  0x71   :  { %704 = vmatpush.msra.mxu2 %v4322_v26  ;;  %724 = vmatpush.msra.mxu3 %v4320_v25 }
  0x72   :  { %665 = vmatpush.msra.mxu0 %v4331_v28  ;;  %685 = vmatpush.msra.mxu1 %v4333_v29 }
  0x73   :  { %705 = vmatpush.msra.mxu2 %v4339_v31  ;;  %725 = vmatpush.msra.mxu3 %v4337_v30 }
  0x74   :  { %666 = vmatpush.msra.mxu0 %v4341_v32  ;;  %686 = vmatpush.msra.mxu1 %v4343_v33 }
  0x75   :  { %706 = vmatpush.msra.mxu2 %v4349_v35  ;;  %726 = vmatpush.msra.mxu3 %v4347_v34 }
  0x76   :  { %459 = vmatmul.f32.vlgmr.msrb.gmra.mxu0 %v6487_v1  ;;  %479 = vmatmul.f32.vlgmr.msrb.gmra.mxu1 %v6487_v1 }
  0x77   :  { %499 = vmatmul.f32.vlgmr.msrb.gmra.mxu2 %v6487_v1  ;;  %519 = vmatmul.f32.vlgmr.msrb.gmra.mxu3 %v6487_v1  ;;  %v6680_v1 = vld [vmem:[#allocation16_spill] sm:$0xff] }
  0x78   :  { %667 = vmatpush.msra.mxu0 %v4352_v36  ;;  %687 = vmatpush.msra.mxu1 %v4354_v37 }
  0x79   :  { %707 = vmatpush.msra.mxu2 %v4361_v39  ;;  %727 = vmatpush.msra.mxu3 %v4359_v38 }
  0x7a   :  { %668 = vmatpush.msra.mxu0 %v4370_v41  ;;  %688 = vmatpush.msra.mxu1 %v4372_v42 }
  0x7b   :  { %708 = vmatpush.msra.mxu2 %v4378_v44  ;;  %728 = vmatpush.msra.mxu3 %v4376_v43 }
  0x7c   :  { %669 = vmatpush.msra.mxu0 %v4380_v45  ;;  %689 = vmatpush.msra.mxu1 %v4382_v46 }
  0x7d   :  { %709 = vmatpush.msra.mxu2 %v4388_v48  ;;  %729 = vmatpush.msra.mxu3 %v4386_v47 }
  0x7e   :  { %670 = vmatpush.msra.mxu0 %v4391_v49  ;;  %690 = vmatpush.msra.mxu1 %v4393_v50 }
  0x7f   :  { %710 = vmatpush.msra.mxu2 %v4400_v52  ;;  %730 = vmatpush.msra.mxu3 %v4398_v51 }
  0x80   :  { %671 = vmatpush.msra.mxu0 %v4409_v54  ;;  %691 = vmatpush.msra.mxu1 %v4411_v55 }
  0x81   :  { %711 = vmatpush.msra.mxu2 %v4417_v57  ;;  %731 = vmatpush.msra.mxu3 %v4415_v56 }
  0x82   :  { %672 = vmatpush.msra.mxu0 %v4419_v58  ;;  %692 = vmatpush.msra.mxu1 %v6679_v14 }
  0x83   :  { %712 = vmatpush.msra.mxu2 %v4427_v61  ;;  %732 = vmatpush.msra.mxu3 %v4425_v60 }
  0x84   :  { %673 = vmatpush.msra.mxu0 %v4430_v62  ;;  %693 = vmatpush.msra.mxu1 %v4432_v63 }
  0x85   :  { %713 = vmatpush.msra.mxu2 %v4437_v0  ;;  %733 = vmatpush.msra.mxu3 %v6680_v1 }
  0x86   :  { %674 = vmatpush.msra.mxu0 %v4448_v27  ;;  %694 = vmatpush.msra.mxu1 %v4450_v40 }
  0x87   :  { %714 = vmatpush.msra.mxu2 %v4454_v53  ;;  %734 = vmatpush.msra.mxu3 %v4456_v59 }
  0x88   :  { %875 = vmatpush.msrb.mxu0 %v4255_v2  ;;  %895 = vmatpush.msrb.mxu1 %v4257_v3 }
  0x89   :  { %915 = vmatpush.msrb.mxu2 %v4261_v5  ;;  %935 = vmatpush.msrb.mxu3 %v4259_v4 }
  0x8a   :  { %876 = vmatpush.msrb.mxu0 %v4263_v6  ;;  %896 = vmatpush.msrb.mxu1 %v4265_v7 }
  0x8b   :  { %916 = vmatpush.msrb.mxu2 %v4271_v9  ;;  %936 = vmatpush.msrb.mxu3 %v4269_v8 }
  0x8c   :  { %877 = vmatpush.msrb.mxu0 %v4274_v10  ;;  %897 = vmatpush.msrb.mxu1 %v4276_v11 }
  0x8d   :  { %917 = vmatpush.msrb.mxu2 %v4283_v13  ;;  %937 = vmatpush.msrb.mxu3 %v4281_v12 }
  0x8e   :  { %878 = vmatpush.msrb.mxu0 %v4292_v15  ;;  %898 = vmatpush.msrb.mxu1 %v4294_v16 }
  0x8f   :  { %918 = vmatpush.msrb.mxu2 %v4300_v18  ;;  %938 = vmatpush.msrb.mxu3 %v4298_v17 }
  0x90   :  { %879 = vmatpush.msrb.mxu0 %v4302_v19  ;;  %899 = vmatpush.msrb.mxu1 %v4304_v20 }
  0x91   :  { %919 = vmatpush.msrb.mxu2 %v4310_v22  ;;  %939 = vmatpush.msrb.mxu3 %v4308_v21 }
  0x92   :  { %880 = vmatpush.msrb.mxu0 %v4313_v23  ;;  %900 = vmatpush.msrb.mxu1 %v4315_v24 }
  0x93   :  { %920 = vmatpush.msrb.mxu2 %v4322_v26  ;;  %940 = vmatpush.msrb.mxu3 %v4320_v25 }
  0x94   :  { %881 = vmatpush.msrb.mxu0 %v4331_v28  ;;  %901 = vmatpush.msrb.mxu1 %v4333_v29 }
  0x95   :  { %921 = vmatpush.msrb.mxu2 %v4339_v31  ;;  %941 = vmatpush.msrb.mxu3 %v4337_v30  ;;  %v169_v31 = vld [vmem:[%s6476_s3] sm:$0xf] }
  0x96   :  { %882 = vmatpush.msrb.mxu0 %v4341_v32  ;;  %902 = vmatpush.msrb.mxu1 %v4343_v33 }
  0x97   :  { %922 = vmatpush.msrb.mxu2 %v4349_v35  ;;  %942 = vmatpush.msrb.mxu3 %v4347_v34  ;;  %v4653_v34 = vperm.slane %v169_v31, 0  ;;  %v4655_v35 = vperm.slane %v169_v31, 1 }
  0x98   :  { %883 = vmatpush.msrb.mxu0 %v4352_v36  ;;  %903 = vmatpush.msrb.mxu1 %v4354_v37 }
  0x99   :  { %923 = vmatpush.msrb.mxu2 %v4361_v39  ;;  %943 = vmatpush.msrb.mxu3 %v4359_v38  ;;  %6698 = vst [vmem:[#allocation32_spill] sm:$0xff] %v4653_v34 }
  0x9a   :  { %884 = vmatpush.msrb.mxu0 %v4370_v41  ;;  %904 = vmatpush.msrb.mxu1 %v4372_v42  ;;  %6699 = vst [vmem:[#allocation33_spill] sm:$0xff] %v4655_v35 }
  0x9b   :  { %924 = vmatpush.msrb.mxu2 %v4378_v44  ;;  %944 = vmatpush.msrb.mxu3 %v4376_v43 }
  0x9c   :  { %885 = vmatpush.msrb.mxu0 %v4380_v45  ;;  %905 = vmatpush.msrb.mxu1 %v4382_v46  ;;  %v4663_v45 = vperm.slane %v169_v31, 3 }
  0x9d   :  { %925 = vmatpush.msrb.mxu2 %v4388_v48  ;;  %945 = vmatpush.msrb.mxu3 %v4386_v47 }
  0x9e   :  { %886 = vmatpush.msrb.mxu0 %v4391_v49  ;;  %906 = vmatpush.msrb.mxu1 %v4393_v50  ;;  %6702 = vst [vmem:[#allocation36_spill] sm:$0xff] %v4663_v45 }
  0x9f   :  { %926 = vmatpush.msrb.mxu2 %v4400_v52  ;;  %946 = vmatpush.msrb.mxu3 %v4398_v51 }
  0xa0   :  { %887 = vmatpush.msrb.mxu0 %v4409_v54  ;;  %907 = vmatpush.msrb.mxu1 %v4411_v55 }
  0xa1   :  { %927 = vmatpush.msrb.mxu2 %v4417_v57  ;;  %947 = vmatpush.msrb.mxu3 %v4415_v56 }
  0xa2   :  { %888 = vmatpush.msrb.mxu0 %v4419_v58  ;;  %908 = vmatpush.msrb.mxu1 %v6679_v14  ;;  %v4668_v58 = vperm.slane %v169_v31, 2 }
  0xa3   :  { %928 = vmatpush.msrb.mxu2 %v4427_v61  ;;  %948 = vmatpush.msrb.mxu3 %v4425_v60 }
  0xa4   :  { %889 = vmatpush.msrb.mxu0 %v4430_v62  ;;  %909 = vmatpush.msrb.mxu1 %v4432_v63  ;;  %6704 = vst [vmem:[#allocation38_spill] sm:$0xff] %v4668_v58 }
  0xa5   :  { %929 = vmatpush.msrb.mxu2 %v4437_v0  ;;  %949 = vmatpush.msrb.mxu3 %v6680_v1 }
  0xa6   :  { %890 = vmatpush.msrb.mxu0 %v4448_v27  ;;  %910 = vmatpush.msrb.mxu1 %v4450_v40 }
  0xa7   :  { %930 = vmatpush.msrb.mxu2 %v4454_v53  ;;  %950 = vmatpush.msrb.mxu3 %v4456_v59 }
  0xb3   :  { %v196_v2 = vpop.f32.mrf.mxu0  ;;  %v237_v3 = vpop.f32.mrf.mxu1 }
  0xb4   :  { %v197_v37 = vadd.f32 %v196_v2, %v4653_v34  ;;  %v238_v38 = vadd.f32 %v237_v3, %v4655_v35 }
  0xba   :  { %v278_v4 = vpop.f32.mrf.mxu2  ;;  %v319_v5 = vpop.f32.mrf.mxu3 }
  0xbb   :  { %v4600_v6 = vpop.f32.mrf.mxu0  ;;  %v4602_v7 = vpop.f32.mrf.mxu1  ;;  %v320_v48 = vadd.f32 %v319_v5, %v4663_v45  ;;  %v279_v61 = vadd.f32 %v278_v4, %v4668_v58 }
  0xc2   :  { %v4604_v8 = vpop.f32.mrf.mxu2  ;;  %v4606_v9 = vpop.f32.mrf.mxu3 }
  0xc3   :  { %v4608_v10 = vpop.f32.mrf.mxu0  ;;  %v4610_v11 = vpop.f32.mrf.mxu1 }
  0xca   :  { %v4612_v12 = vpop.f32.mrf.mxu2  ;;  %v4614_v13 = vpop.f32.mrf.mxu3 }
  0xcb   :  { %v4616_v15 = vpop.f32.mrf.mxu0  ;;  %v4618_v16 = vpop.f32.mrf.mxu1 }
  0xcc   :  { %6681 = vst [vmem:[#allocation15_spill] sm:$0xff] %v4616_v15 }
  0xcd   :  { %6682 = vst [vmem:[#allocation16_spill] sm:$0xff] %v4618_v16 }
  0xd2   :  { %v4620_v17 = vpop.f32.mrf.mxu2  ;;  %v4622_v18 = vpop.f32.mrf.mxu3 }
  0xd3   :  { %6683 = vst [vmem:[#allocation17_spill] sm:$0xff] %v4620_v17  ;;  %v4624_v19 = vpop.f32.mrf.mxu0  ;;  %v4626_v20 = vpop.f32.mrf.mxu1  ;;  %v4852_v17 = vld [vmem:[#allocation7 + $0x70] sm:$0xff] }
  0xd4   :  { %6684 = vst [vmem:[#allocation18_spill] sm:$0xff] %v4622_v18  ;;  %v4856_v18 = vld [vmem:[#allocation7 + $0x78] sm:$0xff] }
  0xd5   :  { %6685 = vst [vmem:[#allocation19_spill] sm:$0xff] %v4624_v19  ;;  %v4850_v19 = vld [vmem:[#allocation7 + $0x68] sm:$0xff] }
  0xd6   :  { %6686 = vst [vmem:[#allocation20_spill] sm:$0xff] %v4626_v20  ;;  %v4848_v20 = vld [vmem:[#allocation7 + $0x60] sm:$0xff] }
  0xd7   :  { %6719 = vst [vmem:[#allocation53_spill] sm:$0xff] %v4850_v19 }
  0xd8   :  { %6720 = vst [vmem:[#allocation54_spill] sm:$0xff] %v4852_v17 }
  0xd9   :  { %6721 = vst [vmem:[#allocation55_spill] sm:$0xff] %v4856_v18 }
  0xda   :  { %v4628_v21 = vpop.f32.mrf.mxu3  ;;  %v4634_v24 = vpop.f32.mrf.mxu2 }
  0xdb   :  { %6687 = vst [vmem:[#allocation21_spill] sm:$0xff] %v4628_v21  ;;  %v4630_v22 = vpop.f32.mrf.mxu0  ;;  %v4632_v23 = vpop.f32.mrf.mxu1 }
  0xdc   :  { %6688 = vst [vmem:[#allocation22_spill] sm:$0xff] %v4630_v22  ;;  %v4826_v22 = vld [vmem:[#allocation7 + $0xb0] sm:$0xff] }
  0xdd   :  { %6689 = vst [vmem:[#allocation23_spill] sm:$0xff] %v4632_v23  ;;  %v4824_v23 = vld [vmem:[#allocation7 + $0xa8] sm:$0xff] }
  0xde   :  { %6690 = vst [vmem:[#allocation24_spill] sm:$0xff] %v4634_v24 }
  0xe2   :  { %v4636_v25 = vpop.f32.mrf.mxu3  ;;  %v4642_v29 = vpop.f32.mrf.mxu2 }
  0xe3   :  { %6691 = vst [vmem:[#allocation25_spill] sm:$0xff] %v4636_v25  ;;  %v4638_v26 = vpop.f32.mrf.mxu0  ;;  %v4640_v28 = vpop.f32.mrf.mxu1  ;;  %v4822_v25 = vld [vmem:[#allocation7 + $0xa0] sm:$0xff] }
  0xe4   :  { %6692 = vst [vmem:[#allocation26_spill] sm:$0xff] %v4638_v26 }
  0xe5   :  { %6693 = vst [vmem:[#allocation27_spill] sm:$0xff] %v4640_v28  ;;  %v4812_v28 = vld [vmem:[#allocation7 + $0xc8] sm:$0xff] }
  0xe6   :  { %6694 = vst [vmem:[#allocation28_spill] sm:$0xff] %v4642_v29  ;;  %v4818_v29 = vld [vmem:[#allocation7 + $0xd8] sm:$0xff] }
  0xea   :  { %v4644_v30 = vpop.f32.mrf.mxu3  ;;  %v4657_v36 = vpop.f32.mrf.mxu2 }
  0xeb   :  { %6695 = vst [vmem:[#allocation29_spill] sm:$0xff] %v4644_v30  ;;  %v4649_v32 = vpop.f32.mrf.mxu0  ;;  %v4651_v33 = vpop.f32.mrf.mxu1  ;;  %v4810_v30 = vld [vmem:[#allocation7 + $0xc0] sm:$0xff] }
  0xec   :  { %6696 = vst [vmem:[#allocation30_spill] sm:$0xff] %v4649_v32  ;;  %v244_v32 = vadd.f32 %v4610_v11, %v4655_v35 }
  0xed   :  { %6697 = vst [vmem:[#allocation31_spill] sm:$0xff] %v4651_v33  ;;  %v203_v33 = vadd.f32 %v4608_v10, %v4653_v34  ;;  %v4814_v10 = vld [vmem:[#allocation7 + $0xd0] sm:$0xff] }
  0xee   :  { %6700 = vst [vmem:[#allocation34_spill] sm:$0xff] %v4657_v36 }
  0xf2   :  { %v4661_v39 = vpop.f32.mrf.mxu3  ;;  %v4666_v49 = vpop.f32.mrf.mxu2 }
  0xf3   :  { %6701 = vst [vmem:[#allocation35_spill] sm:$0xff] %v4661_v39  ;;  %v460_v41 = vpop.f32.mrf.mxu0  ;;  %v480_v42 = vpop.f32.mrf.mxu1  ;;  %v4798_v39 = vld [vmem:[#allocation7 + $0xf0] sm:$0xff] }
  0xf4   :  { %v523_v43 = vadd.f32 %v460_v41, %v197_v37  ;;  %v524_v44 = vadd.f32 %v480_v42, %v238_v38  ;;  %6703 = vst [vmem:[#allocation37_spill] sm:$0xff] %v4666_v49  ;;  %v4796_v49 = vld [vmem:[#allocation7 + $0xe8] sm:$0xff] }
  0xf6   :  { %v3702_v46 = vmul.f32 -1.442695, %v523_v43  ;;  %v3703_v47 = vmul.f32 -1.442695, %v524_v44 }
  0xf8   :  { %3758 = vpow2.f32 %v3702_v46 }
  0xf9   :  { %3760 = vpow2.f32 %v3703_v47 }
  0xfa   :  { %v520_v50 = vpop.f32.mrf.mxu3  ;;  %v500_v59 = vpop.f32.mrf.mxu2 }
  0xfb   :  { %v526_v51 = vadd.f32 %v520_v50, %v320_v48  ;;  %v525_v0 = vadd.f32 %v500_v59, %v279_v61 }
  0xfd   :  { %v3704_v52 = vmul.f32 -1.442695, %v526_v51 }
  0xfe   :  { %v3759_v54 = vpop.eup %3758 }
  0xff   :  { %v3761_v55 = vpop.eup %3760  ;;  %v530_v56 = vadd.f32 1.0, %v3759_v54  ;;  %3762 = vpow2.f32 %v3704_v52 }
 0x100   :  { %v549_v57 = vadd.f32 1.0, %v3761_v55 }
 0x101   :  { %3764 = vrcp.f32 %v530_v56  ;;  %v542_v2 = vand.u32 2147483648, %v530_v56  ;;  %v540_v31 = vand.u32 2147483647, %v530_v56  ;;  %vm536_vm2 = vweird.f32 %v530_v56 }
 0x102   :  { %3766 = vrcp.f32 %v549_v57  ;;  %v561_v3 = vand.u32 2147483648, %v549_v57  ;;  %v559_v38 = vand.u32 2147483647, %v549_v57  ;;  %vm555_vm3 = vweird.f32 %v549_v57 }
 0x103   :  { %v543_v42 = vor.u32 1.1754944e-38, %v542_v2  ;;  %vm541_vm5 = vcmp.eq.f32.partialorder %v540_v31, 8.507059e+37 }
 0x104   :  { %v562_v46 = vor.u32 1.1754944e-38, %v561_v3  ;;  %vm560_vm7 = vcmp.eq.f32.partialorder %v559_v38, 8.507059e+37 }
 0x105   :  { %v3763_v60 = vpop.eup %3762 }
 0x106   :  { %v569_v62 = vadd.f32 1.0, %v3763_v60 }
 0x107   :  { %v3765_v63 = vpop.eup %3764 }
 0x108   :  { %v3767_v27 = vpop.eup %3766  ;;  %v532_v40 = vmul.f32 %v3765_v63, %v530_v56  ;;  %3768 = vrcp.f32 %v569_v62  ;;  %vm537_vm0 = vweird.f32 %v3765_v63  ;;  %vm575_vm9 = vweird.f32 %v569_v62 }
 0x109   :  { %v551_v53 = vmul.f32 %v3767_v27, %v549_v57  ;;  %3770 = vtanh.f32 %v525_v0  ;;  %vm556_vm1 = vweird.f32 %v3767_v27  ;;  %vm538_vm4 = vmor %vm536_vm2, %vm537_vm0  ;;  %v581_v57 = vand.u32 2147483648, %v569_v62 }
 0x10a   :  { %v533_v1 = vsub.f32 1.0, %v532_v40  ;;  %vm557_vm6 = vmor %vm555_vm3, %vm556_vm1 }
 0x10b   :  { %v552_v14 = vsub.f32 1.0, %v551_v53  ;;  %v582_v40 = vor.u32 1.1754944e-38, %v581_v57 }
 0x10c   :  { %v534_v5 = vmul.f32 %v3765_v63, %v533_v1 }
 0x10d   :  { %v553_v37 = vmul.f32 %v3767_v27, %v552_v14  ;;  %v200_v14 = vadd.f32 %v4600_v6, %v4653_v34  ;;  %v4876_v34 = vld [vmem:[#allocation7 + $0x30] sm:$0xff] }
 0x10e   :  { %v3769_v41 = vpop.eup %3768  ;;  %v535_v4 = vadd.f32 %v3765_v63, %v534_v5 }
 0x10f   :  { %v554_v43 = vadd.f32 %v3767_v27, %v553_v37  ;;  %v571_v44 = vmul.f32 %v3769_v41, %v569_v62  ;;  %v3771_v48 = vpop.eup %3770  ;;  %vm576_vm8 = vweird.f32 %v3769_v41 }
 0x110   :  { %v539_v47 = vsel %vm538_vm4, %v3765_v63, %v535_v4  ;;  %v579_v63 = vand.u32 2147483647, %v569_v62  ;;  %vm577_vm10 = vmor %vm575_vm9, %vm576_vm8  ;;  %v241_v62 = vadd.f32 %v4602_v7, %v4655_v35  ;;  %v4868_v35 = vld [vmem:[#allocation7 + $0x58] sm:$0xff] }
 0x111   :  { %v544_v50 = vsel %vm541_vm5, %v543_v42, %v539_v47  ;;  %v558_v51 = vsel %vm557_vm6, %v3767_v27, %v554_v43  ;;  %v572_v52 = vsub.f32 1.0, %v571_v44  ;;  %6725 = vst [vmem:[#allocation59_spill] sm:$0xff] %v4868_v35 }
 0x112   :  { %v563_v54 = vsel %vm560_vm7, %v562_v46, %v558_v51  ;;  %v586_v55 = vmul.f32 %v3771_v48, %v544_v50  ;;  %vm580_vm11 = vcmp.eq.f32.partialorder %v579_v63, 8.507059e+37  ;;  %v282_v50 = vadd.f32 %v4604_v8, %v4668_v58 }
 0x113   :  { %v585_v59 = vmul.f32 0.0, %v563_v54  ;;  %v573_v60 = vmul.f32 %v3769_v41, %v572_v52 }
 0x115   :  { %v4671_v61 = vadd.f32 %v586_v55, %v585_v59  ;;  %v574_v56 = vadd.f32 %v3769_v41, %v573_v60 }
 0x117   :  { %3772 = vtanh.f32 %v4671_v61  ;;  %v578_v0 = vsel %vm577_vm10, %v3769_v41, %v574_v56  ;;  %v323_v41 = vadd.f32 %v4606_v9, %v4663_v45 }
 0x118   :  { %v583_v53 = vsel %vm580_vm11, %v582_v40, %v578_v0 }
 0x11d   :  { %v3773_v27 = vpop.eup %3772 }
 0x11e   :  { %v4674_v1 = vmul.f32 %v3773_v27, %v583_v53 }
 0x120   :  { %6705 = vst [vmem:[#allocation39_spill] sm:$0xff] %v4674_v1  ;;  %675 = vmatmul.f32.vlgmr.msra.gmra.mxu0 %v4674_v1  ;;  %695 = vmatmul.f32.vlgmr.msra.gmra.mxu1 %v4674_v1 }
 0x121   :  { %715 = vmatmul.f32.vlgmr.msra.gmra.mxu2 %v4674_v1  ;;  %735 = vmatmul.f32.vlgmr.msra.gmra.mxu3 %v4674_v1 }
 0x19d   :  { %v676_v2 = vpop.f32.mrf.mxu0  ;;  %v696_v3 = vpop.f32.mrf.mxu1 }
 0x19e   :  { %v739_v5 = vadd.f32 %v676_v2, %v200_v14  ;;  %v740_v31 = vadd.f32 %v696_v3, %v241_v62 }
 0x1a0   :  { %v3705_v37 = vmul.f32 -1.442695, %v739_v5  ;;  %v3706_v38 = vmul.f32 -1.442695, %v740_v31 }
 0x1a2   :  { %3774 = vpow2.f32 %v3705_v37 }
 0x1a3   :  { %3776 = vpow2.f32 %v3706_v38 }
 0x1a4   :  { %v736_v4 = vpop.f32.mrf.mxu3  ;;  %v716_v7 = vpop.f32.mrf.mxu2 }
 0x1a5   :  { %v742_v42 = vadd.f32 %v736_v4, %v323_v41  ;;  %v741_v54 = vadd.f32 %v716_v7, %v282_v50 }
 0x1a7   :  { %v3707_v43 = vmul.f32 -1.442695, %v742_v42 }
 0x1a8   :  { %v3775_v44 = vpop.eup %3774 }
 0x1a9   :  { %v3777_v46 = vpop.eup %3776  ;;  %v746_v6 = vadd.f32 1.0, %v3775_v44  ;;  %3778 = vpow2.f32 %v3707_v43 }
 0x1aa   :  { %v765_v47 = vadd.f32 1.0, %v3777_v46 }
 0x1ab   :  { %3780 = vrcp.f32 %v746_v6  ;;  %v758_v57 = vand.u32 2147483648, %v746_v6  ;;  %v756_v40 = vand.u32 2147483647, %v746_v6  ;;  %vm752_vm14 = vweird.f32 %v746_v6 }
 0x1ac   :  { %3782 = vrcp.f32 %v765_v47  ;;  %v777_v63 = vand.u32 2147483648, %v765_v47  ;;  %v775_v53 = vand.u32 2147483647, %v765_v47  ;;  %vm771_vm15 = vweird.f32 %v765_v47 }
 0x1ad   :  { %v759_v62 = vor.u32 1.1754944e-38, %v758_v57  ;;  %vm757_vm2 = vcmp.eq.f32.partialorder %v756_v40, 8.507059e+37  ;;  %v4712_v57 = vld [vmem:[#allocation7 + $0x1c8] sm:$0xff]  ;;  %v4722_v40 = vld [vmem:[#allocation7 + $0x1a0] sm:$0xff] }
 0x1ae   :  { %v778_v5 = vor.u32 1.1754944e-38, %v777_v63  ;;  %vm776_vm3 = vcmp.eq.f32.partialorder %v775_v53, 8.507059e+37  ;;  %6711 = vst [vmem:[#allocation45_spill] sm:$0xff] %v4712_v57  ;;  %v4714_v63 = vld [vmem:[#allocation7 + $0x1d0] sm:$0xff] }
 0x1af   :  { %v3779_v48 = vpop.eup %3778  ;;  %v4726_v53 = vld [vmem:[#allocation7 + $0x1b0] sm:$0xff] }
 0x1b0   :  { %v785_v51 = vadd.f32 1.0, %v3779_v48 }
 0x1b1   :  { %v3781_v52 = vpop.eup %3780 }
 0x1b2   :  { %v3783_v9 = vpop.eup %3782  ;;  %v748_v55 = vmul.f32 %v3781_v52, %v746_v6  ;;  %3784 = vrcp.f32 %v785_v51  ;;  %vm753_vm12 = vweird.f32 %v3781_v52  ;;  %v797_v7 = vand.u32 2147483648, %v785_v51 }
 0x1b3   :  { %v767_v59 = vmul.f32 %v3783_v9, %v765_v47  ;;  %3786 = vtanh.f32 %v741_v54  ;;  %vm772_vm13 = vweird.f32 %v3783_v9  ;;  %vm754_vm0 = vmor %vm752_vm14, %vm753_vm12  ;;  %vm791_vm5 = vweird.f32 %v785_v51 }
 0x1b4   :  { %v749_v60 = vsub.f32 1.0, %v748_v55  ;;  %vm773_vm1 = vmor %vm771_vm15, %vm772_vm13  ;;  %v795_v48 = vand.u32 2147483647, %v785_v51 }
 0x1b5   :  { %v768_v56 = vsub.f32 1.0, %v767_v59  ;;  %v4700_v59 = vld [vmem:[#allocation7 + $0x1e8] sm:$0xff] }
 0x1b6   :  { %v750_v0 = vmul.f32 %v3781_v52, %v749_v60  ;;  %vm796_vm7 = vcmp.eq.f32.partialorder %v795_v48, 8.507059e+37  ;;  %1111 = vmatpush.msra.mxu1 %v4700_v59  ;;  %v4706_v60 = vld [vmem:[#allocation7 + $0x1f8] sm:$0xff]  ;;  %v4782_v48 = vld [vmem:[#allocation7 + $0x100] sm:$0xff] }
 0x1b7   :  { %v769_v27 = vmul.f32 %v3783_v9, %v768_v56  ;;  %6709 = vst [vmem:[#allocation43_spill] sm:$0xff] %v4706_v60  ;;  %1151 = vmatpush.msra.mxu3 %v4706_v60  ;;  %v4710_v56 = vld [vmem:[#allocation7 + $0x1c0] sm:$0xff] }
 0x1b8   :  { %v3785_v14 = vpop.eup %3784  ;;  %v751_v8 = vadd.f32 %v3781_v52, %v750_v0  ;;  %6710 = vst [vmem:[#allocation44_spill] sm:$0xff] %v4710_v56  ;;  %1112 = vmatpush.msra.mxu1 %v4712_v57  ;;  %v4718_v0 = vld [vmem:[#allocation7 + $0x1d8] sm:$0xff] }
 0x1b9   :  { %v770_v2 = vadd.f32 %v3783_v9, %v769_v27  ;;  %v787_v3 = vmul.f32 %v3785_v14, %v785_v51  ;;  %v3787_v37 = vpop.eup %3786  ;;  %vm792_vm4 = vweird.f32 %v3785_v14  ;;  %v4702_v51 = vld [vmem:[#allocation7 + $0x1f0] sm:$0xff]  ;;  %1152 = vmatpush.msra.mxu3 %v4718_v0  ;;  %v4724_v27 = vld [vmem:[#allocation7 + $0x1a8] sm:$0xff] }
 0x1ba   :  { %v755_v31 = vsel %vm754_vm0, %v3781_v52, %v751_v8  ;;  %vm793_vm6 = vmor %vm791_vm5, %vm792_vm4  ;;  %v798_v52 = vor.u32 1.1754944e-38, %v797_v7  ;;  %6708 = vst [vmem:[#allocation42_spill] sm:$0xff] %v4702_v51  ;;  %1131 = vmatpush.msra.mxu2 %v4702_v51  ;;  %1113 = vmatpush.msra.mxu1 %v4724_v27  ;;  %v4734_v8 = vld [vmem:[#allocation7 + $0x180] sm:$0xff]  ;;  %v4778_v7 = vld [vmem:[#allocation7 + $0x138] sm:$0xff] }
 0x1bb   :  { %v760_v38 = vsel %vm757_vm2, %v759_v62, %v755_v31  ;;  %v774_v41 = vsel %vm773_vm1, %v3783_v9, %v770_v2  ;;  %v788_v4 = vsub.f32 1.0, %v787_v3  ;;  %v4736_v62 = vld [vmem:[#allocation7 + $0x188] sm:$0xff]  ;;  %v4738_v2 = vld [vmem:[#allocation7 + $0x190] sm:$0xff]  ;;  %v4742_v3 = vld [vmem:[#allocation7 + $0x198] sm:$0xff]  ;;  %6718 = vst [vmem:[#allocation52_spill] sm:$0xff] %v4778_v7 }
 0x1bc   :  { %v779_v42 = vsel %vm776_vm3, %v778_v5, %v774_v41  ;;  %v802_v43 = vmul.f32 %v3787_v37, %v760_v38  ;;  %1132 = vmatpush.msra.mxu2 %v4714_v63  ;;  %6712 = vst [vmem:[#allocation46_spill] sm:$0xff] %v4736_v62  ;;  %1114 = vmatpush.msra.mxu1 %v4736_v62  ;;  %v4746_v5 = vld [vmem:[#allocation7 + $0x160] sm:$0xff]  ;;  %v4748_v31 = vld [vmem:[#allocation7 + $0x168] sm:$0xff]  ;;  %v4750_v37 = vld [vmem:[#allocation7 + $0x170] sm:$0xff] }
 0x1bd   :  { %v801_v44 = vmul.f32 %v779_v42, %v4671_v61  ;;  %v789_v46 = vmul.f32 %v3785_v14, %v788_v4  ;;  %v4698_v61 = vld [vmem:[#allocation7 + $0x1e0] sm:$0xff]  ;;  %6713 = vst [vmem:[#allocation47_spill] sm:$0xff] %v4738_v2  ;;  %v4754_v38 = vld [vmem:[#allocation7 + $0x178] sm:$0xff]  ;;  %v4760_v4 = vld [vmem:[#allocation7 + $0x148] sm:$0xff] }
 0x1be   :  { %6707 = vst [vmem:[#allocation41_spill] sm:$0xff] %v4698_v61  ;;  %1091 = vmatpush.msra.mxu0 %v4698_v61  ;;  %1133 = vmatpush.msra.mxu2 %v4726_v53  ;;  %v4758_v41 = vld [vmem:[#allocation7 + $0x140] sm:$0xff]  ;;  %v4762_v42 = vld [vmem:[#allocation7 + $0x150] sm:$0xff] }
 0x1bf   :  { %v4689_v6 = vadd.f32 %v802_v43, %v801_v44  ;;  %v790_v47 = vadd.f32 %v3785_v14, %v789_v46  ;;  %1115 = vmatpush.msra.mxu1 %v4748_v31  ;;  %6714 = vst [vmem:[#allocation48_spill] sm:$0xff] %v4754_v38  ;;  %v4766_v43 = vld [vmem:[#allocation7 + $0x158] sm:$0xff]  ;;  %v4770_v44 = vld [vmem:[#allocation7 + $0x120] sm:$0xff]  ;;  %v4772_v46 = vld [vmem:[#allocation7 + $0x128] sm:$0xff] }
 0x1c0   :  { %1092 = vmatpush.msra.mxu0 %v4710_v56  ;;  %1134 = vmatpush.msra.mxu2 %v4738_v2  ;;  %6715 = vst [vmem:[#allocation49_spill] sm:$0xff] %v4762_v42 }
 0x1c1   :  { %3788 = vtanh.f32 %v4689_v6  ;;  %v794_v50 = vsel %vm793_vm6, %v3785_v14, %v790_v47  ;;  %v4730_v14 = vld [vmem:[#allocation7 + $0x1b8] sm:$0xff]  ;;  %1116 = vmatpush.msra.mxu1 %v4760_v4  ;;  %6716 = vst [vmem:[#allocation50_spill] sm:$0xff] %v4772_v46  ;;  %v4774_v47 = vld [vmem:[#allocation7 + $0x130] sm:$0xff] }
 0x1c2   :  { %v799_v9 = vsel %vm796_vm7, %v798_v52, %v794_v50  ;;  %1093 = vmatpush.msra.mxu0 %v4722_v40  ;;  %1153 = vmatpush.msra.mxu3 %v4730_v14  ;;  %6717 = vst [vmem:[#allocation51_spill] sm:$0xff] %v4774_v47  ;;  %v4784_v50 = vld [vmem:[#allocation7 + $0x108] sm:$0xff]  ;;  %v4786_v52 = vld [vmem:[#allocation7 + $0x110] sm:$0xff] }
 0x1c3   :  { %1135 = vmatpush.msra.mxu2 %v4750_v37  ;;  %1117 = vmatpush.msra.mxu1 %v4772_v46 }
 0x1c4   :  { %1094 = vmatpush.msra.mxu0 %v4734_v8  ;;  %1154 = vmatpush.msra.mxu3 %v4742_v3 }
 0x1c5   :  { %1136 = vmatpush.msra.mxu2 %v4762_v42  ;;  %1118 = vmatpush.msra.mxu1 %v4784_v50 }
 0x1c6   :  { %1095 = vmatpush.msra.mxu0 %v4746_v5  ;;  %1155 = vmatpush.msra.mxu3 %v4754_v38 }
 0x1c7   :  { %v3789_v54 = vpop.eup %3788  ;;  %1137 = vmatpush.msra.mxu2 %v4774_v47  ;;  %1119 = vmatpush.msra.mxu1 %v4796_v49 }
 0x1c8   :  { %v4692_v55 = vmul.f32 %v3789_v54, %v799_v9  ;;  %1096 = vmatpush.msra.mxu0 %v4758_v41  ;;  %1156 = vmatpush.msra.mxu3 %v4766_v43  ;;  %v4790_v54 = vld [vmem:[#allocation7 + $0x118] sm:$0xff]  ;;  %v4794_v9 = vld [vmem:[#allocation7 + $0xe0] sm:$0xff] }
 0x1c9   :  { %1138 = vmatpush.msra.mxu2 %v4786_v52  ;;  %1120 = vmatpush.msra.mxu1 %v4812_v28 }
 0x1ca   :  { %6706 = vst [vmem:[#allocation40_spill] sm:$0xff] %v4692_v55  ;;  %891 = vmatmul.f32.vlgmr.msrb.gmra.mxu0 %v4692_v55  ;;  %911 = vmatmul.f32.vlgmr.msrb.gmra.mxu1 %v4692_v55 }
 0x1cb   :  { %931 = vmatmul.f32.vlgmr.msrb.gmra.mxu2 %v4692_v55  ;;  %951 = vmatmul.f32.vlgmr.msrb.gmra.mxu3 %v4692_v55  ;;  %v4806_v55 = vld [vmem:[#allocation7 + $0xf8] sm:$0xff] }
 0x1cc   :  { %1097 = vmatpush.msra.mxu0 %v4770_v44  ;;  %1157 = vmatpush.msra.mxu3 %v4778_v7 }
 0x1cd   :  { %1139 = vmatpush.msra.mxu2 %v4798_v39  ;;  %1121 = vmatpush.msra.mxu1 %v4824_v23 }
 0x1ce   :  { %1098 = vmatpush.msra.mxu0 %v4782_v48  ;;  %1158 = vmatpush.msra.mxu3 %v4790_v54 }
 0x1cf   :  { %1140 = vmatpush.msra.mxu2 %v4814_v10 }
 0x1d0   :  { %1099 = vmatpush.msra.mxu0 %v4794_v9  ;;  %1159 = vmatpush.msra.mxu3 %v4806_v55 }
 0x1d1   :  { %1141 = vmatpush.msra.mxu2 %v4826_v22 }
 0x1d2   :  { %1100 = vmatpush.msra.mxu0 %v4810_v30  ;;  %1160 = vmatpush.msra.mxu3 %v4818_v29 }
 0x1d4   :  { %1101 = vmatpush.msra.mxu0 %v4822_v25 }
 0x247   :  { %v892_v1 = vpop.f32.mrf.mxu0  ;;  %v912_v36 = vpop.f32.mrf.mxu1 }
 0x248   :  { %v955_v26 = vadd.f32 %v892_v1, %v203_v33  ;;  %v956_v11 = vadd.f32 %v912_v36, %v244_v32  ;;  %v4830_v32 = vld [vmem:[#allocation7 + $0xb8] sm:$0xff]  ;;  %v4834_v33 = vld [vmem:[#allocation7 + $0x80] sm:$0xff]  ;;  %v4836_v36 = vld [vmem:[#allocation7 + $0x88] sm:$0xff] }
 0x249   :  { %1161 = vmatpush.msra.mxu3 %v4830_v32  ;;  %v4838_v1 = vld [vmem:[#allocation7 + $0x90] sm:$0xff]  ;;  %1102 = vmatpush.msra.mxu0 %v4834_v33 }
 0x24a   :  { %v3708_v24 = vmul.f32 -1.442695, %v955_v26  ;;  %v3709_v21 = vmul.f32 -1.442695, %v956_v11  ;;  %1122 = vmatpush.msra.mxu1 %v4836_v36  ;;  %v4842_v26 = vld [vmem:[#allocation7 + $0x98] sm:$0xff]  ;;  %v326_v11 = vadd.f32 %v4614_v13, %v4663_v45  ;;  %1142 = vmatpush.msra.mxu2 %v4838_v1  ;;  %v4860_v13 = vld [vmem:[#allocation7 + $0x40] sm:$0xff] }
 0x24b   :  { %1162 = vmatpush.msra.mxu3 %v4842_v26  ;;  %1103 = vmatpush.msra.mxu0 %v4848_v20  ;;  %6722 = vst [vmem:[#allocation56_spill] sm:$0xff] %v4860_v13  ;;  %v4864_v45 = vld [vmem:[#allocation7 + $0x50] sm:$0xff] }
 0x24c   :  { %3790 = vpow2.f32 %v3708_v24  ;;  %1123 = vmatpush.msra.mxu1 %v4850_v19  ;;  %1143 = vmatpush.msra.mxu2 %v4852_v17  ;;  %6724 = vst [vmem:[#allocation58_spill] sm:$0xff] %v4864_v45  ;;  %v4892_v19 = vld [vmem:[#allocation7 + $0x18] sm:$0xff] }
 0x24d   :  { %3792 = vpow2.f32 %v3709_v21  ;;  %1163 = vmatpush.msra.mxu3 %v4856_v18  ;;  %v4862_v21 = vld [vmem:[#allocation7 + $0x48] sm:$0xff]  ;;  %1104 = vmatpush.msra.mxu0 %v4860_v13  ;;  %v4880_v13 = vld [vmem:[#allocation7 + $0x38] sm:$0xff] }
 0x24e   :  { %v952_v24 = vpop.f32.mrf.mxu3  ;;  %6723 = vst [vmem:[#allocation57_spill] sm:$0xff] %v4862_v21  ;;  %1124 = vmatpush.msra.mxu1 %v4862_v21  ;;  %1144 = vmatpush.msra.mxu2 %v4864_v45  ;;  %v4882_v21 = vld [vmem:[#allocation7] sm:$0xff] }
 0x24f   :  { %v958_v16 = vadd.f32 %v952_v24, %v326_v11  ;;  %1164 = vmatpush.msra.mxu3 %v4868_v35  ;;  %v4872_v11 = vld [vmem:[#allocation7 + $0x20] sm:$0xff]  ;;  %v4874_v24 = vld [vmem:[#allocation7 + $0x28] sm:$0xff]  ;;  %v4890_v35 = vld [vmem:[#allocation7 + $0x10] sm:$0xff] }
 0x250   :  { %6726 = vst [vmem:[#allocation60_spill] sm:$0xff] %v4872_v11  ;;  %1105 = vmatpush.msra.mxu0 %v4872_v11  ;;  %1125 = vmatpush.msra.mxu1 %v4874_v24 }
 0x251   :  { %v3710_v15 = vmul.f32 -1.442695, %v958_v16  ;;  %v4884_v16 = vld [vmem:[#allocation7 + $0x8] sm:$0xff]  ;;  %1145 = vmatpush.msra.mxu2 %v4876_v34  ;;  %1165 = vmatpush.msra.mxu3 %v4880_v13 }
 0x252   :  { %v3791_v18 = vpop.eup %3790  ;;  %1106 = vmatpush.msra.mxu0 %v4882_v21  ;;  %1126 = vmatpush.msra.mxu1 %v4884_v16 }
 0x253   :  { %v3793_v45 = vpop.eup %3792  ;;  %v4886_v17 = vadd.f32 1.0, %v3791_v18  ;;  %3794 = vpow2.f32 %v3710_v15  ;;  %1146 = vmatpush.msra.mxu2 %v4890_v35  ;;  %1166 = vmatpush.msra.mxu3 %v4892_v19  ;;  %v932_v15 = vpop.f32.mrf.mxu2 }
 0x254   :  { %v4894_v11 = vadd.f32 1.0, %v3793_v45  ;;  %1307 = vmatpush.msrb.mxu0 %v4698_v61  ;;  %1327 = vmatpush.msrb.mxu1 %v4700_v59  ;;  %v285_v45 = vadd.f32 %v4612_v12, %v4668_v58 }
 0x255   :  { %3796 = vrcp.f32 %v4886_v17  ;;  %1347 = vmatpush.msrb.mxu2 %v4702_v51  ;;  %1367 = vmatpush.msrb.mxu3 %v4706_v60  ;;  %vm968_vm10 = vweird.f32 %v4886_v17 }
 0x256   :  { %3798 = vrcp.f32 %v4894_v11  ;;  %1308 = vmatpush.msrb.mxu0 %v4710_v56  ;;  %1328 = vmatpush.msrb.mxu1 %v4712_v57  ;;  %v957_v51 = vadd.f32 %v932_v15, %v285_v45  ;;  %v974_v45 = vand.u32 2147483648, %v4886_v17  ;;  %v993_v58 = vand.u32 2147483648, %v4894_v11 }
 0x257   :  { %1348 = vmatpush.msrb.mxu2 %v4714_v63  ;;  %1368 = vmatpush.msrb.mxu3 %v4718_v0  ;;  %vm987_vm11 = vweird.f32 %v4894_v11 }
 0x258   :  { %1309 = vmatpush.msrb.mxu0 %v4722_v40  ;;  %1329 = vmatpush.msrb.mxu1 %v4724_v27 }
 0x259   :  { %v3795_v18 = vpop.eup %3794  ;;  %1349 = vmatpush.msrb.mxu2 %v4726_v53  ;;  %1369 = vmatpush.msrb.mxu3 %v4730_v14 }
 0x25a   :  { %v4912_v61 = vadd.f32 1.0, %v3795_v18  ;;  %1310 = vmatpush.msrb.mxu0 %v4734_v8  ;;  %1330 = vmatpush.msrb.mxu1 %v4736_v62 }
 0x25b   :  { %v3797_v60 = vpop.eup %3796  ;;  %1350 = vmatpush.msrb.mxu2 %v4738_v2  ;;  %1370 = vmatpush.msrb.mxu3 %v4742_v3  ;;  %v972_v2 = vand.u32 2147483647, %v4886_v17 }
 0x25c   :  { %v3799_v57 = vpop.eup %3798  ;;  %v964_v56 = vmul.f32 %v3797_v60, %v4886_v17  ;;  %3800 = vrcp.f32 %v4912_v61  ;;  %1311 = vmatpush.msrb.mxu0 %v4746_v5  ;;  %1331 = vmatpush.msrb.mxu1 %v4748_v31  ;;  %vm969_vm8 = vweird.f32 %v3797_v60  ;;  %v994_v17 = vor.u32 1.1754944e-38, %v993_v58 }
 0x25d   :  { %v983_v12 = vmul.f32 %v3799_v57, %v4894_v11  ;;  %3802 = vtanh.f32 %v957_v51  ;;  %1351 = vmatpush.msrb.mxu2 %v4750_v37  ;;  %1371 = vmatpush.msrb.mxu3 %v4754_v38  ;;  %vm988_vm9 = vweird.f32 %v3799_v57  ;;  %vm970_vm12 = vmor %vm968_vm10, %vm969_vm8  ;;  %vm973_vm14 = vcmp.eq.f32.partialorder %v972_v2, 8.507059e+37 }
 0x25e   :  { %v965_v15 = vsub.f32 1.0, %v964_v56  ;;  %1312 = vmatpush.msrb.mxu0 %v4758_v41  ;;  %1332 = vmatpush.msrb.mxu1 %v4760_v4  ;;  %vm989_vm13 = vmor %vm987_vm11, %vm988_vm9  ;;  %vm1007_vm1 = vweird.f32 %v4912_v61 }
 0x25f   :  { %v984_v18 = vsub.f32 1.0, %v983_v12  ;;  %v991_v12 = vand.u32 2147483647, %v4894_v11  ;;  %1352 = vmatpush.msrb.mxu2 %v4762_v42  ;;  %1372 = vmatpush.msrb.mxu3 %v4766_v43 }
 0x260   :  { %v966_v62 = vmul.f32 %v3797_v60, %v965_v15  ;;  %1313 = vmatpush.msrb.mxu0 %v4770_v44  ;;  %1333 = vmatpush.msrb.mxu1 %v4772_v46  ;;  %v975_v15 = vor.u32 1.1754944e-38, %v974_v45 }
 0x261   :  { %v985_v56 = vmul.f32 %v3799_v57, %v984_v18  ;;  %1353 = vmatpush.msrb.mxu2 %v4774_v47  ;;  %1373 = vmatpush.msrb.mxu3 %v4778_v7  ;;  %vm992_vm15 = vcmp.eq.f32.partialorder %v991_v12, 8.507059e+37  ;;  %v6729_v12 = vld [vmem:[#allocation55_spill] sm:$0xff] }
 0x262   :  { %v4937_v51 = vpop.eup %3800  ;;  %v967_v38 = vadd.f32 %v3797_v60, %v966_v62  ;;  %1314 = vmatpush.msrb.mxu0 %v4782_v48  ;;  %1334 = vmatpush.msrb.mxu1 %v4784_v50 }
 0x263   :  { %v986_v18 = vadd.f32 %v3799_v57, %v985_v56  ;;  %v1003_v42 = vmul.f32 %v4937_v51, %v4912_v61  ;;  %v3803_v11 = vpop.eup %3802  ;;  %1354 = vmatpush.msrb.mxu2 %v4786_v52  ;;  %1374 = vmatpush.msrb.mxu3 %v4790_v54  ;;  %vm1008_vm0 = vweird.f32 %v4937_v51 }
 0x264   :  { %v971_v62 = vsel %vm970_vm12, %v3797_v60, %v967_v38  ;;  %1315 = vmatpush.msrb.mxu0 %v4794_v9  ;;  %1335 = vmatpush.msrb.mxu1 %v4796_v49  ;;  %v1011_v38 = vand.u32 2147483647, %v4912_v61  ;;  %vm1009_vm2 = vmor %vm1007_vm1, %vm1008_vm0 }
 0x265   :  { %v976_v46 = vsel %vm973_vm14, %v975_v15, %v971_v62  ;;  %v990_v45 = vsel %vm989_vm13, %v3799_v57, %v986_v18  ;;  %v1004_v56 = vsub.f32 1.0, %v1003_v42  ;;  %1355 = vmatpush.msrb.mxu2 %v4798_v39  ;;  %1375 = vmatpush.msrb.mxu3 %v4806_v55  ;;  %v6731_v15 = vld [vmem:[#allocation57_spill] sm:$0xff]  ;;  %v6732_v62 = vld [vmem:[#allocation58_spill] sm:$0xff] }
 0x266   :  { %v995_v47 = vsel %vm992_vm15, %v994_v17, %v990_v45  ;;  %v1018_v7 = vmul.f32 %v3803_v11, %v976_v46  ;;  %1316 = vmatpush.msrb.mxu0 %v4810_v30  ;;  %1336 = vmatpush.msrb.mxu1 %v4812_v28  ;;  %v6727_v46 = vld [vmem:[#allocation53_spill] sm:$0xff]  ;;  %vm1012_vm3 = vcmp.eq.f32.partialorder %v1011_v38, 8.507059e+37  ;;  %v6733_v11 = vld [vmem:[#allocation59_spill] sm:$0xff]  ;;  %v6735_v45 = vld [vmem:[#allocation60_spill] sm:$0xff] }
 0x267   :  { %v1017_v58 = vmul.f32 %v995_v47, %v4689_v6  ;;  %v1005_v60 = vmul.f32 %v4937_v51, %v1004_v56  ;;  %1356 = vmatpush.msrb.mxu2 %v4814_v10  ;;  %1376 = vmatpush.msrb.mxu3 %v4818_v29  ;;  %v1013_v6 = vand.u32 2147483648, %v4912_v61  ;;  %v6730_v61 = vld [vmem:[#allocation56_spill] sm:$0xff]  ;;  %v6736_v56 = vld [vmem:[#allocation41_spill] sm:$0xff]  ;;  %v6742_v38 = vld [vmem:[#allocation47_spill] sm:$0xff] }
 0x268   :  { %1317 = vmatpush.msrb.mxu0 %v4822_v25  ;;  %1337 = vmatpush.msrb.mxu1 %v4824_v23 }
 0x269   :  { %v4961_v57 = vadd.f32 %v1018_v7, %v1017_v58  ;;  %v1006_v2 = vadd.f32 %v4937_v51, %v1005_v60  ;;  %1357 = vmatpush.msrb.mxu2 %v4826_v22  ;;  %1377 = vmatpush.msrb.mxu3 %v4830_v32  ;;  %v1014_v47 = vor.u32 1.1754944e-38, %v1013_v6  ;;  %v6728_v7 = vld [vmem:[#allocation54_spill] sm:$0xff]  ;;  %v6738_v60 = vld [vmem:[#allocation43_spill] sm:$0xff]  ;;  %v6740_v6 = vld [vmem:[#allocation45_spill] sm:$0xff] }
 0x26a   :  { %1318 = vmatpush.msrb.mxu0 %v4834_v33  ;;  %1338 = vmatpush.msrb.mxu1 %v4836_v36  ;;  %v6737_v58 = vld [vmem:[#allocation42_spill] sm:$0xff] }
 0x26b   :  { %3804 = vtanh.f32 %v4961_v57  ;;  %1358 = vmatpush.msrb.mxu2 %v4838_v1  ;;  %1378 = vmatpush.msrb.mxu3 %v4842_v26  ;;  %v1010_v42 = vsel %vm1009_vm2, %v4937_v51, %v1006_v2  ;;  %v6739_v2 = vld [vmem:[#allocation44_spill] sm:$0xff] }
 0x26c   :  { %1319 = vmatpush.msrb.mxu0 %v4848_v20  ;;  %1339 = vmatpush.msrb.mxu1 %v6727_v46  ;;  %v1015_v17 = vsel %vm1012_vm3, %v1014_v47, %v1010_v42 }
 0x26d   :  { %1359 = vmatpush.msrb.mxu2 %v6728_v7  ;;  %1379 = vmatpush.msrb.mxu3 %v6729_v12 }
 0x26e   :  { %1320 = vmatpush.msrb.mxu0 %v6730_v61  ;;  %1340 = vmatpush.msrb.mxu1 %v6731_v15 }
 0x26f   :  { %1360 = vmatpush.msrb.mxu2 %v6732_v62  ;;  %1380 = vmatpush.msrb.mxu3 %v6733_v11 }
 0x270   :  { %1321 = vmatpush.msrb.mxu0 %v6735_v45  ;;  %1341 = vmatpush.msrb.mxu1 %v4874_v24 }
 0x271   :  { %v3805_v18 = vpop.eup %3804  ;;  %1361 = vmatpush.msrb.mxu2 %v4876_v34  ;;  %1381 = vmatpush.msrb.mxu3 %v4880_v13 }
 0x272   :  { %v4988_v51 = vmul.f32 %v3805_v18, %v1015_v17  ;;  %1322 = vmatpush.msrb.mxu0 %v4882_v21  ;;  %1342 = vmatpush.msrb.mxu1 %v4884_v16 }
 0x273   :  { %1362 = vmatpush.msrb.mxu2 %v4890_v35  ;;  %1382 = vmatpush.msrb.mxu3 %v4892_v19 }
 0x274   :  { %6734 = vst [vmem:[#allocation53_spill] sm:$0xff] %v4988_v51  ;;  %1107 = vmatmul.f32.vlgmr.msra.gmra.mxu0 %v4988_v51  ;;  %1127 = vmatmul.f32.vlgmr.msra.gmra.mxu1 %v4988_v51 }
 0x275   :  { %1147 = vmatmul.f32.vlgmr.msra.gmra.mxu2 %v4988_v51  ;;  %1167 = vmatmul.f32.vlgmr.msra.gmra.mxu3 %v4988_v51  ;;  %v5272_v51 = vld [vmem:[#allocation7 + $0x58] sm:$0xff] }
 0x276   :  { %1523 = vmatpush.msra.mxu0 %v6736_v56  ;;  %1543 = vmatpush.msra.mxu1 %v4700_v59  ;;  %v6741_v59 = vld [vmem:[#allocation46_spill] sm:$0xff]  ;;  %6770 = vst [vmem:[#allocation41_spill] sm:$0xff] %v5272_v51 }
 0x277   :  { %1563 = vmatpush.msra.mxu2 %v6737_v58  ;;  %1583 = vmatpush.msra.mxu3 %v6738_v60 }
 0x278   :  { %1524 = vmatpush.msra.mxu0 %v6739_v2  ;;  %1544 = vmatpush.msra.mxu1 %v6740_v6 }
 0x279   :  { %1564 = vmatpush.msra.mxu2 %v4714_v63  ;;  %1584 = vmatpush.msra.mxu3 %v4718_v0  ;;  %v6743_v63 = vld [vmem:[#allocation48_spill] sm:$0xff]  ;;  %v6744_v0 = vld [vmem:[#allocation49_spill] sm:$0xff] }
 0x27a   :  { %1525 = vmatpush.msra.mxu0 %v4722_v40  ;;  %1545 = vmatpush.msra.mxu1 %v4724_v27  ;;  %v6745_v40 = vld [vmem:[#allocation50_spill] sm:$0xff]  ;;  %v6746_v27 = vld [vmem:[#allocation51_spill] sm:$0xff] }
 0x27b   :  { %1565 = vmatpush.msra.mxu2 %v4726_v53  ;;  %1585 = vmatpush.msra.mxu3 %v4730_v14  ;;  %v6747_v53 = vld [vmem:[#allocation52_spill] sm:$0xff] }
 0x27c   :  { %1526 = vmatpush.msra.mxu0 %v4734_v8  ;;  %1546 = vmatpush.msra.mxu1 %v6741_v59  ;;  %v6752_v8 = vld [vmem:[#allocation36_spill] sm:$0xff] }
 0x27d   :  { %1566 = vmatpush.msra.mxu2 %v6742_v38  ;;  %1586 = vmatpush.msra.mxu3 %v4742_v3  ;;  %v6753_v3 = vld [vmem:[#allocation18_spill] sm:$0xff] }
 0x27e   :  { %1527 = vmatpush.msra.mxu0 %v4746_v5  ;;  %1547 = vmatpush.msra.mxu1 %v4748_v31  ;;  %v329_v5 = vadd.f32 %v6753_v3, %v6752_v8 }
 0x27f   :  { %1567 = vmatpush.msra.mxu2 %v4750_v37  ;;  %1587 = vmatpush.msra.mxu3 %v6743_v63 }
 0x280   :  { %1528 = vmatpush.msra.mxu0 %v4758_v41  ;;  %1548 = vmatpush.msra.mxu1 %v4760_v4 }
 0x281   :  { %1568 = vmatpush.msra.mxu2 %v6744_v0  ;;  %1588 = vmatpush.msra.mxu3 %v4766_v43 }
 0x282   :  { %1529 = vmatpush.msra.mxu0 %v4770_v44  ;;  %1549 = vmatpush.msra.mxu1 %v6745_v40 }
 0x283   :  { %1569 = vmatpush.msra.mxu2 %v6746_v27  ;;  %1589 = vmatpush.msra.mxu3 %v6747_v53 }
 0x284   :  { %1530 = vmatpush.msra.mxu0 %v4782_v48  ;;  %1550 = vmatpush.msra.mxu1 %v4784_v50  ;;  %v6754_v50 = vld [vmem:[#allocation38_spill] sm:$0xff] }
 0x285   :  { %1570 = vmatpush.msra.mxu2 %v4786_v52  ;;  %1590 = vmatpush.msra.mxu3 %v4790_v54  ;;  %v6755_v52 = vld [vmem:[#allocation17_spill] sm:$0xff] }
 0x286   :  { %1531 = vmatpush.msra.mxu0 %v4794_v9  ;;  %1551 = vmatpush.msra.mxu1 %v4796_v49  ;;  %v288_v54 = vadd.f32 %v6755_v52, %v6754_v50 }
 0x287   :  { %1571 = vmatpush.msra.mxu2 %v4798_v39  ;;  %1591 = vmatpush.msra.mxu3 %v4806_v55 }
 0x288   :  { %1532 = vmatpush.msra.mxu0 %v4810_v30  ;;  %1552 = vmatpush.msra.mxu1 %v4812_v28  ;;  %v6751_v28 = vld [vmem:[#allocation16_spill] sm:$0xff] }
 0x289   :  { %1572 = vmatpush.msra.mxu2 %v4814_v10  ;;  %1592 = vmatpush.msra.mxu3 %v4818_v29 }
 0x28a   :  { %1533 = vmatpush.msra.mxu0 %v4822_v25  ;;  %1553 = vmatpush.msra.mxu1 %v4824_v23  ;;  %v6750_v25 = vld [vmem:[#allocation33_spill] sm:$0xff] }
 0x28b   :  { %1573 = vmatpush.msra.mxu2 %v4826_v22  ;;  %1593 = vmatpush.msra.mxu3 %v4830_v32  ;;  %v6749_v22 = vld [vmem:[#allocation15_spill] sm:$0xff]  ;;  %v247_v29 = vadd.f32 %v6751_v28, %v6750_v25 }
 0x28c   :  { %1534 = vmatpush.msra.mxu0 %v4834_v33  ;;  %1554 = vmatpush.msra.mxu1 %v4836_v36 }
 0x28d   :  { %1574 = vmatpush.msra.mxu2 %v4838_v1  ;;  %1594 = vmatpush.msra.mxu3 %v4842_v26 }
 0x28e   :  { %1535 = vmatpush.msra.mxu0 %v4848_v20  ;;  %1555 = vmatpush.msra.mxu1 %v6727_v46  ;;  %v6748_v20 = vld [vmem:[#allocation32_spill] sm:$0xff] }
 0x28f   :  { %1575 = vmatpush.msra.mxu2 %v6728_v7  ;;  %1595 = vmatpush.msra.mxu3 %v6729_v12  ;;  %v206_v23 = vadd.f32 %v6749_v22, %v6748_v20 }
 0x290   :  { %1536 = vmatpush.msra.mxu0 %v6730_v61  ;;  %1556 = vmatpush.msra.mxu1 %v6731_v15 }
 0x291   :  { %1576 = vmatpush.msra.mxu2 %v6732_v62  ;;  %1596 = vmatpush.msra.mxu3 %v6733_v11 }
 0x292   :  { %1537 = vmatpush.msra.mxu0 %v6735_v45  ;;  %1557 = vmatpush.msra.mxu1 %v4874_v24 }
 0x293   :  { %1577 = vmatpush.msra.mxu2 %v4876_v34  ;;  %1597 = vmatpush.msra.mxu3 %v4880_v13 }
 0x294   :  { %1538 = vmatpush.msra.mxu0 %v4882_v21  ;;  %1558 = vmatpush.msra.mxu1 %v4884_v16 }
 0x295   :  { %1578 = vmatpush.msra.mxu2 %v4890_v35  ;;  %1598 = vmatpush.msra.mxu3 %v4892_v19 }
 0x2f1   :  { %v1108_v30 = vpop.f32.mrf.mxu0  ;;  %v1128_v39 = vpop.f32.mrf.mxu1 }
 0x2f2   :  { %v1171_v49 = vadd.f32 %v1108_v30, %v206_v23  ;;  %v1172_v34 = vadd.f32 %v1128_v39, %v247_v29  ;;  %v6758_v30 = vld [vmem:[#allocation20_spill] sm:$0xff] }
 0x2f3   :  { %v250_v39 = vadd.f32 %v6758_v30, %v6750_v25 }
 0x2f4   :  { %v3711_v55 = vmul.f32 -1.442695, %v1171_v49  ;;  %v3712_v14 = vmul.f32 -1.442695, %v1172_v34 }
 0x2f6   :  { %3806 = vpow2.f32 %v3711_v55 }
 0x2f7   :  { %3808 = vpow2.f32 %v3712_v14 }
 0x2f8   :  { %v1168_v35 = vpop.f32.mrf.mxu3  ;;  %v1148_v44 = vpop.f32.mrf.mxu2 }
 0x2f9   :  { %v1174_v31 = vadd.f32 %v1168_v35, %v329_v5  ;;  %v1173_v32 = vadd.f32 %v1148_v44, %v288_v54  ;;  %v6759_v35 = vld [vmem:[#allocation21_spill] sm:$0xff] }
 0x2fb   :  { %v3713_v19 = vmul.f32 -1.442695, %v1174_v31  ;;  %v332_v31 = vadd.f32 %v6759_v35, %v6752_v8  ;;  %v5122_v35 = vld [vmem:[#allocation7 + $0x1d8] sm:$0xff] }
 0x2fc   :  { %v3807_v37 = vpop.eup %3806 }
 0x2fd   :  { %v3809_v41 = vpop.eup %3808  ;;  %v1178_v4 = vadd.f32 1.0, %v3807_v37  ;;  %3810 = vpow2.f32 %v3713_v19 }
 0x2fe   :  { %v1197_v43 = vadd.f32 1.0, %v3809_v41 }
 0x2ff   :  { %3812 = vrcp.f32 %v1178_v4  ;;  %v1190_v21 = vand.u32 2147483648, %v1178_v4  ;;  %v1188_v42 = vand.u32 2147483647, %v1178_v4  ;;  %vm1184_vm6 = vweird.f32 %v1178_v4 }
 0x300   :  { %3814 = vrcp.f32 %v1197_v43  ;;  %v1209_v24 = vand.u32 2147483648, %v1197_v43  ;;  %v1207_v47 = vand.u32 2147483647, %v1197_v43  ;;  %vm1203_vm7 = vweird.f32 %v1197_v43 }
 0x301   :  { %v1191_v61 = vor.u32 1.1754944e-38, %v1190_v21  ;;  %vm1189_vm10 = vcmp.eq.f32.partialorder %v1188_v42, 8.507059e+37 }
 0x302   :  { %v1210_v17 = vor.u32 1.1754944e-38, %v1209_v24  ;;  %vm1208_vm11 = vcmp.eq.f32.partialorder %v1207_v47, 8.507059e+37 }
 0x303   :  { %v3811_v48 = vpop.eup %3810 }
 0x304   :  { %v1217_v9 = vadd.f32 1.0, %v3811_v48 }
 0x305   :  { %v3813_v10 = vpop.eup %3812 }
 0x306   :  { %v3815_v33 = vpop.eup %3814  ;;  %v1180_v36 = vmul.f32 %v3813_v10, %v1178_v4  ;;  %3816 = vrcp.f32 %v1217_v9  ;;  %vm1185_vm4 = vweird.f32 %v3813_v10  ;;  %v1229_v0 = vand.u32 2147483648, %v1217_v9 }
 0x307   :  { %v1199_v1 = vmul.f32 %v3815_v33, %v1197_v43  ;;  %3818 = vtanh.f32 %v1173_v32  ;;  %vm1204_vm5 = vweird.f32 %v3815_v33  ;;  %vm1186_vm8 = vmor %vm1184_vm6, %vm1185_vm4  ;;  %vm1223_vm13 = vweird.f32 %v1217_v9 }
 0x308   :  { %v1181_v26 = vsub.f32 1.0, %v1180_v36  ;;  %vm1205_vm9 = vmor %vm1203_vm7, %vm1204_vm5  ;;  %v1227_v40 = vand.u32 2147483647, %v1217_v9  ;;  %v1230_v53 = vor.u32 1.1754944e-38, %v1229_v0 }
 0x309   :  { %v1200_v13 = vsub.f32 1.0, %v1199_v1 }
 0x30a   :  { %v1182_v16 = vmul.f32 %v3813_v10, %v1181_v26  ;;  %vm1228_vm15 = vcmp.eq.f32.partialorder %v1227_v40, 8.507059e+37 }
 0x30b   :  { %v1201_v46 = vmul.f32 %v3815_v33, %v1200_v13 }
 0x30c   :  { %v3817_v7 = vpop.eup %3816  ;;  %v1183_v12 = vadd.f32 %v3813_v10, %v1182_v16 }
 0x30d   :  { %v1202_v15 = vadd.f32 %v3815_v33, %v1201_v46  ;;  %v1219_v18 = vmul.f32 %v3817_v7, %v1217_v9  ;;  %v3819_v11 = vpop.eup %3818  ;;  %vm1224_vm12 = vweird.f32 %v3817_v7  ;;  %v6760_v9 = vld [vmem:[#allocation24_spill] sm:$0xff] }
 0x30e   :  { %v1187_v62 = vsel %vm1186_vm8, %v3813_v10, %v1183_v12  ;;  %vm1225_vm14 = vmor %vm1223_vm13, %vm1224_vm12  ;;  %v291_v10 = vadd.f32 %v6760_v9, %v6754_v50  ;;  %v5154_v9 = vld [vmem:[#allocation7 + $0x170] sm:$0xff] }
 0x30f   :  { %v1192_v45 = vsel %vm1189_vm10, %v1191_v61, %v1187_v62  ;;  %v1206_v56 = vsel %vm1205_vm9, %v3815_v33, %v1202_v15  ;;  %v1220_v58 = vsub.f32 1.0, %v1219_v18 }
 0x310   :  { %v1211_v60 = vsel %vm1208_vm11, %v1210_v17, %v1206_v56  ;;  %v1234_v2 = vmul.f32 %v3819_v11, %v1192_v45 }
 0x311   :  { %v1233_v6 = vmul.f32 %v1211_v60, %v4961_v57  ;;  %v1221_v59 = vmul.f32 %v3817_v7, %v1220_v58  ;;  %v6757_v57 = vld [vmem:[#allocation19_spill] sm:$0xff] }
 0x312   :  { %v209_v29 = vadd.f32 %v6757_v57, %v6748_v20 }
 0x313   :  { %v5075_v38 = vadd.f32 %v1234_v2, %v1233_v6  ;;  %v1222_v63 = vadd.f32 %v3817_v7, %v1221_v59 }
 0x315   :  { %3820 = vtanh.f32 %v5075_v38  ;;  %v1226_v27 = vsel %vm1225_vm14, %v3817_v7, %v1222_v63 }
 0x316   :  { %v1231_v23 = vsel %vm1228_vm15, %v1230_v53, %v1226_v27 }
 0x31b   :  { %v3821_v22 = vpop.eup %3820 }
 0x31c   :  { %v5078_v28 = vmul.f32 %v3821_v22, %v1231_v23 }
 0x31e   :  { %6756 = vst [vmem:[#allocation54_spill] sm:$0xff] %v5078_v28  ;;  %1323 = vmatmul.f32.vlgmr.msrb.gmra.mxu0 %v5078_v28  ;;  %1343 = vmatmul.f32.vlgmr.msrb.gmra.mxu1 %v5078_v28 }
 0x31f   :  { %1363 = vmatmul.f32.vlgmr.msrb.gmra.mxu2 %v5078_v28  ;;  %1383 = vmatmul.f32.vlgmr.msrb.gmra.mxu3 %v5078_v28  ;;  %v5268_v28 = vld [vmem:[#allocation7 + $0x50] sm:$0xff] }
 0x320   :  { %6769 = vst [vmem:[#allocation60_spill] sm:$0xff] %v5268_v28 }
 0x39b   :  { %v1324_v49 = vpop.f32.mrf.mxu0  ;;  %v1344_v34 = vpop.f32.mrf.mxu1 }
 0x39c   :  { %v1387_v55 = vadd.f32 %v1324_v49, %v209_v29  ;;  %v1388_v14 = vadd.f32 %v1344_v34, %v250_v39  ;;  %v5104_v49 = vld [vmem:[#allocation7 + $0x1e8] sm:$0xff]  ;;  %v5106_v34 = vld [vmem:[#allocation7 + $0x1f0] sm:$0xff] }
 0x39d   :  { %1759 = vmatpush.msrb.mxu1 %v5104_v49  ;;  %1779 = vmatpush.msrb.mxu2 %v5106_v34 }
 0x39e   :  { %v3714_v3 = vmul.f32 -1.442695, %v1387_v55  ;;  %v3715_v5 = vmul.f32 -1.442695, %v1388_v14  ;;  %v5110_v55 = vld [vmem:[#allocation7 + $0x1f8] sm:$0xff]  ;;  %v5114_v14 = vld [vmem:[#allocation7 + $0x1c0] sm:$0xff] }
 0x39f   :  { %1799 = vmatpush.msrb.mxu3 %v5110_v55 }
 0x3a0   :  { %3822 = vpow2.f32 %v3714_v3  ;;  %v5116_v3 = vld [vmem:[#allocation7 + $0x1c8] sm:$0xff] }
 0x3a1   :  { %3824 = vpow2.f32 %v3715_v5  ;;  %v5118_v5 = vld [vmem:[#allocation7 + $0x1d0] sm:$0xff]  ;;  %1760 = vmatpush.msrb.mxu1 %v5116_v3  ;;  %1800 = vmatpush.msrb.mxu3 %v5122_v35 }
 0x3a2   :  { %v1384_v19 = vpop.f32.mrf.mxu3  ;;  %v1364_v52 = vpop.f32.mrf.mxu2  ;;  %1780 = vmatpush.msrb.mxu2 %v5118_v5 }
 0x3a3   :  { %v1390_v37 = vadd.f32 %v1384_v19, %v332_v31  ;;  %v1389_v36 = vadd.f32 %v1364_v52, %v291_v10  ;;  %v5126_v31 = vld [vmem:[#allocation7 + $0x1a0] sm:$0xff]  ;;  %v5128_v19 = vld [vmem:[#allocation7 + $0x1a8] sm:$0xff]  ;;  %v5158_v10 = vld [vmem:[#allocation7 + $0x178] sm:$0xff] }
 0x3a4   :  { %1761 = vmatpush.msrb.mxu1 %v5128_v19  ;;  %v5150_v52 = vld [vmem:[#allocation7 + $0x160] sm:$0xff] }
 0x3a5   :  { %v3716_v41 = vmul.f32 -1.442695, %v1390_v37  ;;  %v5130_v37 = vld [vmem:[#allocation7 + $0x1b0] sm:$0xff] }
 0x3a6   :  { %v3823_v4 = vpop.eup %3822  ;;  %1781 = vmatpush.msrb.mxu2 %v5130_v37 }
 0x3a7   :  { %v3825_v43 = vpop.eup %3824  ;;  %v1394_v44 = vadd.f32 1.0, %v3823_v4  ;;  %3826 = vpow2.f32 %v3716_v41  ;;  %v5134_v41 = vld [vmem:[#allocation7 + $0x1b8] sm:$0xff]  ;;  %v5138_v4 = vld [vmem:[#allocation7 + $0x180] sm:$0xff] }
 0x3a8   :  { %v1413_v48 = vadd.f32 1.0, %v3825_v43  ;;  %1801 = vmatpush.msrb.mxu3 %v5134_v41  ;;  %v5140_v43 = vld [vmem:[#allocation7 + $0x188] sm:$0xff] }
 0x3a9   :  { %3828 = vrcp.f32 %v1394_v44  ;;  %v1406_v16 = vand.u32 2147483648, %v1394_v44  ;;  %v1404_v47 = vand.u32 2147483647, %v1394_v44  ;;  %vm1400_vm2 = vweird.f32 %v1394_v44  ;;  %1762 = vmatpush.msrb.mxu1 %v5140_v43 }
 0x3aa   :  { %3830 = vrcp.f32 %v1413_v48  ;;  %v1425_v42 = vand.u32 2147483648, %v1413_v48  ;;  %v1423_v12 = vand.u32 2147483647, %v1413_v48  ;;  %vm1419_vm3 = vweird.f32 %v1413_v48 }
 0x3ab   :  { %v1407_v18 = vor.u32 1.1754944e-38, %v1406_v16  ;;  %vm1405_vm6 = vcmp.eq.f32.partialorder %v1404_v47, 8.507059e+37  ;;  %v5186_v16 = vld [vmem:[#allocation7 + $0x100] sm:$0xff]  ;;  %v5194_v47 = vld [vmem:[#allocation7 + $0x118] sm:$0xff] }
 0x3ac   :  { %v1426_v11 = vor.u32 1.1754944e-38, %v1425_v42  ;;  %vm1424_vm7 = vcmp.eq.f32.partialorder %v1423_v12, 8.507059e+37  ;;  %v5188_v42 = vld [vmem:[#allocation7 + $0x108] sm:$0xff] }
 0x3ad   :  { %v3827_v54 = vpop.eup %3826  ;;  %v5200_v12 = vld [vmem:[#allocation7 + $0xe8] sm:$0xff] }
 0x3ae   :  { %v1433_v32 = vadd.f32 1.0, %v3827_v54  ;;  %v5152_v54 = vld [vmem:[#allocation7 + $0x168] sm:$0xff] }
 0x3af   :  { %v3829_v33 = vpop.eup %3828  ;;  %1763 = vmatpush.msrb.mxu1 %v5152_v54 }
 0x3b0   :  { %v3831_v1 = vpop.eup %3830  ;;  %v1396_v26 = vmul.f32 %v3829_v33, %v1394_v44  ;;  %3832 = vrcp.f32 %v1433_v32  ;;  %vm1401_vm0 = vweird.f32 %v3829_v33  ;;  %v1445_v53 = vand.u32 2147483648, %v1433_v32  ;;  %v5142_v44 = vld [vmem:[#allocation7 + $0x190] sm:$0xff] }
 0x3b1   :  { %v1415_v13 = vmul.f32 %v3831_v1, %v1413_v48  ;;  %3834 = vtanh.f32 %v1389_v36  ;;  %vm1420_vm1 = vweird.f32 %v3831_v1  ;;  %vm1402_vm4 = vmor %vm1400_vm2, %vm1401_vm0  ;;  %vm1439_vm9 = vweird.f32 %v1433_v32  ;;  %v5146_v48 = vld [vmem:[#allocation7 + $0x198] sm:$0xff]  ;;  %1782 = vmatpush.msrb.mxu2 %v5142_v44  ;;  %v5166_v36 = vld [vmem:[#allocation7 + $0x150] sm:$0xff] }
 0x3b2   :  { %v1397_v21 = vsub.f32 1.0, %v1396_v26  ;;  %vm1421_vm5 = vmor %vm1419_vm3, %vm1420_vm1  ;;  %v1443_v22 = vand.u32 2147483647, %v1433_v32  ;;  %v1446_v57 = vor.u32 1.1754944e-38, %v1445_v53  ;;  %1802 = vmatpush.msrb.mxu3 %v5146_v48  ;;  %v5174_v26 = vld [vmem:[#allocation7 + $0x120] sm:$0xff]  ;;  %v5230_v53 = vld [vmem:[#allocation7 + $0xb0] sm:$0xff] }
 0x3b3   :  { %v1416_v24 = vsub.f32 1.0, %v1415_v13  ;;  %1783 = vmatpush.msrb.mxu2 %v5154_v9  ;;  %v5176_v13 = vld [vmem:[#allocation7 + $0x128] sm:$0xff] }
 0x3b4   :  { %v1398_v46 = vmul.f32 %v3829_v33, %v1397_v21  ;;  %vm1444_vm11 = vcmp.eq.f32.partialorder %v1443_v22, 8.507059e+37  ;;  %1803 = vmatpush.msrb.mxu3 %v5158_v10  ;;  %v5178_v21 = vld [vmem:[#allocation7 + $0x130] sm:$0xff] }
 0x3b5   :  { %v1417_v7 = vmul.f32 %v3831_v1, %v1416_v24  ;;  %1784 = vmatpush.msrb.mxu2 %v5166_v36  ;;  %v5182_v24 = vld [vmem:[#allocation7 + $0x138] sm:$0xff] }
 0x3b6   :  { %v3833_v61 = vpop.eup %3832  ;;  %v1399_v15 = vadd.f32 %v3829_v33, %v1398_v46  ;;  %v5190_v46 = vld [vmem:[#allocation7 + $0x110] sm:$0xff] }
 0x3b7   :  { %v1418_v17 = vadd.f32 %v3831_v1, %v1417_v7  ;;  %v1435_v62 = vmul.f32 %v3833_v61, %v1433_v32  ;;  %v3835_v56 = vpop.eup %3834  ;;  %vm1440_vm8 = vweird.f32 %v3833_v61  ;;  %v5162_v32 = vld [vmem:[#allocation7 + $0x140] sm:$0xff]  ;;  %1785 = vmatpush.msrb.mxu2 %v5178_v21 }
 0x3b8   :  { %v1403_v45 = vsel %vm1402_vm4, %v3829_v33, %v1399_v15  ;;  %vm1441_vm10 = vmor %vm1439_vm9, %vm1440_vm8  ;;  %v5164_v33 = vld [vmem:[#allocation7 + $0x148] sm:$0xff]  ;;  %v5198_v7 = vld [vmem:[#allocation7 + $0xe0] sm:$0xff] }
 0x3b9   :  { %v1408_v58 = vsel %vm1405_vm6, %v1407_v18, %v1403_v45  ;;  %v1422_v60 = vsel %vm1421_vm5, %v3831_v1, %v1418_v17  ;;  %v1436_v2 = vsub.f32 1.0, %v1435_v62  ;;  %1764 = vmatpush.msrb.mxu1 %v5164_v33  ;;  %v5170_v1 = vld [vmem:[#allocation7 + $0x158] sm:$0xff]  ;;  %1786 = vmatpush.msrb.mxu2 %v5190_v46  ;;  %v6763_v17 = vld [vmem:[#allocation23_spill] sm:$0xff] }
 0x3ba   :  { %v1427_v6 = vsel %vm1424_vm7, %v1426_v11, %v1422_v60  ;;  %v1450_v59 = vmul.f32 %v3835_v56, %v1408_v58  ;;  %1804 = vmatpush.msrb.mxu3 %v5170_v1  ;;  %v6762_v15 = vld [vmem:[#allocation22_spill] sm:$0xff]  ;;  %v253_v62 = vadd.f32 %v6763_v17, %v6750_v25  ;;  %v5214_v58 = vld [vmem:[#allocation7 + $0xc0] sm:$0xff]  ;;  %v5216_v60 = vld [vmem:[#allocation7 + $0xc8] sm:$0xff] }
 0x3bb   :  { %v1449_v63 = vmul.f32 %v1427_v6, %v5075_v38  ;;  %v1437_v0 = vmul.f32 %v3833_v61, %v1436_v2  ;;  %v5102_v38 = vld [vmem:[#allocation7 + $0x1e0] sm:$0xff]  ;;  %1765 = vmatpush.msrb.mxu1 %v5176_v13  ;;  %v212_v18 = vadd.f32 %v6762_v15, %v6748_v20  ;;  %v5210_v11 = vld [vmem:[#allocation7 + $0xf8] sm:$0xff]  ;;  %v5218_v2 = vld [vmem:[#allocation7 + $0xd0] sm:$0xff] }
 0x3bc   :  { %1739 = vmatpush.msrb.mxu0 %v5102_v38  ;;  %1805 = vmatpush.msrb.mxu3 %v5182_v24  ;;  %v5242_v15 = vld [vmem:[#allocation7 + $0x90] sm:$0xff] }
 0x3bd   :  { %v5093_v40 = vadd.f32 %v1450_v59, %v1449_v63  ;;  %v1438_v27 = vadd.f32 %v3833_v61, %v1437_v0  ;;  %1766 = vmatpush.msrb.mxu1 %v5188_v42  ;;  %v5222_v63 = vld [vmem:[#allocation7 + $0xd8] sm:$0xff]  ;;  %v5226_v0 = vld [vmem:[#allocation7 + $0xa0] sm:$0xff]  ;;  %v6764_v17 = vld [vmem:[#allocation25_spill] sm:$0xff] }
 0x3be   :  { %1740 = vmatpush.msrb.mxu0 %v5114_v14  ;;  %1806 = vmatpush.msrb.mxu3 %v5194_v47  ;;  %v5280_v25 = vld [vmem:[#allocation7 + $0x30] sm:$0xff] }
 0x3bf   :  { %3836 = vtanh.f32 %v5093_v40  ;;  %v1442_v23 = vsel %vm1441_vm10, %v3833_v61, %v1438_v27  ;;  %v5202_v61 = vld [vmem:[#allocation7 + $0xf0] sm:$0xff]  ;;  %1767 = vmatpush.msrb.mxu1 %v5200_v12  ;;  %v5228_v27 = vld [vmem:[#allocation7 + $0xa8] sm:$0xff] }
 0x3c0   :  { %v1447_v30 = vsel %vm1444_vm11, %v1446_v57, %v1442_v23  ;;  %1741 = vmatpush.msrb.mxu0 %v5126_v31  ;;  %1787 = vmatpush.msrb.mxu2 %v5202_v61  ;;  %v5234_v57 = vld [vmem:[#allocation7 + $0xb8] sm:$0xff] }
 0x3c1   :  { %1807 = vmatpush.msrb.mxu3 %v5210_v11  ;;  %1768 = vmatpush.msrb.mxu1 %v5216_v60 }
 0x3c2   :  { %1742 = vmatpush.msrb.mxu0 %v5138_v4  ;;  %1788 = vmatpush.msrb.mxu2 %v5218_v2 }
 0x3c3   :  { %1808 = vmatpush.msrb.mxu3 %v5222_v63  ;;  %1769 = vmatpush.msrb.mxu1 %v5228_v27 }
 0x3c4   :  { %1743 = vmatpush.msrb.mxu0 %v5150_v52  ;;  %1789 = vmatpush.msrb.mxu2 %v5230_v53 }
 0x3c5   :  { %v3837_v29 = vpop.eup %3836  ;;  %1809 = vmatpush.msrb.mxu3 %v5234_v57 }
 0x3c6   :  { %v5096_v39 = vmul.f32 %v3837_v29, %v1447_v30  ;;  %1744 = vmatpush.msrb.mxu0 %v5162_v32  ;;  %v5238_v29 = vld [vmem:[#allocation7 + $0x80] sm:$0xff]  ;;  %v5240_v30 = vld [vmem:[#allocation7 + $0x88] sm:$0xff]  ;;  %1790 = vmatpush.msrb.mxu2 %v5242_v15 }
 0x3c7   :  { %1770 = vmatpush.msrb.mxu1 %v5240_v30 }
 0x3c8   :  { %6761 = vst [vmem:[#allocation55_spill] sm:$0xff] %v5096_v39  ;;  %1539 = vmatmul.f32.vlgmr.msra.gmra.mxu0 %v5096_v39  ;;  %1559 = vmatmul.f32.vlgmr.msra.gmra.mxu1 %v5096_v39 }
 0x3c9   :  { %1579 = vmatmul.f32.vlgmr.msra.gmra.mxu2 %v5096_v39  ;;  %1599 = vmatmul.f32.vlgmr.msra.gmra.mxu3 %v5096_v39 }
 0x3ca   :  { %1745 = vmatpush.msrb.mxu0 %v5174_v26 }
 0x3cc   :  { %1746 = vmatpush.msrb.mxu0 %v5186_v16 }
 0x3ce   :  { %1747 = vmatpush.msrb.mxu0 %v5198_v7 }
 0x3d0   :  { %1748 = vmatpush.msrb.mxu0 %v5214_v58 }
 0x3d2   :  { %1749 = vmatpush.msrb.mxu0 %v5226_v0 }
 0x3d4   :  { %1750 = vmatpush.msrb.mxu0 %v5238_v29 }
 0x445   :  { %v1540_v45 = vpop.f32.mrf.mxu0  ;;  %v1560_v56 = vpop.f32.mrf.mxu1 }
 0x446   :  { %v1603_v6 = vadd.f32 %v1540_v45, %v212_v18  ;;  %v1604_v59 = vadd.f32 %v1560_v56, %v253_v62  ;;  %v5246_v18 = vld [vmem:[#allocation7 + $0x98] sm:$0xff]  ;;  %v335_v62 = vadd.f32 %v6764_v17, %v6752_v8  ;;  %v5252_v45 = vld [vmem:[#allocation7 + $0x60] sm:$0xff]  ;;  %v5254_v56 = vld [vmem:[#allocation7 + $0x68] sm:$0xff] }
 0x447   :  { %1810 = vmatpush.msrb.mxu3 %v5246_v18  ;;  %1751 = vmatpush.msrb.mxu0 %v5252_v45  ;;  %v5266_v17 = vld [vmem:[#allocation7 + $0x48] sm:$0xff] }
 0x448   :  { %v3717_v22 = vmul.f32 -1.442695, %v1603_v6  ;;  %v3718_v23 = vmul.f32 -1.442695, %v1604_v59  ;;  %v5256_v6 = vld [vmem:[#allocation7 + $0x70] sm:$0xff]  ;;  %1771 = vmatpush.msrb.mxu1 %v5254_v56  ;;  %6768 = vst [vmem:[#allocation59_spill] sm:$0xff] %v5266_v17 }
 0x449   :  { %6765 = vst [vmem:[#allocation56_spill] sm:$0xff] %v5256_v6  ;;  %1791 = vmatpush.msrb.mxu2 %v5256_v6  ;;  %v5296_v6 = vld [vmem:[#allocation7 + $0x18] sm:$0xff] }
 0x44a   :  { %3838 = vpow2.f32 %v3717_v22  ;;  %v5260_v22 = vld [vmem:[#allocation7 + $0x78] sm:$0xff]  ;;  %1772 = vmatpush.msrb.mxu1 %v5266_v17  ;;  %v5286_v17 = vld [vmem:[#allocation7] sm:$0xff] }
 0x44b   :  { %3840 = vpow2.f32 %v3718_v23  ;;  %6766 = vst [vmem:[#allocation57_spill] sm:$0xff] %v5260_v22  ;;  %1811 = vmatpush.msrb.mxu3 %v5260_v22  ;;  %v5264_v23 = vld [vmem:[#allocation7 + $0x40] sm:$0xff]  ;;  %1792 = vmatpush.msrb.mxu2 %v5268_v28 }
 0x44c   :  { %v1600_v59 = vpop.f32.mrf.mxu3  ;;  %6767 = vst [vmem:[#allocation58_spill] sm:$0xff] %v5264_v23  ;;  %1752 = vmatpush.msrb.mxu0 %v5264_v23  ;;  %v5284_v23 = vld [vmem:[#allocation7 + $0x38] sm:$0xff] }
 0x44d   :  { %v1606_v39 = vadd.f32 %v1600_v59, %v335_v62  ;;  %1812 = vmatpush.msrb.mxu3 %v5272_v51  ;;  %v5276_v62 = vld [vmem:[#allocation7 + $0x20] sm:$0xff]  ;;  %v5278_v59 = vld [vmem:[#allocation7 + $0x28] sm:$0xff]  ;;  %1793 = vmatpush.msrb.mxu2 %v5280_v25  ;;  %v5294_v51 = vld [vmem:[#allocation7 + $0x10] sm:$0xff] }
 0x44e   :  { %6771 = vst [vmem:[#allocation42_spill] sm:$0xff] %v5276_v62  ;;  %1753 = vmatpush.msrb.mxu0 %v5276_v62  ;;  %1773 = vmatpush.msrb.mxu1 %v5278_v59 }
 0x44f   :  { %v3719_v8 = vmul.f32 -1.442695, %v1606_v39  ;;  %v5288_v39 = vld [vmem:[#allocation7 + $0x8] sm:$0xff]  ;;  %1813 = vmatpush.msrb.mxu3 %v5284_v23  ;;  %6772 = vst [vmem:[#allocation43_spill] sm:$0xff] %v5294_v51  ;;  %1794 = vmatpush.msrb.mxu2 %v5294_v51 }
 0x450   :  { %v3839_v20 = vpop.eup %3838  ;;  %1754 = vmatpush.msrb.mxu0 %v5286_v17  ;;  %1774 = vmatpush.msrb.mxu1 %v5288_v39 }
 0x451   :  { %v3841_v28 = vpop.eup %3840  ;;  %v5290_v22 = vadd.f32 1.0, %v3839_v20  ;;  %3842 = vpow2.f32 %v3719_v8  ;;  %1814 = vmatpush.msrb.mxu3 %v5296_v6  ;;  %1995 = vmatpush.msra.mxu2 %v5106_v34  ;;  %v1580_v20 = vpop.f32.mrf.mxu2 }
 0x452   :  { %v5298_v62 = vadd.f32 1.0, %v3841_v28  ;;  %1955 = vmatpush.msra.mxu0 %v5102_v38  ;;  %1975 = vmatpush.msra.mxu1 %v5104_v49  ;;  %v6773_v28 = vld [vmem:[#allocation28_spill] sm:$0xff] }
 0x453   :  { %3844 = vrcp.f32 %v5290_v22  ;;  %2015 = vmatpush.msra.mxu3 %v5110_v55  ;;  %v294_v51 = vadd.f32 %v6773_v28, %v6754_v50  ;;  %1996 = vmatpush.msra.mxu2 %v5118_v5  ;;  %vm1616_vm14 = vweird.f32 %v5290_v22  ;;  %v2155_v28 = vld [vmem:[#allocation9 + $0x160] sm:$0xff] }
 0x454   :  { %3846 = vrcp.f32 %v5298_v62  ;;  %1956 = vmatpush.msra.mxu0 %v5114_v14  ;;  %1976 = vmatpush.msra.mxu1 %v5116_v3  ;;  %vm1635_vm15 = vweird.f32 %v5298_v62 }
 0x455   :  { %2016 = vmatpush.msra.mxu3 %v5122_v35  ;;  %v1605_v34 = vadd.f32 %v1580_v20, %v294_v51  ;;  %1997 = vmatpush.msra.mxu2 %v5130_v37  ;;  %v1622_v35 = vand.u32 2147483648, %v5290_v22  ;;  %v1620_v37 = vand.u32 2147483647, %v5290_v22  ;;  %v2161_v20 = vld [vmem:[#allocation9 + $0x190] sm:$0xff] }
 0x456   :  { %1957 = vmatpush.msra.mxu0 %v5126_v31  ;;  %1977 = vmatpush.msra.mxu1 %v5128_v19  ;;  %v1641_v31 = vand.u32 2147483648, %v5298_v62 }
 0x457   :  { %v3843_v8 = vpop.eup %3842  ;;  %2017 = vmatpush.msra.mxu3 %v5134_v41  ;;  %1998 = vmatpush.msra.mxu2 %v5142_v44  ;;  %vm1621_vm2 = vcmp.eq.f32.partialorder %v1620_v37, 8.507059e+37  ;;  %v2151_v37 = vld [vmem:[#allocation9 + $0x140] sm:$0xff] }
 0x458   :  { %v5316_v38 = vadd.f32 1.0, %v3843_v8  ;;  %1958 = vmatpush.msra.mxu0 %v5138_v4  ;;  %1978 = vmatpush.msra.mxu1 %v5140_v43  ;;  %v1639_v4 = vand.u32 2147483647, %v5298_v62  ;;  %v2162_v8 = vld [vmem:[#allocation9 + $0x198] sm:$0xff] }
 0x459   :  { %v3845_v49 = vpop.eup %3844  ;;  %2018 = vmatpush.msra.mxu3 %v5146_v48  ;;  %1999 = vmatpush.msra.mxu2 %v5154_v9  ;;  %v1623_v48 = vor.u32 1.1754944e-38, %v1622_v35  ;;  %v1642_v9 = vor.u32 1.1754944e-38, %v1641_v31  ;;  %v2158_v35 = vld [vmem:[#allocation9 + $0x178] sm:$0xff] }
 0x45a   :  { %v3847_v55 = vpop.eup %3846  ;;  %v1612_v14 = vmul.f32 %v3845_v49, %v5290_v22  ;;  %3848 = vrcp.f32 %v5316_v38  ;;  %1959 = vmatpush.msra.mxu0 %v5150_v52  ;;  %1979 = vmatpush.msra.mxu1 %v5152_v54  ;;  %vm1617_vm12 = vweird.f32 %v3845_v49  ;;  %vm1640_vm3 = vcmp.eq.f32.partialorder %v1639_v4, 8.507059e+37  ;;  %v2170_v22 = vld [vmem:[#allocation9 + $0x1d8] sm:$0xff]  ;;  %v2153_v4 = vld [vmem:[#allocation9 + $0x150] sm:$0xff] }
 0x45b   :  { %v1631_v3 = vmul.f32 %v3847_v55, %v5298_v62  ;;  %3850 = vtanh.f32 %v1605_v34  ;;  %2019 = vmatpush.msra.mxu3 %v5158_v10  ;;  %vm1636_vm13 = vweird.f32 %v3847_v55  ;;  %2000 = vmatpush.msra.mxu2 %v5166_v36  ;;  %vm1618_vm0 = vmor %vm1616_vm14, %vm1617_vm12  ;;  %vm1655_vm5 = vweird.f32 %v5316_v38  ;;  %v2165_v62 = vld [vmem:[#allocation9 + $0x1b0] sm:$0xff]  ;;  %v6782_v34 = vld [vmem:[#allocation32_spill] sm:$0xff] }
 0x45c   :  { %v1613_v51 = vsub.f32 1.0, %v1612_v14  ;;  %1960 = vmatpush.msra.mxu0 %v5162_v32  ;;  %1980 = vmatpush.msra.mxu1 %v5164_v33  ;;  %vm1637_vm1 = vmor %vm1635_vm15, %vm1636_vm13 }
 0x45d   :  { %v1632_v5 = vsub.f32 1.0, %v1631_v3  ;;  %2020 = vmatpush.msra.mxu3 %v5170_v1  ;;  %2001 = vmatpush.msra.mxu2 %v5178_v21  ;;  %v6784_v3 = vld [vmem:[#allocation33_spill] sm:$0xff] }
 0x45e   :  { %v1614_v19 = vmul.f32 %v3845_v49, %v1613_v51  ;;  %1961 = vmatpush.msra.mxu0 %v5174_v26  ;;  %1981 = vmatpush.msra.mxu1 %v5176_v13  ;;  %v6785_v51 = vld [vmem:[#allocation27_spill] sm:$0xff] }
 0x45f   :  { %v1633_v41 = vmul.f32 %v3847_v55, %v1632_v5  ;;  %2021 = vmatpush.msra.mxu3 %v5182_v24  ;;  %2002 = vmatpush.msra.mxu2 %v5190_v46  ;;  %v1659_v46 = vand.u32 2147483647, %v5316_v38  ;;  %v256_v5 = vadd.f32 %v6785_v51, %v6784_v3  ;;  %v2118_v51 = vld [vmem:[#allocation9 + $0x38] sm:$0xff] }
 0x460   :  { %v5341_v43 = vpop.eup %3848  ;;  %v1615_v44 = vadd.f32 %v3845_v49, %v1614_v19  ;;  %1962 = vmatpush.msra.mxu0 %v5186_v16  ;;  %1982 = vmatpush.msra.mxu1 %v5188_v42 }
 0x461   :  { %v1634_v52 = vadd.f32 %v3847_v55, %v1633_v41  ;;  %v1651_v54 = vmul.f32 %v5341_v43, %v5316_v38  ;;  %v3851_v32 = vpop.eup %3850  ;;  %2022 = vmatpush.msra.mxu3 %v5194_v47  ;;  %2003 = vmatpush.msra.mxu2 %v5202_v61  ;;  %vm1656_vm4 = vweird.f32 %v5341_v43  ;;  %v6775_v61 = vld [vmem:[#allocation57_spill] sm:$0xff]  ;;  %vm1660_vm7 = vcmp.eq.f32.partialorder %v1659_v46, 8.507059e+37  ;;  %v2152_v41 = vld [vmem:[#allocation9 + $0x148] sm:$0xff] }
 0x462   :  { %v1619_v10 = vsel %vm1618_vm0, %v3845_v49, %v1615_v44  ;;  %1963 = vmatpush.msra.mxu0 %v5198_v7  ;;  %1983 = vmatpush.msra.mxu1 %v5200_v12  ;;  %vm1657_vm6 = vmor %vm1655_vm5, %vm1656_vm4  ;;  %v6774_v12 = vld [vmem:[#allocation56_spill] sm:$0xff]  ;;  %v2157_v49 = vld [vmem:[#allocation9 + $0x170] sm:$0xff] }
 0x463   :  { %v1624_v33 = vsel %vm1621_vm2, %v1623_v48, %v1619_v10  ;;  %v1638_v36 = vsel %vm1637_vm1, %v3847_v55, %v1634_v52  ;;  %v1652_v1 = vsub.f32 1.0, %v1651_v54  ;;  %2023 = vmatpush.msra.mxu3 %v5210_v11  ;;  %2004 = vmatpush.msra.mxu2 %v5218_v2  ;;  %v6776_v11 = vld [vmem:[#allocation58_spill] sm:$0xff]  ;;  %v2147_v52 = vld [vmem:[#allocation9 + $0x120] sm:$0xff]  ;;  %v2148_v54 = vld [vmem:[#allocation9 + $0x128] sm:$0xff] }
 0x464   :  { %v1643_v26 = vsel %vm1640_vm3, %v1642_v9, %v1638_v36  ;;  %v1666_v13 = vmul.f32 %v3851_v32, %v1624_v33  ;;  %1964 = vmatpush.msra.mxu0 %v5214_v58  ;;  %1984 = vmatpush.msra.mxu1 %v5216_v60  ;;  %v6777_v58 = vld [vmem:[#allocation59_spill] sm:$0xff]  ;;  %v6783_v55 = vld [vmem:[#allocation26_spill] sm:$0xff]  ;;  %v2149_v9 = vld [vmem:[#allocation9 + $0x130] sm:$0xff] }
 0x465   :  { %v1665_v21 = vmul.f32 %v1643_v26, %v5093_v40  ;;  %v1653_v24 = vmul.f32 %v5341_v43, %v1652_v1  ;;  %2024 = vmatpush.msra.mxu3 %v5222_v63  ;;  %v1661_v40 = vand.u32 2147483648, %v5316_v38  ;;  %2005 = vmatpush.msra.mxu2 %v5230_v53  ;;  %v6778_v63 = vld [vmem:[#allocation60_spill] sm:$0xff]  ;;  %v6780_v53 = vld [vmem:[#allocation42_spill] sm:$0xff]  ;;  %v215_v14 = vadd.f32 %v6783_v55, %v6782_v34  ;;  %v2143_v36 = vld [vmem:[#allocation9 + $0x100] sm:$0xff] }
 0x466   :  { %1965 = vmatpush.msra.mxu0 %v5226_v0  ;;  %1985 = vmatpush.msra.mxu1 %v5228_v27  ;;  %v6779_v0 = vld [vmem:[#allocation41_spill] sm:$0xff]  ;;  %v2156_v38 = vld [vmem:[#allocation9 + $0x168] sm:$0xff]  ;;  %v2154_v48 = vld [vmem:[#allocation9 + $0x158] sm:$0xff] }
 0x467   :  { %v5365_v16 = vadd.f32 %v1666_v13, %v1665_v21  ;;  %v1654_v42 = vadd.f32 %v5341_v43, %v1653_v24  ;;  %2025 = vmatpush.msra.mxu3 %v5234_v57  ;;  %2006 = vmatpush.msra.mxu2 %v5242_v15  ;;  %v1662_v7 = vor.u32 1.1754944e-38, %v1661_v40  ;;  %v6781_v57 = vld [vmem:[#allocation43_spill] sm:$0xff]  ;;  %v2174_v15 = vld [vmem:[#allocation9 + $0x1f8] sm:$0xff]  ;;  %v2144_v1 = vld [vmem:[#allocation9 + $0x108] sm:$0xff] }
 0x468   :  { %1966 = vmatpush.msra.mxu0 %v5238_v29  ;;  %1986 = vmatpush.msra.mxu1 %v5240_v30  ;;  %v2171_v29 = vld [vmem:[#allocation9 + $0x1e0] sm:$0xff]  ;;  %v2173_v30 = vld [vmem:[#allocation9 + $0x1f0] sm:$0xff]  ;;  %v2150_v33 = vld [vmem:[#allocation9 + $0x138] sm:$0xff] }
 0x469   :  { %3852 = vtanh.f32 %v5365_v16  ;;  %2026 = vmatpush.msra.mxu3 %v5246_v18  ;;  %v1658_v47 = vsel %vm1657_vm6, %v5341_v43, %v1654_v42  ;;  %2007 = vmatpush.msra.mxu2 %v6774_v12  ;;  %v2167_v18 = vld [vmem:[#allocation9 + $0x1c0] sm:$0xff]  ;;  %v2145_v26 = vld [vmem:[#allocation9 + $0x110] sm:$0xff]  ;;  %v2146_v13 = vld [vmem:[#allocation9 + $0x118] sm:$0xff] }
 0x46a   :  { %1967 = vmatpush.msra.mxu0 %v5252_v45  ;;  %1987 = vmatpush.msra.mxu1 %v5254_v56  ;;  %v1663_v2 = vsel %vm1660_vm7, %v1662_v7, %v1658_v47  ;;  %v2168_v45 = vld [vmem:[#allocation9 + $0x1c8] sm:$0xff]  ;;  %v2169_v56 = vld [vmem:[#allocation9 + $0x1d0] sm:$0xff]  ;;  %v2139_v40 = vld [vmem:[#allocation9 + $0xe0] sm:$0xff] }
 0x46b   :  { %2027 = vmatpush.msra.mxu3 %v6775_v61  ;;  %2008 = vmatpush.msra.mxu2 %v6778_v63  ;;  %v6786_v21 = vld [vmem:[#allocation36_spill] sm:$0xff]  ;;  %v6787_v24 = vld [vmem:[#allocation29_spill] sm:$0xff]  ;;  %v2142_v12 = vld [vmem:[#allocation9 + $0xf8] sm:$0xff] }
 0x46c   :  { %1968 = vmatpush.msra.mxu0 %v6776_v11  ;;  %1988 = vmatpush.msra.mxu1 %v6777_v58  ;;  %v338_v42 = vadd.f32 %v6787_v24, %v6786_v21  ;;  %v2140_v46 = vld [vmem:[#allocation9 + $0xe8] sm:$0xff]  ;;  %v2141_v47 = vld [vmem:[#allocation9 + $0xf0] sm:$0xff]  ;;  %v2135_v11 = vld [vmem:[#allocation9 + $0xc0] sm:$0xff] }
 0x46d   :  { %2028 = vmatpush.msra.mxu3 %v6779_v0  ;;  %2009 = vmatpush.msra.mxu2 %v5280_v25  ;;  %v2172_v25 = vld [vmem:[#allocation9 + $0x1e8] sm:$0xff]  ;;  %v2131_v0 = vld [vmem:[#allocation9 + $0xa0] sm:$0xff] }
 0x46e   :  { %1969 = vmatpush.msra.mxu0 %v6780_v53  ;;  %1989 = vmatpush.msra.mxu1 %v5278_v59  ;;  %v2159_v59 = vld [vmem:[#allocation9 + $0x180] sm:$0xff]  ;;  %v2136_v58 = vld [vmem:[#allocation9 + $0xc8] sm:$0xff] }
 0x46f   :  { %v3853_v60 = vpop.eup %3852  ;;  %2029 = vmatpush.msra.mxu3 %v5284_v23  ;;  %2010 = vmatpush.msra.mxu2 %v6781_v57  ;;  %v2163_v23 = vld [vmem:[#allocation9 + $0x1a0] sm:$0xff]  ;;  %v2132_v53 = vld [vmem:[#allocation9 + $0xa8] sm:$0xff]  ;;  %v2133_v57 = vld [vmem:[#allocation9 + $0xb0] sm:$0xff] }
 0x470   :  { %v5392_v27 = vmul.f32 %v3853_v60, %v1663_v2  ;;  %1970 = vmatpush.msra.mxu0 %v5286_v17  ;;  %1990 = vmatpush.msra.mxu1 %v5288_v39  ;;  %v2164_v17 = vld [vmem:[#allocation9 + $0x1a8] sm:$0xff]  ;;  %v2137_v60 = vld [vmem:[#allocation9 + $0xd0] sm:$0xff]  ;;  %v2138_v2 = vld [vmem:[#allocation9 + $0xd8] sm:$0xff] }
 0x471   :  { %2030 = vmatpush.msra.mxu3 %v5296_v6  ;;  %v2166_v6 = vld [vmem:[#allocation9 + $0x1b8] sm:$0xff]  ;;  %v2160_v39 = vld [vmem:[#allocation9 + $0x188] sm:$0xff] }
 0x472   :  { %1755 = vmatmul.f32.vlgmr.msrb.gmra.mxu0 %v5392_v27  ;;  %1775 = vmatmul.f32.vlgmr.msrb.gmra.mxu1 %v5392_v27  ;;  %v2116_v55 = vld [vmem:[#allocation9 + $0x28] sm:$0xff] }
 0x473   :  { %1795 = vmatmul.f32.vlgmr.msrb.gmra.mxu2 %v5392_v27  ;;  %1815 = vmatmul.f32.vlgmr.msrb.gmra.mxu3 %v5392_v27 }
 0x474   :  { %2185 = vmatpush.msrb.mxu0 %v2171_v29  ;;  %2226 = vmatpush.msrb.mxu1 %v2172_v25  ;;  %v2134_v25 = vld [vmem:[#allocation9 + $0xb8] sm:$0xff] }
 0x475   :  { %2267 = vmatpush.msrb.mxu2 %v2173_v30  ;;  %2308 = vmatpush.msrb.mxu3 %v2174_v15  ;;  %v2127_v30 = vld [vmem:[#allocation9 + $0x80] sm:$0xff]  ;;  %v2128_v15 = vld [vmem:[#allocation9 + $0x88] sm:$0xff] }
 0x476   :  { %2186 = vmatpush.msrb.mxu0 %v2167_v18  ;;  %2227 = vmatpush.msrb.mxu1 %v2168_v45 }
 0x477   :  { %2268 = vmatpush.msrb.mxu2 %v2169_v56  ;;  %2309 = vmatpush.msrb.mxu3 %v2170_v22  ;;  %v2129_v56 = vld [vmem:[#allocation9 + $0x90] sm:$0xff]  ;;  %v2130_v22 = vld [vmem:[#allocation9 + $0x98] sm:$0xff] }
 0x478   :  { %2187 = vmatpush.msrb.mxu0 %v2163_v23  ;;  %2228 = vmatpush.msrb.mxu1 %v2164_v17  ;;  %v2123_v17 = vld [vmem:[#allocation9 + $0x60] sm:$0xff] }
 0x479   :  { %2269 = vmatpush.msrb.mxu2 %v2165_v62  ;;  %2310 = vmatpush.msrb.mxu3 %v2166_v6  ;;  %v2124_v62 = vld [vmem:[#allocation9 + $0x68] sm:$0xff]  ;;  %v2125_v6 = vld [vmem:[#allocation9 + $0x70] sm:$0xff] }
 0x47a   :  { %2188 = vmatpush.msrb.mxu0 %v2159_v59  ;;  %2229 = vmatpush.msrb.mxu1 %v2160_v39  ;;  %v2126_v59 = vld [vmem:[#allocation9 + $0x78] sm:$0xff]  ;;  %v2119_v39 = vld [vmem:[#allocation9 + $0x40] sm:$0xff] }
 0x47b   :  { %2270 = vmatpush.msrb.mxu2 %v2161_v20  ;;  %2311 = vmatpush.msrb.mxu3 %v2162_v8  ;;  %v2120_v20 = vld [vmem:[#allocation9 + $0x48] sm:$0xff]  ;;  %v2121_v8 = vld [vmem:[#allocation9 + $0x50] sm:$0xff] }
 0x47c   :  { %2189 = vmatpush.msrb.mxu0 %v2155_v28  ;;  %2230 = vmatpush.msrb.mxu1 %v2156_v38  ;;  %v2122_v28 = vld [vmem:[#allocation9 + $0x58] sm:$0xff]  ;;  %v2115_v38 = vld [vmem:[#allocation9 + $0x20] sm:$0xff] }
 0x47d   :  { %2271 = vmatpush.msrb.mxu2 %v2157_v49  ;;  %2312 = vmatpush.msrb.mxu3 %v2158_v35  ;;  %v6788_v35 = vld [vmem:[#allocation34_spill] sm:$0xff] }
 0x47e   :  { %2190 = vmatpush.msrb.mxu0 %v2151_v37  ;;  %2231 = vmatpush.msrb.mxu1 %v2152_v41  ;;  %v2112_v37 = vld [vmem:[#allocation9 + $0x8] sm:$0xff] }
 0x47f   :  { %2272 = vmatpush.msrb.mxu2 %v2153_v4  ;;  %2313 = vmatpush.msrb.mxu3 %v2154_v48  ;;  %v2113_v4 = vld [vmem:[#allocation9 + $0x10] sm:$0xff] }
 0x480   :  { %2191 = vmatpush.msrb.mxu0 %v2147_v52  ;;  %2232 = vmatpush.msrb.mxu1 %v2148_v54 }
 0x481   :  { %2273 = vmatpush.msrb.mxu2 %v2149_v9  ;;  %2314 = vmatpush.msrb.mxu3 %v2150_v33 }
 0x482   :  { %2192 = vmatpush.msrb.mxu0 %v2143_v36  ;;  %2233 = vmatpush.msrb.mxu1 %v2144_v1 }
 0x483   :  { %2274 = vmatpush.msrb.mxu2 %v2145_v26  ;;  %2315 = vmatpush.msrb.mxu3 %v2146_v13 }
 0x484   :  { %2193 = vmatpush.msrb.mxu0 %v2139_v40  ;;  %2234 = vmatpush.msrb.mxu1 %v2140_v46 }
 0x485   :  { %2275 = vmatpush.msrb.mxu2 %v2141_v47  ;;  %2316 = vmatpush.msrb.mxu3 %v2142_v12 }
 0x486   :  { %2194 = vmatpush.msrb.mxu0 %v2135_v11  ;;  %2235 = vmatpush.msrb.mxu1 %v2136_v58 }
 0x487   :  { %2276 = vmatpush.msrb.mxu2 %v2137_v60  ;;  %2317 = vmatpush.msrb.mxu3 %v2138_v2 }
 0x488   :  { %2195 = vmatpush.msrb.mxu0 %v2131_v0  ;;  %2236 = vmatpush.msrb.mxu1 %v2132_v53 }
 0x489   :  { %2277 = vmatpush.msrb.mxu2 %v2133_v57  ;;  %2318 = vmatpush.msrb.mxu3 %v2134_v25 }
 0x48a   :  { %2196 = vmatpush.msrb.mxu0 %v2127_v30  ;;  %2237 = vmatpush.msrb.mxu1 %v2128_v15 }
 0x48b   :  { %2278 = vmatpush.msrb.mxu2 %v2129_v56  ;;  %2319 = vmatpush.msrb.mxu3 %v2130_v22 }
 0x48c   :  { %2197 = vmatpush.msrb.mxu0 %v2123_v17  ;;  %2238 = vmatpush.msrb.mxu1 %v2124_v62  ;;  %v6790_v17 = vld [vmem:[#allocation40_spill] sm:$0xff]  ;;  %v6791_v62 = vld [vmem:[#allocation53_spill] sm:$0xff] }
 0x48d   :  { %2279 = vmatpush.msrb.mxu2 %v2125_v6  ;;  %2320 = vmatpush.msrb.mxu3 %v2126_v59  ;;  %v5444_v6 = vld [vmem:[#allocation10 + $0x1e0] sm:$0xff]  ;;  %v5446_v59 = vld [vmem:[#allocation10 + $0x1e8] sm:$0xff] }
 0x48e   :  { %2198 = vmatpush.msrb.mxu0 %v2119_v39  ;;  %2239 = vmatpush.msrb.mxu1 %v2120_v20  ;;  %6792 = vst [vmem:[#allocation44_spill] sm:$0xff] %v5444_v6  ;;  %v5448_v39 = vld [vmem:[#allocation10 + $0x1c0] sm:$0xff]  ;;  %v5452_v20 = vld [vmem:[#allocation10 + $0x1c8] sm:$0xff] }
 0x48f   :  { %2280 = vmatpush.msrb.mxu2 %v2121_v8  ;;  %2321 = vmatpush.msrb.mxu3 %v2122_v28  ;;  %6793 = vst [vmem:[#allocation45_spill] sm:$0xff] %v5452_v20  ;;  %v5454_v8 = vld [vmem:[#allocation10 + $0x1f8] sm:$0xff]  ;;  %v5457_v28 = vld [vmem:[#allocation10 + $0x1a0] sm:$0xff] }
 0x490   :  { %2199 = vmatpush.msrb.mxu0 %v2115_v38  ;;  %2240 = vmatpush.msrb.mxu1 %v2116_v55  ;;  %v5459_v38 = vld [vmem:[#allocation10 + $0x1a8] sm:$0xff]  ;;  %v6796_v55 = vld [vmem:[#allocation54_spill] sm:$0xff] }
 0x491   :  { %2322 = vmatpush.msrb.mxu3 %v2118_v51  ;;  %6794 = vst [vmem:[#allocation46_spill] sm:$0xff] %v5459_v38  ;;  %v5480_v51 = vld [vmem:[#allocation10 + $0x1f0] sm:$0xff] }
 0x492   :  { %2241 = vmatpush.msrb.mxu1 %v2112_v37  ;;  %v5492_v37 = vld [vmem:[#allocation10 + $0x188] sm:$0xff] }
 0x4ef   :  { %v1756_v31 = vpop.f32.mrf.mxu0  ;;  %v1776_v19 = vpop.f32.mrf.mxu1 }
 0x4f0   :  { %v1819_v43 = vadd.f32 %v1756_v31, %v215_v14  ;;  %v1820_v44 = vadd.f32 %v1776_v19, %v256_v5  ;;  %v2117_v14 = vld [vmem:[#allocation9 + $0x30] sm:$0xff]  ;;  %v297_v31 = vadd.f32 %v6788_v35, %v6754_v50  ;;  %v2111_v19 = vld [vmem:[#allocation9] sm:$0xff]  ;;  %v5486_v35 = vld [vmem:[#allocation10 + $0x1b8] sm:$0xff] }
 0x4f1   :  { %2281 = vmatpush.msrb.mxu2 %v2117_v14  ;;  %2200 = vmatpush.msrb.mxu0 %v2111_v19  ;;  %v6797_v14 = vld [vmem:[#allocation55_spill] sm:$0xff]  ;;  %6798 = vst [vmem:[#allocation48_spill] sm:$0xff] %v5486_v35 }
 0x4f2   :  { %v3720_v10 = vmul.f32 -1.442695, %v1819_v43  ;;  %v3721_v32 = vmul.f32 -1.442695, %v1820_v44  ;;  %v2114_v43 = vld [vmem:[#allocation9 + $0x18] sm:$0xff]  ;;  %v5490_v19 = vld [vmem:[#allocation10 + $0x180] sm:$0xff] }
 0x4f3   :  { %2282 = vmatpush.msrb.mxu2 %v2113_v4  ;;  %2323 = vmatpush.msrb.mxu3 %v2114_v43  ;;  %6799 = vst [vmem:[#allocation49_spill] sm:$0xff] %v5490_v19  ;;  %v5502_v4 = vld [vmem:[#allocation10 + $0x198] sm:$0xff]  ;;  %v5504_v43 = vld [vmem:[#allocation10 + $0x190] sm:$0xff] }
 0x4f4   :  { %3854 = vpow2.f32 %v3720_v10 }
 0x4f5   :  { %3856 = vpow2.f32 %v3721_v32 }
 0x4f6   :  { %v1816_v7 = vpop.f32.mrf.mxu3  ;;  %v1796_v49 = vpop.f32.mrf.mxu2 }
 0x4f7   :  { %v1822_v61 = vadd.f32 %v1816_v7, %v338_v42  ;;  %v1821_v48 = vadd.f32 %v1796_v49, %v297_v31  ;;  %v5461_v49 = vld [vmem:[#allocation10 + $0x1d8] sm:$0xff]  ;;  %v5488_v31 = vld [vmem:[#allocation10 + $0x1b0] sm:$0xff] }
 0x4f8   :  { %6795 = vst [vmem:[#allocation47_spill] sm:$0xff] %v5461_v49 }
 0x4f9   :  { %v3722_v63 = vmul.f32 -1.442695, %v1822_v61 }
 0x4fa   :  { %v3855_v29 = vpop.eup %3854 }
 0x4fb   :  { %v3857_v18 = vpop.eup %3856  ;;  %v5412_v45 = vadd.f32 1.0, %v3855_v29  ;;  %3858 = vpow2.f32 %v3722_v63 }
 0x4fc   :  { %v5414_v23 = vadd.f32 1.0, %v3857_v18 }
 0x4fd   :  { %3860 = vrcp.f32 %v5412_v45  ;;  %v1838_v33 = vand.u32 2147483648, %v5412_v45  ;;  %v1836_v26 = vand.u32 2147483647, %v5412_v45  ;;  %vm1832_vm10 = vweird.f32 %v5412_v45 }
 0x4fe   :  { %3862 = vrcp.f32 %v5414_v23  ;;  %v1857_v36 = vand.u32 2147483648, %v5414_v23  ;;  %v1855_v24 = vand.u32 2147483647, %v5414_v23  ;;  %vm1851_vm11 = vweird.f32 %v5414_v23 }
 0x4ff   :  { %v1839_v46 = vor.u32 1.1754944e-38, %v1838_v33  ;;  %vm1837_vm14 = vcmp.eq.f32.partialorder %v1836_v26, 8.507059e+37  ;;  %v5522_v33 = vld [vmem:[#allocation10 + $0x148] sm:$0xff] }
 0x500   :  { %v1858_v12 = vor.u32 1.1754944e-38, %v1857_v36  ;;  %vm1856_vm15 = vcmp.eq.f32.partialorder %v1855_v24, 8.507059e+37  ;;  %v5524_v36 = vld [vmem:[#allocation10 + $0x158] sm:$0xff] }
 0x501   :  { %v3859_v5 = vpop.eup %3858 }
 0x502   :  { %v1865_v41 = vadd.f32 1.0, %v3859_v5  ;;  %v5483_v5 = vld [vmem:[#allocation10 + $0x1d0] sm:$0xff] }
 0x503   :  { %v3861_v44 = vpop.eup %3860 }
 0x504   :  { %v3863_v52 = vpop.eup %3862  ;;  %v1828_v54 = vmul.f32 %v3861_v44, %v5412_v45  ;;  %3864 = vrcp.f32 %v1865_v41  ;;  %vm1833_vm8 = vweird.f32 %v3861_v44  ;;  %v1877_v30 = vand.u32 2147483648, %v1865_v41 }
 0x505   :  { %v1847_v9 = vmul.f32 %v3863_v52, %v5414_v23  ;;  %3866 = vtanh.f32 %v1821_v48  ;;  %vm1852_vm9 = vweird.f32 %v3863_v52  ;;  %vm1834_vm12 = vmor %vm1832_vm10, %vm1833_vm8  ;;  %vm1871_vm1 = vweird.f32 %v1865_v41  ;;  %v5512_v48 = vld [vmem:[#allocation10 + $0x170] sm:$0xff] }
 0x506   :  { %v1829_v10 = vsub.f32 1.0, %v1828_v54  ;;  %vm1853_vm13 = vmor %vm1851_vm11, %vm1852_vm9  ;;  %v1875_v15 = vand.u32 2147483647, %v1865_v41  ;;  %v1878_v45 = vor.u32 1.1754944e-38, %v1877_v30 }
 0x507   :  { %v1848_v32 = vsub.f32 1.0, %v1847_v9  ;;  %v6801_v9 = vld [vmem:[#allocation31_spill] sm:$0xff] }
 0x508   :  { %v1830_v1 = vmul.f32 %v3861_v44, %v1829_v10  ;;  %vm1876_vm3 = vcmp.eq.f32.partialorder %v1875_v15, 8.507059e+37  ;;  %v259_v10 = vadd.f32 %v6801_v9, %v6784_v3  ;;  %v5535_v3 = vld [vmem:[#allocation10 + $0x138] sm:$0xff]  ;;  %v5570_v15 = vld [vmem:[#allocation10 + $0xa0] sm:$0xff] }
 0x509   :  { %v1849_v13 = vmul.f32 %v3863_v52, %v1848_v32  ;;  %v5520_v32 = vld [vmem:[#allocation10 + $0x140] sm:$0xff]  ;;  %6804 = vst [vmem:[#allocation51_spill] sm:$0xff] %v5570_v15 }
 0x50a   :  { %v3865_v42 = vpop.eup %3864  ;;  %v1831_v40 = vadd.f32 %v3861_v44, %v1830_v1 }
 0x50b   :  { %v1850_v47 = vadd.f32 %v3863_v52, %v1849_v13  ;;  %v1867_v7 = vmul.f32 %v3865_v42, %v1865_v41  ;;  %v3867_v11 = vpop.eup %3866  ;;  %vm1872_vm0 = vweird.f32 %v3865_v42  ;;  %v5500_v41 = vld [vmem:[#allocation10 + $0x168] sm:$0xff]  ;;  %v5528_v13 = vld [vmem:[#allocation10 + $0x150] sm:$0xff] }
 0x50c   :  { %v1835_v61 = vsel %vm1834_vm12, %v3861_v44, %v1831_v40  ;;  %vm1873_vm2 = vmor %vm1871_vm1, %vm1872_vm0  ;;  %v5510_v44 = vld [vmem:[#allocation10 + $0x178] sm:$0xff]  ;;  %v5532_v40 = vld [vmem:[#allocation10 + $0x128] sm:$0xff] }
 0x50d   :  { %v1840_v58 = vsel %vm1837_vm14, %v1839_v46, %v1835_v61  ;;  %v1854_v60 = vsel %vm1853_vm13, %v3863_v52, %v1850_v47  ;;  %v1868_v2 = vsub.f32 1.0, %v1867_v7  ;;  %v6800_v52 = vld [vmem:[#allocation30_spill] sm:$0xff]  ;;  %v5540_v46 = vld [vmem:[#allocation10 + $0x130] sm:$0xff]  ;;  %v5544_v61 = vld [vmem:[#allocation10 + $0x108] sm:$0xff] }
 0x50e   :  { %v1859_v63 = vsel %vm1856_vm15, %v1858_v12, %v1854_v60  ;;  %v1882_v0 = vmul.f32 %v3867_v11, %v1840_v58  ;;  %v218_v54 = vadd.f32 %v6800_v52, %v6782_v34  ;;  %v5530_v34 = vld [vmem:[#allocation10 + $0x120] sm:$0xff]  ;;  %v5552_v58 = vld [vmem:[#allocation10 + $0xe8] sm:$0xff]  ;;  %v5554_v60 = vld [vmem:[#allocation10 + $0x118] sm:$0xff] }
 0x50f   :  { %v1881_v53 = vmul.f32 %v1859_v63, %v5365_v16  ;;  %v1869_v57 = vmul.f32 %v3865_v42, %v1868_v2  ;;  %v6789_v16 = vld [vmem:[#allocation39_spill] sm:$0xff]  ;;  %v5559_v63 = vld [vmem:[#allocation10 + $0xc8] sm:$0xff] }
 0x510   :  { %v5542_v12 = vld [vmem:[#allocation10 + $0x100] sm:$0xff] }
 0x511   :  { %v5429_v29 = vadd.f32 %v1882_v0, %v1881_v53  ;;  %v1870_v25 = vadd.f32 %v3865_v42, %v1869_v57  ;;  %v5550_v11 = vld [vmem:[#allocation10 + $0xe0] sm:$0xff]  ;;  %v5561_v0 = vld [vmem:[#allocation10 + $0xf8] sm:$0xff] }
 0x512   :  { %v5557_v2 = vld [vmem:[#allocation10 + $0xc0] sm:$0xff] }
 0x513   :  { %3868 = vtanh.f32 %v5429_v29  ;;  %v1874_v18 = vsel %vm1873_vm2, %v3865_v42, %v1870_v25  ;;  %v6802_v53 = vld [vmem:[#allocation35_spill] sm:$0xff]  ;;  %v5567_v25 = vld [vmem:[#allocation10 + $0xd8] sm:$0xff] }
 0x514   :  { %v1879_v22 = vsel %vm1876_vm3, %v1878_v45, %v1874_v18  ;;  %v341_v57 = vadd.f32 %v6802_v53, %v6786_v21  ;;  %6803 = vst [vmem:[#allocation50_spill] sm:$0xff] %v5567_v25  ;;  %v5572_v18 = vld [vmem:[#allocation10 + $0xa8] sm:$0xff]  ;;  %v5574_v45 = vld [vmem:[#allocation10 + $0x110] sm:$0xff]  ;;  %v5578_v21 = vld [vmem:[#allocation10 + $0xb8] sm:$0xff] }
 0x515   :  { %6805 = vst [vmem:[#allocation52_spill] sm:$0xff] %v5572_v18  ;;  %v5596_v52 = vld [vmem:[#allocation10 + $0x60] sm:$0xff] }
 0x516   :  { %6806 = vst [vmem:[#allocation15_spill] sm:$0xff] %v5578_v21  ;;  %v5624_v53 = vld [vmem:[#allocation10 + $0x20] sm:$0xff] }
 0x517   :  { %6811 = vst [vmem:[#allocation19_spill] sm:$0xff] %v5596_v52 }
 0x518   :  { %6818 = vst [vmem:[#allocation28_spill] sm:$0xff] %v5624_v53 }
 0x519   :  { %v3869_v56 = vpop.eup %3868 }
 0x51a   :  { %v1885_v23 = vmul.f32 %v3869_v56, %v1879_v22  ;;  %v5580_v22 = vld [vmem:[#allocation10 + $0xf0] sm:$0xff] }
 0x51c   :  { %1971 = vmatmul.f32.vlgmr.msra.gmra.mxu0 %v1885_v23  ;;  %1991 = vmatmul.f32.vlgmr.msra.gmra.mxu1 %v1885_v23 }
 0x51d   :  { %2011 = vmatmul.f32.vlgmr.msra.gmra.mxu2 %v1885_v23  ;;  %2031 = vmatmul.f32.vlgmr.msra.gmra.mxu3 %v1885_v23 }
 0x51e   :  { %2449 = vmatpush.msra.mxu0 %v5444_v6  ;;  %2469 = vmatpush.msra.mxu1 %v5446_v59 }
 0x51f   :  { %2509 = vmatpush.msra.mxu3 %v5454_v8  ;;  %2489 = vmatpush.msra.mxu2 %v5480_v51 }
 0x520   :  { %2450 = vmatpush.msra.mxu0 %v5448_v39  ;;  %2470 = vmatpush.msra.mxu1 %v5452_v20 }
 0x521   :  { %2510 = vmatpush.msra.mxu3 %v5461_v49  ;;  %2490 = vmatpush.msra.mxu2 %v5483_v5 }
 0x522   :  { %2451 = vmatpush.msra.mxu0 %v5457_v28  ;;  %2471 = vmatpush.msra.mxu1 %v5459_v38 }
 0x523   :  { %2511 = vmatpush.msra.mxu3 %v5486_v35  ;;  %2491 = vmatpush.msra.mxu2 %v5488_v31 }
 0x524   :  { %2201 = vmatmul.f32.vlgmr.msrb.gmra.mxu0 %v6789_v16  ;;  %2242 = vmatmul.f32.vlgmr.msrb.gmra.mxu1 %v6789_v16 }
 0x525   :  { %2283 = vmatmul.f32.vlgmr.msrb.gmra.mxu2 %v6789_v16  ;;  %2324 = vmatmul.f32.vlgmr.msrb.gmra.mxu3 %v6789_v16  ;;  %v5586_v16 = vld [vmem:[#allocation10 + $0x88] sm:$0xff] }
 0x526   :  { %2452 = vmatpush.msra.mxu0 %v5490_v19  ;;  %2472 = vmatpush.msra.mxu1 %v5492_v37  ;;  %6808 = vst [vmem:[#allocation18_spill] sm:$0xff] %v5586_v16 }
 0x527   :  { %2512 = vmatpush.msra.mxu3 %v5502_v4  ;;  %2492 = vmatpush.msra.mxu2 %v5504_v43 }
 0x528   :  { %2473 = vmatpush.msra.mxu1 %v5500_v41 }
 0x529   :  { %2513 = vmatpush.msra.mxu3 %v5510_v44  ;;  %2493 = vmatpush.msra.mxu2 %v5512_v48 }
 0x52a   :  { %2474 = vmatpush.msra.mxu1 %v5522_v33 }
 0x52b   :  { %2514 = vmatpush.msra.mxu3 %v5524_v36  ;;  %2494 = vmatpush.msra.mxu2 %v5528_v13 }
 0x52c   :  { %2204 = vmatmul.f32.gmra.mxu0 %v6790_v17  ;;  %2245 = vmatmul.f32.gmra.mxu1 %v6790_v17 }
 0x52d   :  { %2286 = vmatmul.f32.gmra.mxu2 %v6790_v17  ;;  %2327 = vmatmul.f32.gmra.mxu3 %v6790_v17 }
 0x52e   :  { %2475 = vmatpush.msra.mxu1 %v5532_v40  ;;  %2515 = vmatpush.msra.mxu3 %v5535_v3 }
 0x52f   :  { %2495 = vmatpush.msra.mxu2 %v5540_v46 }
 0x530   :  { %2476 = vmatpush.msra.mxu1 %v5544_v61  ;;  %2516 = vmatpush.msra.mxu3 %v5554_v60 }
 0x531   :  { %2496 = vmatpush.msra.mxu2 %v5574_v45 }
 0x532   :  { %2477 = vmatpush.msra.mxu1 %v5552_v58  ;;  %2517 = vmatpush.msra.mxu3 %v5561_v0 }
 0x533   :  { %2497 = vmatpush.msra.mxu2 %v5580_v22 }
 0x534   :  { %2207 = vmatmul.f32.gmra.mxu0 %v6791_v62  ;;  %2248 = vmatmul.f32.gmra.mxu1 %v6791_v62 }
 0x535   :  { %2289 = vmatmul.f32.gmra.mxu2 %v6791_v62  ;;  %2330 = vmatmul.f32.gmra.mxu3 %v6791_v62  ;;  %v5590_v62 = vld [vmem:[#allocation10 + $0x98] sm:$0xff] }
 0x536   :  { %2478 = vmatpush.msra.mxu1 %v5559_v63  ;;  %2518 = vmatpush.msra.mxu3 %v5567_v25  ;;  %6809 = vst [vmem:[#allocation38_spill] sm:$0xff] %v5590_v62 }
 0x538   :  { %2479 = vmatpush.msra.mxu1 %v5572_v18  ;;  %2519 = vmatpush.msra.mxu3 %v5578_v21 }
 0x53a   :  { %2480 = vmatpush.msra.mxu1 %v5586_v16  ;;  %2520 = vmatpush.msra.mxu3 %v5590_v62  ;;  %v5648_v62 = vld [vmem:[#allocation10 + $0x18] sm:$0xff] }
 0x53b   :  { %6827 = vst [vmem:[#allocation43_spill] sm:$0xff] %v5648_v62 }
 0x53c   :  { %2210 = vmatmul.f32.gmra.mxu0 %v6796_v55  ;;  %2251 = vmatmul.f32.gmra.mxu1 %v6796_v55 }
 0x53d   :  { %2292 = vmatmul.f32.gmra.mxu2 %v6796_v55  ;;  %2333 = vmatmul.f32.gmra.mxu3 %v6796_v55  ;;  %v5592_v55 = vld [vmem:[#allocation10 + $0xd0] sm:$0xff] }
 0x53e   :  { %6810 = vst [vmem:[#allocation17_spill] sm:$0xff] %v5592_v55  ;;  %2498 = vmatpush.msra.mxu2 %v5592_v55 }
 0x544   :  { %2213 = vmatmul.f32.gmra.mxu0 %v6797_v14  ;;  %2254 = vmatmul.f32.gmra.mxu1 %v6797_v14 }
 0x545   :  { %2295 = vmatmul.f32.gmra.mxu2 %v6797_v14  ;;  %2336 = vmatmul.f32.gmra.mxu3 %v6797_v14 }
 0x54c   :  { %2216 = vmatmul.f32.gmra.mxu0 %v5392_v27  ;;  %2257 = vmatmul.f32.gmra.mxu1 %v5392_v27 }
 0x54d   :  { %2298 = vmatmul.f32.gmra.mxu2 %v5392_v27  ;;  %2339 = vmatmul.f32.gmra.mxu3 %v5392_v27  ;;  %v5495_v27 = vld [vmem:[#allocation10 + $0x160] sm:$0xff] }
 0x54e   :  { %2453 = vmatpush.msra.mxu0 %v5495_v27 }
 0x550   :  { %2454 = vmatpush.msra.mxu0 %v5520_v32 }
 0x552   :  { %2455 = vmatpush.msra.mxu0 %v5530_v34 }
 0x554   :  { %2219 = vmatmul.f32.gmra.mxu0 %v1885_v23  ;;  %2260 = vmatmul.f32.gmra.mxu1 %v1885_v23 }
 0x555   :  { %2301 = vmatmul.f32.gmra.mxu2 %v1885_v23  ;;  %2342 = vmatmul.f32.gmra.mxu3 %v1885_v23  ;;  %v5584_v23 = vld [vmem:[#allocation10 + $0x80] sm:$0xff] }
 0x556   :  { %2456 = vmatpush.msra.mxu0 %v5542_v12  ;;  %6807 = vst [vmem:[#allocation16_spill] sm:$0xff] %v5584_v23 }
 0x558   :  { %2457 = vmatpush.msra.mxu0 %v5550_v11 }
 0x55a   :  { %2458 = vmatpush.msra.mxu0 %v5557_v2 }
 0x55c   :  { %2459 = vmatpush.msra.mxu0 %v5570_v15 }
 0x55e   :  { %2460 = vmatpush.msra.mxu0 %v5584_v23 }
 0x560   :  { %2461 = vmatpush.msra.mxu0 %v5596_v52 }
 0x599   :  { %v1972_v1 = vpop.f32.mrf.mxu0  ;;  %v1992_v26 = vpop.f32.mrf.mxu1 }
 0x59a   :  { %v2035_v24 = vadd.f32 %v1972_v1, %v218_v54  ;;  %v2036_v42 = vadd.f32 %v1992_v26, %v259_v10  ;;  %v5598_v54 = vld [vmem:[#allocation10 + $0x68] sm:$0xff]  ;;  %v5604_v1 = vld [vmem:[#allocation10 + $0xb0] sm:$0xff]  ;;  %v5606_v26 = vld [vmem:[#allocation10 + $0x78] sm:$0xff] }
 0x59b   :  { %6812 = vst [vmem:[#allocation20_spill] sm:$0xff] %v5598_v54  ;;  %2481 = vmatpush.msra.mxu1 %v5598_v54  ;;  %2499 = vmatpush.msra.mxu2 %v5604_v1  ;;  %v6824_v54 = vld [vmem:[#allocation37_spill] sm:$0xff] }
 0x59c   :  { %v3723_v47 = vmul.f32 -1.442695, %v2035_v24  ;;  %v3724_v7 = vmul.f32 -1.442695, %v2036_v42  ;;  %6813 = vst [vmem:[#allocation21_spill] sm:$0xff] %v5604_v1  ;;  %v5612_v42 = vld [vmem:[#allocation10 + $0x40] sm:$0xff]  ;;  %2521 = vmatpush.msra.mxu3 %v5606_v26  ;;  %v300_v52 = vadd.f32 %v6824_v54, %v6754_v50 }
 0x59d   :  { %6814 = vst [vmem:[#allocation24_spill] sm:$0xff] %v5606_v26  ;;  %2462 = vmatpush.msra.mxu0 %v5612_v42  ;;  %v5656_v50 = vld [vmem:[#allocation10 + $0x30] sm:$0xff] }
 0x59e   :  { %3870 = vpow2.f32 %v3723_v47  ;;  %6815 = vst [vmem:[#allocation22_spill] sm:$0xff] %v5612_v42  ;;  %v5614_v47 = vld [vmem:[#allocation10 + $0x48] sm:$0xff]  ;;  %v5646_v42 = vld [vmem:[#allocation10 + $0x38] sm:$0xff] }
 0x59f   :  { %3872 = vpow2.f32 %v3724_v7  ;;  %6816 = vst [vmem:[#allocation23_spill] sm:$0xff] %v5614_v47  ;;  %v5619_v7 = vld [vmem:[#allocation10 + $0x90] sm:$0xff]  ;;  %2482 = vmatpush.msra.mxu1 %v5614_v47  ;;  %2463 = vmatpush.msra.mxu0 %v5624_v53 }
 0x5a0   :  { %v2032_v30 = vpop.f32.mrf.mxu3  ;;  %6817 = vst [vmem:[#allocation25_spill] sm:$0xff] %v5619_v7  ;;  %2500 = vmatpush.msra.mxu2 %v5619_v7  ;;  %v5644_v47 = vld [vmem:[#allocation10 + $0x50] sm:$0xff] }
 0x5a1   :  { %v2038_v56 = vadd.f32 %v2032_v30, %v341_v57  ;;  %v5626_v57 = vld [vmem:[#allocation10 + $0x28] sm:$0xff]  ;;  %v5628_v30 = vld [vmem:[#allocation10 + $0x58] sm:$0xff]  ;;  %6825 = vst [vmem:[#allocation41_spill] sm:$0xff] %v5644_v47 }
 0x5a2   :  { %6819 = vst [vmem:[#allocation56_spill] sm:$0xff] %v5626_v57  ;;  %2522 = vmatpush.msra.mxu3 %v5628_v30  ;;  %2483 = vmatpush.msra.mxu1 %v5626_v57 }
 0x5a3   :  { %v3725_v17 = vmul.f32 -1.442695, %v2038_v56  ;;  %6820 = vst [vmem:[#allocation57_spill] sm:$0xff] %v5628_v30  ;;  %v5632_v56 = vld [vmem:[#allocation10 + $0x70] sm:$0xff] }
 0x5a4   :  { %v3871_v14 = vpop.eup %3870  ;;  %6821 = vst [vmem:[#allocation58_spill] sm:$0xff] %v5632_v56  ;;  %2501 = vmatpush.msra.mxu2 %v5632_v56  ;;  %2523 = vmatpush.msra.mxu3 %v5646_v42 }
 0x5a5   :  { %v3873_v9 = vpop.eup %3872  ;;  %v5600_v10 = vadd.f32 1.0, %v3871_v14  ;;  %3874 = vpow2.f32 %v3725_v17  ;;  %v2012_v17 = vpop.f32.mrf.mxu2  ;;  %v5636_v14 = vld [vmem:[#allocation10] sm:$0xff]  ;;  %6826 = vst [vmem:[#allocation42_spill] sm:$0xff] %v5646_v42  ;;  %v5663_v42 = vld [vmem:[#allocation10 + $0x10] sm:$0xff] }
 0x5a6   :  { %v5608_v24 = vadd.f32 1.0, %v3873_v9  ;;  %6822 = vst [vmem:[#allocation59_spill] sm:$0xff] %v5636_v14  ;;  %v5638_v9 = vld [vmem:[#allocation10 + $0x8] sm:$0xff]  ;;  %v2037_v16 = vadd.f32 %v2012_v17, %v300_v52  ;;  %2464 = vmatpush.msra.mxu0 %v5636_v14  ;;  %2502 = vmatpush.msra.mxu2 %v5644_v47 }
 0x5a7   :  { %3876 = vrcp.f32 %v5600_v10  ;;  %6823 = vst [vmem:[#allocation60_spill] sm:$0xff] %v5638_v9  ;;  %2484 = vmatpush.msra.mxu1 %v5638_v9  ;;  %2524 = vmatpush.msra.mxu3 %v5648_v62  ;;  %v2054_v9 = vand.u32 2147483648, %v5600_v10  ;;  %vm2048_vm6 = vweird.f32 %v5600_v10 }
 0x5a8   :  { %3878 = vrcp.f32 %v5608_v24  ;;  %6828 = vst [vmem:[#allocation32_spill] sm:$0xff] %v5656_v50  ;;  %2600 = vmatpush.msrb.mxu0 %v5444_v6  ;;  %2503 = vmatpush.msra.mxu2 %v5656_v50  ;;  %v2073_v62 = vand.u32 2147483648, %v5608_v24  ;;  %v2052_v6 = vand.u32 2147483647, %v5600_v10  ;;  %vm2067_vm7 = vweird.f32 %v5608_v24 }
 0x5a9   :  { %6829 = vst [vmem:[#allocation26_spill] sm:$0xff] %v5663_v42  ;;  %2620 = vmatpush.msrb.mxu1 %v5446_v59  ;;  %2660 = vmatpush.msrb.mxu3 %v5454_v8 }
 0x5aa   :  { %2601 = vmatpush.msrb.mxu0 %v5448_v39  ;;  %2504 = vmatpush.msra.mxu2 %v5663_v42  ;;  %vm2053_vm10 = vcmp.eq.f32.partialorder %v2052_v6, 8.507059e+37 }
 0x5ab   :  { %v3875_v26 = vpop.eup %3874  ;;  %2621 = vmatpush.msrb.mxu1 %v5452_v20  ;;  %2661 = vmatpush.msrb.mxu3 %v5461_v49 }
 0x5ac   :  { %v5650_v7 = vadd.f32 1.0, %v3875_v26  ;;  %2640 = vmatpush.msrb.mxu2 %v5480_v51  ;;  %2602 = vmatpush.msrb.mxu0 %v5457_v28 }
 0x5ad   :  { %v3877_v30 = vpop.eup %3876  ;;  %2622 = vmatpush.msrb.mxu1 %v5459_v38  ;;  %2662 = vmatpush.msrb.mxu3 %v5486_v35 }
 0x5ae   :  { %v3879_v54 = vpop.eup %3878  ;;  %v2044_v57 = vmul.f32 %v3877_v30, %v5600_v10  ;;  %3880 = vrcp.f32 %v5650_v7  ;;  %vm2049_vm4 = vweird.f32 %v3877_v30  ;;  %2641 = vmatpush.msrb.mxu2 %v5483_v5  ;;  %2603 = vmatpush.msrb.mxu0 %v5490_v19  ;;  %v2074_v10 = vor.u32 1.1754944e-38, %v2073_v62 }
 0x5af   :  { %v2063_v26 = vmul.f32 %v3879_v54, %v5608_v24  ;;  %3882 = vtanh.f32 %v2037_v16  ;;  %vm2068_vm5 = vweird.f32 %v3879_v54  ;;  %vm2050_vm8 = vmor %vm2048_vm6, %vm2049_vm4  ;;  %2623 = vmatpush.msrb.mxu1 %v5492_v37  ;;  %2663 = vmatpush.msrb.mxu3 %v5502_v4  ;;  %vm2087_vm13 = vweird.f32 %v5650_v7 }
 0x5b0   :  { %v2045_v52 = vsub.f32 1.0, %v2044_v57  ;;  %vm2069_vm9 = vmor %vm2067_vm7, %vm2068_vm5  ;;  %2642 = vmatpush.msrb.mxu2 %v5488_v31  ;;  %2604 = vmatpush.msrb.mxu0 %v5495_v27 }
 0x5b1   :  { %v2064_v17 = vsub.f32 1.0, %v2063_v26  ;;  %v2071_v26 = vand.u32 2147483647, %v5608_v24  ;;  %2624 = vmatpush.msrb.mxu1 %v5500_v41  ;;  %2664 = vmatpush.msrb.mxu3 %v5510_v44 }
 0x5b2   :  { %v2046_v14 = vmul.f32 %v3877_v30, %v2045_v52  ;;  %v2055_v52 = vor.u32 1.1754944e-38, %v2054_v9  ;;  %2643 = vmatpush.msrb.mxu2 %v5504_v43  ;;  %2605 = vmatpush.msrb.mxu0 %v5520_v32 }
 0x5b3   :  { %v2065_v57 = vmul.f32 %v3879_v54, %v2064_v17  ;;  %vm2072_vm11 = vcmp.eq.f32.partialorder %v2071_v26, 8.507059e+37  ;;  %2625 = vmatpush.msrb.mxu1 %v5522_v33  ;;  %2665 = vmatpush.msrb.mxu3 %v5524_v36  ;;  %v6830_v26 = vld [vmem:[#allocation18_spill] sm:$0xff] }
 0x5b4   :  { %v5679_v16 = vpop.eup %3880  ;;  %v2047_v20 = vadd.f32 %v3877_v30, %v2046_v14  ;;  %2644 = vmatpush.msrb.mxu2 %v5512_v48  ;;  %2606 = vmatpush.msrb.mxu0 %v5530_v34 }
 0x5b5   :  { %v2066_v17 = vadd.f32 %v3879_v54, %v2065_v57  ;;  %v2083_v49 = vmul.f32 %v5679_v16, %v5650_v7  ;;  %v3883_v24 = vpop.eup %3882  ;;  %vm2088_vm12 = vweird.f32 %v5679_v16  ;;  %2626 = vmatpush.msrb.mxu1 %v5532_v40  ;;  %2666 = vmatpush.msrb.mxu3 %v5535_v3 }
 0x5b6   :  { %v2051_v14 = vsel %vm2050_vm8, %v3877_v30, %v2047_v20  ;;  %2645 = vmatpush.msrb.mxu2 %v5528_v13  ;;  %2607 = vmatpush.msrb.mxu0 %v5542_v12  ;;  %vm2089_vm14 = vmor %vm2087_vm13, %vm2088_vm12 }
 0x5b7   :  { %v2056_v35 = vsel %vm2053_vm10, %v2055_v52, %v2051_v14  ;;  %v2070_v9 = vsel %vm2069_vm9, %v3879_v54, %v2066_v17  ;;  %v2084_v57 = vsub.f32 1.0, %v2083_v49  ;;  %2627 = vmatpush.msrb.mxu1 %v5544_v61  ;;  %2667 = vmatpush.msrb.mxu3 %v5554_v60  ;;  %v6832_v52 = vld [vmem:[#allocation25_spill] sm:$0xff]  ;;  %v6833_v17 = vld [vmem:[#allocation19_spill] sm:$0xff]  ;;  %v6835_v14 = vld [vmem:[#allocation24_spill] sm:$0xff] }
 0x5b8   :  { %v2075_v38 = vsel %vm2072_vm11, %v2074_v10, %v2070_v9  ;;  %v2098_v19 = vmul.f32 %v3883_v24, %v2056_v35  ;;  %2646 = vmatpush.msrb.mxu2 %v5540_v46  ;;  %2608 = vmatpush.msrb.mxu0 %v5550_v11  ;;  %v6834_v10 = vld [vmem:[#allocation20_spill] sm:$0xff]  ;;  %v6836_v24 = vld [vmem:[#allocation22_spill] sm:$0xff]  ;;  %v6837_v9 = vld [vmem:[#allocation23_spill] sm:$0xff] }
 0x5b9   :  { %v2097_v6 = vmul.f32 %v2075_v38, %v5429_v29  ;;  %v2085_v20 = vmul.f32 %v5679_v16, %v2084_v57  ;;  %v2093_v29 = vand.u32 2147483648, %v5650_v7  ;;  %v2091_v38 = vand.u32 2147483647, %v5650_v7  ;;  %2628 = vmatpush.msrb.mxu1 %v5552_v58  ;;  %2668 = vmatpush.msrb.mxu3 %v5561_v0  ;;  %v6838_v57 = vld [vmem:[#allocation57_spill] sm:$0xff] }
 0x5ba   :  { %2647 = vmatpush.msrb.mxu2 %v5574_v45  ;;  %2609 = vmatpush.msrb.mxu0 %v5557_v2 }
 0x5bb   :  { %v2099_v49 = vadd.f32 %v2098_v19, %v2097_v6  ;;  %v2086_v35 = vadd.f32 %v5679_v16, %v2085_v20  ;;  %v2094_v62 = vor.u32 1.1754944e-38, %v2093_v29  ;;  %vm2092_vm15 = vcmp.eq.f32.partialorder %v2091_v38, 8.507059e+37  ;;  %2629 = vmatpush.msrb.mxu1 %v5559_v63  ;;  %2669 = vmatpush.msrb.mxu3 %v5567_v25  ;;  %v6840_v20 = vld [vmem:[#allocation56_spill] sm:$0xff]  ;;  %v6844_v38 = vld [vmem:[#allocation43_spill] sm:$0xff] }
 0x5bc   :  { %2648 = vmatpush.msrb.mxu2 %v5580_v22  ;;  %2610 = vmatpush.msrb.mxu0 %v5570_v15  ;;  %v6839_v6 = vmov 0.0   ;;  %v6843_v29 = vld [vmem:[#allocation60_spill] sm:$0xff] }
 0x5bd   :  { %3884 = vtanh.f32 %v2099_v49  ;;  %v2090_v19 = vsel %vm2089_vm14, %v5679_v16, %v2086_v35  ;;  %2630 = vmatpush.msrb.mxu1 %v5572_v18  ;;  %2670 = vmatpush.msrb.mxu3 %v5578_v21  ;;  %v6831_v16 = vld [vmem:[#allocation38_spill] sm:$0xff]  ;;  %v6842_v35 = vld [vmem:[#allocation59_spill] sm:$0xff] }
 0x5be   :  { %v2095_v30 = vsel %vm2092_vm15, %v2094_v62, %v2090_v19  ;;  %2649 = vmatpush.msrb.mxu2 %v5592_v55  ;;  %2611 = vmatpush.msrb.mxu0 %v5584_v23  ;;  %v6841_v49 = vld [vmem:[#allocation42_spill] sm:$0xff]  ;;  %v6845_v19 = vld [vmem:[#allocation44_spill] sm:$0xff]  ;;  %v6846_v62 = vld [vmem:[#allocation45_spill] sm:$0xff] }
 0x5bf   :  { %2631 = vmatpush.msrb.mxu1 %v6830_v26  ;;  %2671 = vmatpush.msrb.mxu3 %v6831_v16 }
 0x5c0   :  { %2650 = vmatpush.msrb.mxu2 %v5604_v1  ;;  %2612 = vmatpush.msrb.mxu0 %v6833_v17 }
 0x5c1   :  { %2632 = vmatpush.msrb.mxu1 %v6834_v10  ;;  %2672 = vmatpush.msrb.mxu3 %v6835_v14 }
 0x5c2   :  { %2651 = vmatpush.msrb.mxu2 %v6832_v52  ;;  %2613 = vmatpush.msrb.mxu0 %v6836_v24 }
 0x5c3   :  { %v3885_v7 = vpop.eup %3884  ;;  %2633 = vmatpush.msrb.mxu1 %v6837_v9  ;;  %2673 = vmatpush.msrb.mxu3 %v6838_v57 }
 0x5c4   :  { %v2101_v54 = vmul.f32 %v3885_v7, %v2095_v30  ;;  %2652 = vmatpush.msrb.mxu2 %v5632_v56  ;;  %2614 = vmatpush.msrb.mxu0 %v5624_v53  ;;  %v6847_v7 = vld [vmem:[#allocation47_spill] sm:$0xff]  ;;  %v6848_v30 = vld [vmem:[#allocation46_spill] sm:$0xff] }
 0x5c5   :  { %2634 = vmatpush.msrb.mxu1 %v6840_v20  ;;  %2674 = vmatpush.msrb.mxu3 %v6841_v49 }
 0x5c6   :  { %2222 = vmatmul.f32.gmra.mxu0 %v2101_v54  ;;  %2263 = vmatmul.f32.gmra.mxu1 %v2101_v54 }
 0x5c7   :  { %2304 = vmatmul.f32.gmra.mxu2 %v2101_v54  ;;  %2345 = vmatmul.f32.gmra.mxu3 %v2101_v54  ;;  %v6849_v54 = vld [vmem:[#allocation48_spill] sm:$0xff] }
 0x5c8   :  { %2653 = vmatpush.msrb.mxu2 %v5644_v47  ;;  %2615 = vmatpush.msrb.mxu0 %v6842_v35 }
 0x5c9   :  { %2635 = vmatpush.msrb.mxu1 %v6843_v29  ;;  %2675 = vmatpush.msrb.mxu3 %v6844_v38 }
 0x5ca   :  { %2654 = vmatpush.msrb.mxu2 %v5656_v50 }
 0x5cc   :  { %2655 = vmatpush.msrb.mxu2 %v5663_v42 }
 0x5ce   :  { %2465 = vmatmul.f32.vlgmr.msra.gmra.mxu0 %v6839_v6  ;;  %2485 = vmatmul.f32.vlgmr.msra.gmra.mxu1 %v6839_v6 }
 0x5cf   :  { %2505 = vmatmul.f32.vlgmr.msra.gmra.mxu2 %v6839_v6  ;;  %2525 = vmatmul.f32.vlgmr.msra.gmra.mxu3 %v6839_v6  ;;  %v6850_v6 = vld [vmem:[#allocation49_spill] sm:$0xff] }
 0x5d0   :  { %2751 = vmatpush.msra.mxu0 %v6845_v19  ;;  %2771 = vmatpush.msra.mxu1 %v5446_v59 }
 0x5d1   :  { %2791 = vmatpush.msra.mxu2 %v5480_v51  ;;  %2811 = vmatpush.msra.mxu3 %v5454_v8 }
 0x5d2   :  { %2752 = vmatpush.msra.mxu0 %v5448_v39  ;;  %2772 = vmatpush.msra.mxu1 %v6846_v62 }
 0x5d3   :  { %2792 = vmatpush.msra.mxu2 %v5483_v5  ;;  %2812 = vmatpush.msra.mxu3 %v6847_v7 }
 0x5d4   :  { %2753 = vmatpush.msra.mxu0 %v5457_v28  ;;  %2773 = vmatpush.msra.mxu1 %v6848_v30 }
 0x5d5   :  { %2793 = vmatpush.msra.mxu2 %v5488_v31  ;;  %2813 = vmatpush.msra.mxu3 %v6849_v54 }
 0x5d6   :  { %2754 = vmatpush.msra.mxu0 %v6850_v6  ;;  %2774 = vmatpush.msra.mxu1 %v5492_v37 }
 0x5d7   :  { %2794 = vmatpush.msra.mxu2 %v5504_v43  ;;  %2814 = vmatpush.msra.mxu3 %v5502_v4 }
 0x5d8   :  { %2755 = vmatpush.msra.mxu0 %v5495_v27  ;;  %2775 = vmatpush.msra.mxu1 %v5500_v41 }
 0x5d9   :  { %2795 = vmatpush.msra.mxu2 %v5512_v48  ;;  %2815 = vmatpush.msra.mxu3 %v5510_v44 }
 0x5da   :  { %2756 = vmatpush.msra.mxu0 %v5520_v32  ;;  %2776 = vmatpush.msra.mxu1 %v5522_v33 }
 0x5db   :  { %2796 = vmatpush.msra.mxu2 %v5528_v13  ;;  %2816 = vmatpush.msra.mxu3 %v5524_v36 }
 0x5dc   :  { %2757 = vmatpush.msra.mxu0 %v5530_v34  ;;  %2777 = vmatpush.msra.mxu1 %v5532_v40 }
 0x5dd   :  { %2797 = vmatpush.msra.mxu2 %v5540_v46  ;;  %2817 = vmatpush.msra.mxu3 %v5535_v3 }
 0x5de   :  { %2758 = vmatpush.msra.mxu0 %v5542_v12  ;;  %2778 = vmatpush.msra.mxu1 %v5544_v61 }
 0x5df   :  { %2798 = vmatpush.msra.mxu2 %v5574_v45  ;;  %2818 = vmatpush.msra.mxu3 %v5554_v60 }
 0x5e0   :  { %2759 = vmatpush.msra.mxu0 %v5550_v11  ;;  %2779 = vmatpush.msra.mxu1 %v5552_v58 }
 0x5e1   :  { %2799 = vmatpush.msra.mxu2 %v5580_v22  ;;  %2819 = vmatpush.msra.mxu3 %v5561_v0 }
 0x5e2   :  { %2760 = vmatpush.msra.mxu0 %v5557_v2  ;;  %2780 = vmatpush.msra.mxu1 %v5559_v63 }
 0x5e3   :  { %2800 = vmatpush.msra.mxu2 %v5592_v55  ;;  %2820 = vmatpush.msra.mxu3 %v5567_v25 }
 0x5e4   :  { %2761 = vmatpush.msra.mxu0 %v5570_v15  ;;  %2781 = vmatpush.msra.mxu1 %v5572_v18 }
 0x5e5   :  { %2801 = vmatpush.msra.mxu2 %v5604_v1  ;;  %2821 = vmatpush.msra.mxu3 %v5578_v21 }
 0x5e6   :  { %2762 = vmatpush.msra.mxu0 %v5584_v23  ;;  %2782 = vmatpush.msra.mxu1 %v6830_v26 }
 0x5e7   :  { %2802 = vmatpush.msra.mxu2 %v6832_v52  ;;  %2822 = vmatpush.msra.mxu3 %v6831_v16 }
 0x5e8   :  { %2763 = vmatpush.msra.mxu0 %v6833_v17  ;;  %2783 = vmatpush.msra.mxu1 %v6834_v10 }
 0x5e9   :  { %2803 = vmatpush.msra.mxu2 %v5632_v56  ;;  %2823 = vmatpush.msra.mxu3 %v6835_v14 }
 0x5ea   :  { %2764 = vmatpush.msra.mxu0 %v6836_v24  ;;  %2784 = vmatpush.msra.mxu1 %v6837_v9  ;;  %v2202_v9 = vpop.f32.mrf.mxu0  ;;  %v2325_v24 = vpop.f32.mrf.mxu3 }
 0x5eb   :  { %2804 = vmatpush.msra.mxu2 %v5644_v47  ;;  %2824 = vmatpush.msra.mxu3 %v6838_v57  ;;  %v2243_v47 = vpop.f32.mrf.mxu1 }
 0x5ec   :  { %2765 = vmatpush.msra.mxu0 %v5624_v53  ;;  %2785 = vmatpush.msra.mxu1 %v6840_v20  ;;  %v2284_v20 = vpop.f32.mrf.mxu2 }
 0x5ed   :  { %2805 = vmatpush.msra.mxu2 %v5656_v50  ;;  %2825 = vmatpush.msra.mxu3 %v6841_v49 }
 0x5ee   :  { %2766 = vmatpush.msra.mxu0 %v6842_v35  ;;  %2786 = vmatpush.msra.mxu1 %v6843_v29 }
 0x5ef   :  { %2806 = vmatpush.msra.mxu2 %v5663_v42  ;;  %2826 = vmatpush.msra.mxu3 %v6844_v38 }
 0x5f2   :  { %v5819_v57 = vpop.f32.mrf.mxu0  ;;  %v5823_v14 = vpop.f32.mrf.mxu3 }
 0x5f3   :  { %6851 = vst [vmem:[#allocation33_spill] sm:$0xff] %v5819_v57  ;;  %v5821_v53 = vpop.f32.mrf.mxu1 }
 0x5f4   :  { %6852 = vst [vmem:[#allocation27_spill] sm:$0xff] %v5821_v53  ;;  %v5829_v35 = vpop.f32.mrf.mxu2 }
 0x5f5   :  { %6853 = vst [vmem:[#allocation36_spill] sm:$0xff] %v5823_v14 }
 0x5f6   :  { %6856 = vst [vmem:[#allocation39_spill] sm:$0xff] %v5829_v35 }
 0x5fa   :  { %v5825_v50 = vpop.f32.mrf.mxu0  ;;  %v5831_v29 = vpop.f32.mrf.mxu3 }
 0x5fb   :  { %6854 = vst [vmem:[#allocation29_spill] sm:$0xff] %v5825_v50  ;;  %v5827_v49 = vpop.f32.mrf.mxu1 }
 0x5fc   :  { %6855 = vst [vmem:[#allocation34_spill] sm:$0xff] %v5827_v49  ;;  %v5837_v56 = vpop.f32.mrf.mxu2 }
 0x5fd   :  { %6857 = vst [vmem:[#allocation40_spill] sm:$0xff] %v5831_v29 }
 0x5fe   :  { %6860 = vst [vmem:[#allocation55_spill] sm:$0xff] %v5837_v56 }
 0x602   :  { %v5833_v42 = vpop.f32.mrf.mxu0  ;;  %v5839_v57 = vpop.f32.mrf.mxu3 }
 0x603   :  { %6858 = vst [vmem:[#allocation53_spill] sm:$0xff] %v5833_v42  ;;  %v5835_v38 = vpop.f32.mrf.mxu1 }
 0x604   :  { %6859 = vst [vmem:[#allocation54_spill] sm:$0xff] %v5835_v38  ;;  %v5845_v14 = vpop.f32.mrf.mxu2 }
 0x605   :  { %6861 = vst [vmem:[#allocation30_spill] sm:$0xff] %v5839_v57 }
 0x606   :  { %6864 = vst [vmem:[#allocation37_spill] sm:$0xff] %v5845_v14 }
 0x60a   :  { %v5841_v53 = vpop.f32.mrf.mxu0  ;;  %v5847_v50 = vpop.f32.mrf.mxu3 }
 0x60b   :  { %6862 = vst [vmem:[#allocation31_spill] sm:$0xff] %v5841_v53  ;;  %v5843_v10 = vpop.f32.mrf.mxu1 }
 0x60c   :  { %6863 = vst [vmem:[#allocation35_spill] sm:$0xff] %v5843_v10  ;;  %v5853_v29 = vpop.f32.mrf.mxu2 }
 0x60d   :  { %6865 = vst [vmem:[#allocation44_spill] sm:$0xff] %v5847_v50  ;;  %v2175_v50 = vld [vmem:[%s6479_s6] sm:$0xf] }
 0x60e   :  { %6868 = vst [vmem:[#allocation46_spill] sm:$0xff] %v5853_v29  ;;  %v5874_v29 = vperm.slane %v2175_v50, 1  ;;  %v5882_v52 = vperm.slane %v2175_v50, 3 }
 0x610   :  { %6877 = vst [vmem:[#allocation67_spill] sm:$0xff] %v5874_v29  ;;  %v2326_v26 = vadd.f32 %v2325_v24, %v5882_v52 }
 0x611   :  { %6880 = vst [vmem:[#allocation70_spill] sm:$0xff] %v5882_v52 }
 0x612   :  { %v5849_v49 = vpop.f32.mrf.mxu0  ;;  %v5855_v42 = vpop.f32.mrf.mxu3 }
 0x613   :  { %6866 = vst [vmem:[#allocation45_spill] sm:$0xff] %v5849_v49  ;;  %v5851_v35 = vpop.f32.mrf.mxu1 }
 0x614   :  { %6867 = vst [vmem:[#allocation47_spill] sm:$0xff] %v5851_v35  ;;  %v5861_v57 = vpop.f32.mrf.mxu2  ;;  %v5872_v35 = vperm.slane %v2175_v50, 0 }
 0x615   :  { %6869 = vst [vmem:[#allocation48_spill] sm:$0xff] %v5855_v42 }
 0x616   :  { %6872 = vst [vmem:[#allocation62_spill] sm:$0xff] %v5861_v57 }
 0x617   :  { %6876 = vst [vmem:[#allocation66_spill] sm:$0xff] %v5872_v35 }
 0x61a   :  { %v5857_v38 = vpop.f32.mrf.mxu0  ;;  %v5863_v53 = vpop.f32.mrf.mxu3 }
 0x61b   :  { %6870 = vst [vmem:[#allocation49_spill] sm:$0xff] %v5857_v38  ;;  %v5859_v56 = vpop.f32.mrf.mxu1  ;;  %v2203_v38 = vadd.f32 %v2202_v9, %v5872_v35 }
 0x61c   :  { %6871 = vst [vmem:[#allocation61_spill] sm:$0xff] %v5859_v56  ;;  %v2244_v56 = vadd.f32 %v2243_v47, %v5874_v29  ;;  %v5878_v42 = vpop.f32.mrf.mxu2 }
 0x61d   :  { %6873 = vst [vmem:[#allocation63_spill] sm:$0xff] %v5863_v53 }
 0x61e   :  { %6878 = vst [vmem:[#allocation68_spill] sm:$0xff] %v5878_v42 }
 0x643   :  { %v5868_v10 = vpop.f32.mrf.mxu0  ;;  %v5870_v49 = vpop.f32.mrf.mxu1 }
 0x644   :  { %6874 = vst [vmem:[#allocation64_spill] sm:$0xff] %v5868_v10 }
 0x645   :  { %6875 = vst [vmem:[#allocation65_spill] sm:$0xff] %v5870_v49 }
 0x64a   :  { %v5880_v57 = vpop.f32.mrf.mxu3  ;;  %v5885_v23 = vpop.f32.mrf.mxu2 }
 0x64b   :  { %6879 = vst [vmem:[#allocation69_spill] sm:$0xff] %v5880_v57  ;;  %v2466_v53 = vpop.f32.mrf.mxu0  ;;  %v2486_v14 = vpop.f32.mrf.mxu1 }
 0x64c   :  { %v2529_v17 = vadd.f32 %v2466_v53, %v2203_v38  ;;  %v2530_v16 = vadd.f32 %v2486_v14, %v2244_v56  ;;  %6881 = vst [vmem:[#allocation71_spill] sm:$0xff] %v5885_v23  ;;  %v5887_v53 = vperm.slane %v2175_v50, 2 }
 0x64e   :  { %v3726_v10 = vmul.f32 -1.442695, %v2529_v17  ;;  %v3727_v49 = vmul.f32 -1.442695, %v2530_v16  ;;  %6882 = vst [vmem:[#allocation72_spill] sm:$0xff] %v5887_v53  ;;  %v2285_v17 = vadd.f32 %v2284_v20, %v5887_v53 }
 0x650   :  { %3886 = vpow2.f32 %v3726_v10 }
 0x651   :  { %3888 = vpow2.f32 %v3727_v49 }
 0x652   :  { %v2526_v9 = vpop.f32.mrf.mxu3  ;;  %v2506_v56 = vpop.f32.mrf.mxu2 }
 0x653   :  { %v2532_v47 = vadd.f32 %v2526_v9, %v2326_v26  ;;  %v2531_v24 = vadd.f32 %v2506_v56, %v2285_v17 }
 0x655   :  { %v3728_v29 = vmul.f32 -1.442695, %v2532_v47 }
 0x656   :  { %v3887_v42 = vpop.eup %3886 }
 0x657   :  { %v3889_v35 = vpop.eup %3888  ;;  %v2536_v57 = vadd.f32 1.0, %v3887_v42  ;;  %3890 = vpow2.f32 %v3728_v29 }
 0x658   :  { %v2555_v21 = vadd.f32 1.0, %v3889_v35 }
 0x659   :  { %3892 = vrcp.f32 %v2536_v57  ;;  %v2548_v42 = vand.u32 2147483648, %v2536_v57  ;;  %v2546_v29 = vand.u32 2147483647, %v2536_v57  ;;  %vm2542_vm2 = vweird.f32 %v2536_v57 }
 0x65a   :  { %3894 = vrcp.f32 %v2555_v21  ;;  %v2567_v35 = vand.u32 2147483648, %v2555_v21  ;;  %v2565_v52 = vand.u32 2147483647, %v2555_v21  ;;  %vm2561_vm3 = vweird.f32 %v2555_v21 }
 0x65b   :  { %v2549_v56 = vor.u32 1.1754944e-38, %v2548_v42  ;;  %vm2547_vm5 = vcmp.eq.f32.partialorder %v2546_v29, 8.507059e+37 }
 0x65c   :  { %v2568_v53 = vor.u32 1.1754944e-38, %v2567_v35  ;;  %vm2566_vm7 = vcmp.eq.f32.partialorder %v2565_v52, 8.507059e+37 }
 0x65d   :  { %v3891_v16 = vpop.eup %3890 }
 0x65e   :  { %v2575_v10 = vadd.f32 1.0, %v3891_v16 }
 0x65f   :  { %v3893_v14 = vpop.eup %3892 }
 0x660   :  { %v3895_v49 = vpop.eup %3894  ;;  %v2538_v38 = vmul.f32 %v3893_v14, %v2536_v57  ;;  %3896 = vrcp.f32 %v2575_v10  ;;  %vm2543_vm0 = vweird.f32 %v3893_v14  ;;  %vm2581_vm9 = vweird.f32 %v2575_v10 }
 0x661   :  { %v2557_v26 = vmul.f32 %v3895_v49, %v2555_v21  ;;  %3898 = vtanh.f32 %v2531_v24  ;;  %vm2562_vm1 = vweird.f32 %v3895_v49  ;;  %vm2544_vm4 = vmor %vm2542_vm2, %vm2543_vm0  ;;  %v2585_v57 = vand.u32 2147483647, %v2575_v10 }
 0x662   :  { %v2539_v9 = vsub.f32 1.0, %v2538_v38  ;;  %vm2563_vm6 = vmor %vm2561_vm3, %vm2562_vm1 }
 0x663   :  { %v2558_v47 = vsub.f32 1.0, %v2557_v26  ;;  %vm2586_vm11 = vcmp.eq.f32.partialorder %v2585_v57, 8.507059e+37 }
 0x664   :  { %v2540_v50 = vmul.f32 %v3893_v14, %v2539_v9 }
 0x665   :  { %v2559_v23 = vmul.f32 %v3895_v49, %v2558_v47 }
 0x666   :  { %v3897_v1 = vpop.eup %3896  ;;  %v2541_v20 = vadd.f32 %v3893_v14, %v2540_v50 }
 0x667   :  { %v2560_v16 = vadd.f32 %v3895_v49, %v2559_v23  ;;  %v2577_v17 = vmul.f32 %v3897_v1, %v2575_v10  ;;  %v3899_v24 = vpop.eup %3898  ;;  %vm2582_vm8 = vweird.f32 %v3897_v1  ;;  %v2587_v23 = vand.u32 2147483648, %v2575_v10 }
 0x668   :  { %v2545_v38 = vsel %vm2544_vm4, %v3893_v14, %v2541_v20  ;;  %vm2583_vm10 = vmor %vm2581_vm9, %vm2582_vm8 }
 0x669   :  { %v2550_v26 = vsel %vm2547_vm5, %v2549_v56, %v2545_v38  ;;  %v2564_v9 = vsel %vm2563_vm6, %v3895_v49, %v2560_v16  ;;  %v2578_v18 = vsub.f32 1.0, %v2577_v17  ;;  %v2588_v42 = vor.u32 1.1754944e-38, %v2587_v23  ;;  %v6915_v38 = vld [vmem:[#allocation72_spill] sm:$0xff] }
 0x66a   :  { %v2569_v47 = vsel %vm2566_vm7, %v2568_v53, %v2564_v9  ;;  %v2592_v15 = vmul.f32 %v3899_v24, %v2550_v26  ;;  %v6916_v24 = vld [vmem:[#allocation39_spill] sm:$0xff] }
 0x66b   :  { %v2591_v25 = vmul.f32 0.0, %v2569_v47  ;;  %v2579_v55 = vmul.f32 %v3897_v1, %v2578_v18  ;;  %v2288_v26 = vadd.f32 %v6916_v24, %v6915_v38  ;;  %v6026_v24 = vld [vmem:[#allocation10 + $0x178] sm:$0xff] }
 0x66d   :  { %v5890_v50 = vadd.f32 %v2592_v15, %v2591_v25  ;;  %v2580_v21 = vadd.f32 %v3897_v1, %v2579_v55  ;;  %v6912_v25 = vld [vmem:[#allocation27_spill] sm:$0xff] }
 0x66f   :  { %3900 = vtanh.f32 %v5890_v50  ;;  %v2584_v14 = vsel %vm2583_vm10, %v3897_v1, %v2580_v21 }
 0x670   :  { %v2589_v52 = vsel %vm2586_vm11, %v2588_v42, %v2584_v14 }
 0x675   :  { %v3901_v49 = vpop.eup %3900 }
 0x676   :  { %v2595_v35 = vmul.f32 %v3901_v49, %v2589_v52 }
 0x678   :  { %2616 = vmatmul.f32.vlgmr.msrb.gmra.mxu0 %v2595_v35  ;;  %2636 = vmatmul.f32.vlgmr.msrb.gmra.mxu1 %v2595_v35 }
 0x679   :  { %2656 = vmatmul.f32.vlgmr.msrb.gmra.mxu2 %v2595_v35  ;;  %2676 = vmatmul.f32.vlgmr.msrb.gmra.mxu3 %v2595_v35 }
 0x67a   :  { %2902 = vmatpush.msrb.mxu0 %v6845_v19  ;;  %2922 = vmatpush.msrb.mxu1 %v5446_v59  ;;  %v6883_v59 = vld [vmem:[#allocation17_spill] sm:$0xff] }
 0x67b   :  { %2942 = vmatpush.msrb.mxu2 %v5480_v51  ;;  %2962 = vmatpush.msrb.mxu3 %v5454_v8  ;;  %v6885_v8 = vld [vmem:[#allocation51_spill] sm:$0xff]  ;;  %v6887_v51 = vld [vmem:[#allocation21_spill] sm:$0xff] }
 0x67c   :  { %2903 = vmatpush.msrb.mxu0 %v5448_v39  ;;  %2923 = vmatpush.msrb.mxu1 %v6846_v62  ;;  %v6884_v39 = vld [vmem:[#allocation50_spill] sm:$0xff] }
 0x67d   :  { %2943 = vmatpush.msrb.mxu2 %v5483_v5  ;;  %2963 = vmatpush.msrb.mxu3 %v6847_v7  ;;  %v6888_v5 = vld [vmem:[#allocation15_spill] sm:$0xff]  ;;  %v6913_v62 = vld [vmem:[#allocation70_spill] sm:$0xff]  ;;  %v6914_v7 = vld [vmem:[#allocation36_spill] sm:$0xff] }
 0x67e   :  { %2904 = vmatpush.msrb.mxu0 %v5457_v28  ;;  %2924 = vmatpush.msrb.mxu1 %v6848_v30  ;;  %v6886_v28 = vld [vmem:[#allocation52_spill] sm:$0xff]  ;;  %v2329_v30 = vadd.f32 %v6914_v7, %v6913_v62  ;;  %v5993_v7 = vld [vmem:[#allocation10 + $0x1a0] sm:$0xff] }
 0x67f   :  { %2944 = vmatpush.msrb.mxu2 %v5488_v31  ;;  %2964 = vmatpush.msrb.mxu3 %v6849_v54  ;;  %v6889_v31 = vld [vmem:[#allocation16_spill] sm:$0xff] }
 0x680   :  { %2905 = vmatpush.msrb.mxu0 %v6850_v6  ;;  %2925 = vmatpush.msrb.mxu1 %v5492_v37  ;;  %v6890_v37 = vld [vmem:[#allocation18_spill] sm:$0xff] }
 0x681   :  { %2945 = vmatpush.msrb.mxu2 %v5504_v43  ;;  %2965 = vmatpush.msrb.mxu3 %v5502_v4  ;;  %v6893_v4 = vld [vmem:[#allocation19_spill] sm:$0xff]  ;;  %v6894_v43 = vld [vmem:[#allocation20_spill] sm:$0xff] }
 0x682   :  { %2906 = vmatpush.msrb.mxu0 %v5495_v27  ;;  %2926 = vmatpush.msrb.mxu1 %v5500_v41  ;;  %v6891_v27 = vld [vmem:[#allocation25_spill] sm:$0xff]  ;;  %v6892_v41 = vld [vmem:[#allocation38_spill] sm:$0xff] }
 0x683   :  { %2946 = vmatpush.msrb.mxu2 %v5512_v48  ;;  %2966 = vmatpush.msrb.mxu3 %v5510_v44  ;;  %v6895_v44 = vld [vmem:[#allocation58_spill] sm:$0xff]  ;;  %v6896_v48 = vld [vmem:[#allocation24_spill] sm:$0xff] }
 0x684   :  { %2907 = vmatpush.msrb.mxu0 %v5520_v32  ;;  %2927 = vmatpush.msrb.mxu1 %v5522_v33  ;;  %v6897_v32 = vld [vmem:[#allocation22_spill] sm:$0xff]  ;;  %v6898_v33 = vld [vmem:[#allocation23_spill] sm:$0xff] }
 0x685   :  { %2947 = vmatpush.msrb.mxu2 %v5528_v13  ;;  %2967 = vmatpush.msrb.mxu3 %v5524_v36  ;;  %v6899_v36 = vld [vmem:[#allocation41_spill] sm:$0xff] }
 0x686   :  { %2908 = vmatpush.msrb.mxu0 %v5530_v34  ;;  %2928 = vmatpush.msrb.mxu1 %v5532_v40  ;;  %v6900_v13 = vld [vmem:[#allocation57_spill] sm:$0xff]  ;;  %v6901_v34 = vld [vmem:[#allocation28_spill] sm:$0xff] }
 0x687   :  { %2948 = vmatpush.msrb.mxu2 %v5540_v46  ;;  %2968 = vmatpush.msrb.mxu3 %v5535_v3  ;;  %v6902_v40 = vld [vmem:[#allocation56_spill] sm:$0xff]  ;;  %v6904_v46 = vld [vmem:[#allocation42_spill] sm:$0xff] }
 0x688   :  { %2909 = vmatpush.msrb.mxu0 %v5542_v12  ;;  %2929 = vmatpush.msrb.mxu1 %v5544_v61  ;;  %v6903_v3 = vld [vmem:[#allocation32_spill] sm:$0xff]  ;;  %v6905_v12 = vld [vmem:[#allocation59_spill] sm:$0xff] }
 0x689   :  { %2949 = vmatpush.msrb.mxu2 %v5574_v45  ;;  %2969 = vmatpush.msrb.mxu3 %v5554_v60  ;;  %v6906_v61 = vld [vmem:[#allocation60_spill] sm:$0xff]  ;;  %v6909_v60 = vld [vmem:[#allocation66_spill] sm:$0xff] }
 0x68a   :  { %2910 = vmatpush.msrb.mxu0 %v5550_v11  ;;  %2930 = vmatpush.msrb.mxu1 %v5552_v58  ;;  %v6907_v11 = vld [vmem:[#allocation26_spill] sm:$0xff]  ;;  %v6908_v58 = vld [vmem:[#allocation43_spill] sm:$0xff] }
 0x68b   :  { %2950 = vmatpush.msrb.mxu2 %v5580_v22  ;;  %2970 = vmatpush.msrb.mxu3 %v5561_v0  ;;  %v6911_v0 = vld [vmem:[#allocation67_spill] sm:$0xff] }
 0x68c   :  { %2911 = vmatpush.msrb.mxu0 %v5557_v2  ;;  %2931 = vmatpush.msrb.mxu1 %v5559_v63  ;;  %v6910_v2 = vld [vmem:[#allocation33_spill] sm:$0xff]  ;;  %v2247_v15 = vadd.f32 %v6912_v25, %v6911_v0 }
 0x68d   :  { %2951 = vmatpush.msrb.mxu2 %v6883_v59  ;;  %2971 = vmatpush.msrb.mxu3 %v6884_v39  ;;  %v2206_v63 = vadd.f32 %v6910_v2, %v6909_v60 }
 0x68e   :  { %2912 = vmatpush.msrb.mxu0 %v6885_v8  ;;  %2932 = vmatpush.msrb.mxu1 %v6886_v28 }
 0x68f   :  { %2952 = vmatpush.msrb.mxu2 %v6887_v51  ;;  %2972 = vmatpush.msrb.mxu3 %v6888_v5 }
 0x690   :  { %2913 = vmatpush.msrb.mxu0 %v6889_v31  ;;  %2933 = vmatpush.msrb.mxu1 %v6890_v37 }
 0x691   :  { %2953 = vmatpush.msrb.mxu2 %v6891_v27  ;;  %2973 = vmatpush.msrb.mxu3 %v6892_v41 }
 0x692   :  { %2914 = vmatpush.msrb.mxu0 %v6893_v4  ;;  %2934 = vmatpush.msrb.mxu1 %v6894_v43 }
 0x693   :  { %2954 = vmatpush.msrb.mxu2 %v6895_v44  ;;  %2974 = vmatpush.msrb.mxu3 %v6896_v48 }
 0x694   :  { %2915 = vmatpush.msrb.mxu0 %v6897_v32  ;;  %2935 = vmatpush.msrb.mxu1 %v6898_v33 }
 0x695   :  { %2955 = vmatpush.msrb.mxu2 %v6899_v36  ;;  %2975 = vmatpush.msrb.mxu3 %v6900_v13 }
 0x696   :  { %2916 = vmatpush.msrb.mxu0 %v6901_v34  ;;  %2936 = vmatpush.msrb.mxu1 %v6902_v40 }
 0x697   :  { %2956 = vmatpush.msrb.mxu2 %v6903_v3  ;;  %2976 = vmatpush.msrb.mxu3 %v6904_v46 }
 0x698   :  { %2917 = vmatpush.msrb.mxu0 %v6905_v12  ;;  %2937 = vmatpush.msrb.mxu1 %v6906_v61 }
 0x699   :  { %2957 = vmatpush.msrb.mxu2 %v6907_v11  ;;  %2977 = vmatpush.msrb.mxu3 %v6908_v58 }
 0x6f5   :  { %v2617_v18 = vpop.f32.mrf.mxu0  ;;  %v2637_v45 = vpop.f32.mrf.mxu1 }
 0x6f6   :  { %v2680_v22 = vadd.f32 %v2617_v18, %v2206_v63  ;;  %v2681_v55 = vadd.f32 %v2637_v45, %v2247_v15  ;;  %v5972_v15 = vld [vmem:[#allocation10 + $0x1e8] sm:$0xff]  ;;  %v5975_v18 = vld [vmem:[#allocation10 + $0x1f0] sm:$0xff]  ;;  %v5978_v45 = vld [vmem:[#allocation10 + $0x1f8] sm:$0xff] }
 0x6f8   :  { %v3729_v1 = vmul.f32 -1.442695, %v2680_v22  ;;  %v3730_v19 = vmul.f32 -1.442695, %v2681_v55  ;;  %v5981_v22 = vld [vmem:[#allocation10 + $0x1c0] sm:$0xff]  ;;  %v5984_v55 = vld [vmem:[#allocation10 + $0x1c8] sm:$0xff] }
 0x6fa   :  { %3902 = vpow2.f32 %v3729_v1  ;;  %v5987_v1 = vld [vmem:[#allocation10 + $0x1d0] sm:$0xff] }
 0x6fb   :  { %3904 = vpow2.f32 %v3730_v19  ;;  %v5990_v19 = vld [vmem:[#allocation10 + $0x1d8] sm:$0xff] }
 0x6fc   :  { %v2677_v54 = vpop.f32.mrf.mxu3  ;;  %v2657_v16 = vpop.f32.mrf.mxu2 }
 0x6fd   :  { %v2683_v6 = vadd.f32 %v2677_v54, %v2329_v30  ;;  %v2682_v21 = vadd.f32 %v2657_v16, %v2288_v26  ;;  %v5996_v30 = vld [vmem:[#allocation10 + $0x1a8] sm:$0xff]  ;;  %v5999_v54 = vld [vmem:[#allocation10 + $0x1b0] sm:$0xff]  ;;  %v6029_v26 = vld [vmem:[#allocation10 + $0x140] sm:$0xff] }
 0x6fe   :  { %v6020_v16 = vld [vmem:[#allocation10 + $0x168] sm:$0xff] }
 0x6ff   :  { %v3731_v53 = vmul.f32 -1.442695, %v2683_v6  ;;  %v6002_v6 = vld [vmem:[#allocation10 + $0x1b8] sm:$0xff] }
 0x700   :  { %v3903_v10 = vpop.eup %3902 }
 0x701   :  { %v3905_v29 = vpop.eup %3904  ;;  %v2687_v20 = vadd.f32 1.0, %v3903_v10  ;;  %3906 = vpow2.f32 %v3731_v53  ;;  %v6005_v53 = vld [vmem:[#allocation10 + $0x180] sm:$0xff]  ;;  %v6008_v10 = vld [vmem:[#allocation10 + $0x188] sm:$0xff] }
 0x702   :  { %v2706_v56 = vadd.f32 1.0, %v3905_v29  ;;  %v6011_v29 = vld [vmem:[#allocation10 + $0x190] sm:$0xff] }
 0x703   :  { %3908 = vrcp.f32 %v2687_v20  ;;  %v2699_v52 = vand.u32 2147483648, %v2687_v20  ;;  %v2697_v39 = vand.u32 2147483647, %v2687_v20  ;;  %vm2693_vm14 = vweird.f32 %v2687_v20 }
 0x704   :  { %3910 = vrcp.f32 %v2706_v56  ;;  %v2718_v35 = vand.u32 2147483648, %v2706_v56  ;;  %v2716_v28 = vand.u32 2147483647, %v2706_v56  ;;  %vm2712_vm15 = vweird.f32 %v2706_v56 }
 0x705   :  { %v2700_v31 = vor.u32 1.1754944e-38, %v2699_v52  ;;  %vm2698_vm2 = vcmp.eq.f32.partialorder %v2697_v39, 8.507059e+37  ;;  %v6056_v52 = vld [vmem:[#allocation10 + $0x108] sm:$0xff]  ;;  %v6065_v39 = vld [vmem:[#allocation10 + $0xe0] sm:$0xff] }
 0x706   :  { %v2719_v41 = vor.u32 1.1754944e-38, %v2718_v35  ;;  %vm2717_vm3 = vcmp.eq.f32.partialorder %v2716_v28, 8.507059e+37  ;;  %v6059_v35 = vld [vmem:[#allocation10 + $0x110] sm:$0xff] }
 0x707   :  { %v3907_v17 = vpop.eup %3906  ;;  %v6071_v28 = vld [vmem:[#allocation10 + $0xf0] sm:$0xff] }
 0x708   :  { %v2726_v9 = vadd.f32 1.0, %v3907_v17  ;;  %v6023_v17 = vld [vmem:[#allocation10 + $0x170] sm:$0xff] }
 0x709   :  { %v3909_v47 = vpop.eup %3908 }
 0x70a   :  { %v3911_v23 = vpop.eup %3910  ;;  %v2689_v57 = vmul.f32 %v3909_v47, %v2687_v20  ;;  %3912 = vrcp.f32 %v2726_v9  ;;  %vm2694_vm12 = vweird.f32 %v3909_v47  ;;  %v2738_v46 = vand.u32 2147483648, %v2726_v9  ;;  %v6014_v20 = vld [vmem:[#allocation10 + $0x198] sm:$0xff] }
 0x70b   :  { %v2708_v14 = vmul.f32 %v3911_v23, %v2706_v56  ;;  %3914 = vtanh.f32 %v2682_v21  ;;  %vm2713_vm13 = vweird.f32 %v3911_v23  ;;  %vm2695_vm0 = vmor %vm2693_vm14, %vm2694_vm12  ;;  %vm2732_vm5 = vweird.f32 %v2726_v9  ;;  %v6017_v56 = vld [vmem:[#allocation10 + $0x160] sm:$0xff]  ;;  %v6038_v21 = vld [vmem:[#allocation10 + $0x158] sm:$0xff] }
 0x70c   :  { %v2690_v42 = vsub.f32 1.0, %v2689_v57  ;;  %vm2714_vm1 = vmor %vm2712_vm15, %vm2713_vm13  ;;  %v2736_v12 = vand.u32 2147483647, %v2726_v9  ;;  %v2739_v58 = vor.u32 1.1754944e-38, %v2738_v46  ;;  %v6044_v57 = vld [vmem:[#allocation10 + $0x128] sm:$0xff]  ;;  %v6122_v46 = vld [vmem:[#allocation10 + $0x78] sm:$0xff] }
 0x70d   :  { %v2709_v49 = vsub.f32 1.0, %v2708_v14  ;;  %v6047_v14 = vld [vmem:[#allocation10 + $0x130] sm:$0xff]  ;;  %6930 = vst [vmem:[#allocation24_spill] sm:$0xff] %v6122_v46 }
 0x70e   :  { %v2691_v59 = vmul.f32 %v3909_v47, %v2690_v42  ;;  %vm2737_vm7 = vcmp.eq.f32.partialorder %v2736_v12, 8.507059e+37  ;;  %v6050_v42 = vld [vmem:[#allocation10 + $0x138] sm:$0xff]  ;;  %v6125_v12 = vld [vmem:[#allocation10 + $0x40] sm:$0xff] }
 0x70f   :  { %v2710_v8 = vmul.f32 %v3911_v23, %v2709_v49  ;;  %v6053_v49 = vld [vmem:[#allocation10 + $0x100] sm:$0xff]  ;;  %6931 = vst [vmem:[#allocation22_spill] sm:$0xff] %v6125_v12 }
 0x710   :  { %v3913_v51 = vpop.eup %3912  ;;  %v2692_v5 = vadd.f32 %v3909_v47, %v2691_v59  ;;  %v6062_v59 = vld [vmem:[#allocation10 + $0x118] sm:$0xff] }
 0x711   :  { %v2711_v37 = vadd.f32 %v3911_v23, %v2710_v8  ;;  %v2728_v27 = vmul.f32 %v3913_v51, %v2726_v9  ;;  %v3915_v43 = vpop.eup %3914  ;;  %vm2733_vm4 = vweird.f32 %v3913_v51  ;;  %v6032_v9 = vld [vmem:[#allocation10 + $0x148] sm:$0xff] }
 0x712   :  { %v2696_v4 = vsel %vm2695_vm0, %v3909_v47, %v2692_v5  ;;  %vm2734_vm6 = vmor %vm2732_vm5, %vm2733_vm4  ;;  %v6035_v47 = vld [vmem:[#allocation10 + $0x150] sm:$0xff]  ;;  %v6068_v8 = vld [vmem:[#allocation10 + $0xe8] sm:$0xff] }
 0x713   :  { %v2701_v44 = vsel %vm2698_vm2, %v2700_v31, %v2696_v4  ;;  %v2715_v48 = vsel %vm2714_vm1, %v3911_v23, %v2711_v37  ;;  %v2729_v32 = vsub.f32 1.0, %v2728_v27  ;;  %v6041_v23 = vld [vmem:[#allocation10 + $0x120] sm:$0xff]  ;;  %v6080_v31 = vld [vmem:[#allocation10 + $0xc8] sm:$0xff]  ;;  %v6083_v37 = vld [vmem:[#allocation10 + $0xd0] sm:$0xff] }
 0x714   :  { %v2720_v33 = vsel %vm2717_vm3, %v2719_v41, %v2715_v48  ;;  %v2743_v36 = vmul.f32 %v3915_v43, %v2701_v44  ;;  %v6077_v5 = vld [vmem:[#allocation10 + $0xc0] sm:$0xff]  ;;  %6917 = vst [vmem:[#allocation17_spill] sm:$0xff] %v6083_v37  ;;  %v6086_v27 = vld [vmem:[#allocation10 + $0xd8] sm:$0xff]  ;;  %v6092_v4 = vld [vmem:[#allocation10 + $0xa8] sm:$0xff] }
 0x715   :  { %v2742_v13 = vmul.f32 %v2720_v33, %v5890_v50  ;;  %v2730_v34 = vmul.f32 %v3913_v51, %v2729_v32  ;;  %v5969_v50 = vld [vmem:[#allocation10 + $0x1e0] sm:$0xff]  ;;  %6918 = vst [vmem:[#allocation50_spill] sm:$0xff] %v6086_v27  ;;  %v6095_v43 = vld [vmem:[#allocation10 + $0xb0] sm:$0xff]  ;;  %v6098_v44 = vld [vmem:[#allocation10 + $0xb8] sm:$0xff] }
 0x716   :  { %v6089_v41 = vld [vmem:[#allocation10 + $0xa0] sm:$0xff]  ;;  %6920 = vst [vmem:[#allocation52_spill] sm:$0xff] %v6092_v4  ;;  %v6104_v32 = vld [vmem:[#allocation10 + $0x88] sm:$0xff]  ;;  %v6107_v33 = vld [vmem:[#allocation10 + $0x90] sm:$0xff] }
 0x717   :  { %v5966_v40 = vadd.f32 %v2743_v36, %v2742_v13  ;;  %v2731_v3 = vadd.f32 %v3913_v51, %v2730_v34  ;;  %6919 = vst [vmem:[#allocation51_spill] sm:$0xff] %v6089_v41  ;;  %v6101_v48 = vld [vmem:[#allocation10 + $0x80] sm:$0xff]  ;;  %v6110_v36 = vld [vmem:[#allocation10 + $0x98] sm:$0xff]  ;;  %v6116_v34 = vld [vmem:[#allocation10 + $0x68] sm:$0xff] }
 0x718   :  { %6921 = vst [vmem:[#allocation21_spill] sm:$0xff] %v6095_v43  ;;  %v6113_v13 = vld [vmem:[#allocation10 + $0x60] sm:$0xff] }
 0x719   :  { %3916 = vtanh.f32 %v5966_v40  ;;  %v2735_v61 = vsel %vm2734_vm6, %v3913_v51, %v2731_v3  ;;  %v6074_v51 = vld [vmem:[#allocation10 + $0xf8] sm:$0xff]  ;;  %6922 = vst [vmem:[#allocation15_spill] sm:$0xff] %v6098_v44  ;;  %v6119_v3 = vld [vmem:[#allocation10 + $0x70] sm:$0xff] }
 0x71a   :  { %v2740_v63 = vsel %vm2737_vm7, %v2739_v58, %v2735_v61  ;;  %6923 = vst [vmem:[#allocation16_spill] sm:$0xff] %v6101_v48  ;;  %v6128_v61 = vld [vmem:[#allocation10 + $0x48] sm:$0xff]  ;;  %v6131_v58 = vld [vmem:[#allocation10 + $0x50] sm:$0xff] }
 0x71b   :  { %6924 = vst [vmem:[#allocation18_spill] sm:$0xff] %v6104_v32 }
 0x71c   :  { %6925 = vst [vmem:[#allocation25_spill] sm:$0xff] %v6107_v33 }
 0x71d   :  { %6926 = vst [vmem:[#allocation38_spill] sm:$0xff] %v6110_v36 }
 0x71e   :  { %6927 = vst [vmem:[#allocation19_spill] sm:$0xff] %v6113_v13 }
 0x71f   :  { %v3917_v2 = vpop.eup %3916  ;;  %6928 = vst [vmem:[#allocation20_spill] sm:$0xff] %v6116_v34 }
 0x720   :  { %v2746_v25 = vmul.f32 %v3917_v2, %v2740_v63  ;;  %6929 = vst [vmem:[#allocation58_spill] sm:$0xff] %v6119_v3  ;;  %v6134_v2 = vld [vmem:[#allocation10 + $0x58] sm:$0xff]  ;;  %v6137_v63 = vld [vmem:[#allocation10 + $0x20] sm:$0xff] }
 0x721   :  { %6932 = vst [vmem:[#allocation23_spill] sm:$0xff] %v6128_v61 }
 0x722   :  { %2767 = vmatmul.f32.vlgmr.msra.gmra.mxu0 %v2746_v25  ;;  %2787 = vmatmul.f32.vlgmr.msra.gmra.mxu1 %v2746_v25  ;;  %6933 = vst [vmem:[#allocation41_spill] sm:$0xff] %v6131_v58 }
 0x723   :  { %2807 = vmatmul.f32.vlgmr.msra.gmra.mxu2 %v2746_v25  ;;  %2827 = vmatmul.f32.vlgmr.msra.gmra.mxu3 %v2746_v25  ;;  %6934 = vst [vmem:[#allocation57_spill] sm:$0xff] %v6134_v2  ;;  %v6140_v25 = vld [vmem:[#allocation10 + $0x28] sm:$0xff] }
 0x724   :  { %3053 = vmatpush.msra.mxu0 %v5969_v50  ;;  %3073 = vmatpush.msra.mxu1 %v5972_v15  ;;  %6935 = vst [vmem:[#allocation28_spill] sm:$0xff] %v6137_v63 }
 0x725   :  { %3093 = vmatpush.msra.mxu2 %v5975_v18  ;;  %3113 = vmatpush.msra.mxu3 %v5978_v45  ;;  %6936 = vst [vmem:[#allocation56_spill] sm:$0xff] %v6140_v25 }
 0x726   :  { %3054 = vmatpush.msra.mxu0 %v5981_v22  ;;  %3074 = vmatpush.msra.mxu1 %v5984_v55 }
 0x727   :  { %3094 = vmatpush.msra.mxu2 %v5987_v1  ;;  %3114 = vmatpush.msra.mxu3 %v5990_v19 }
 0x728   :  { %3055 = vmatpush.msra.mxu0 %v5993_v7  ;;  %3075 = vmatpush.msra.mxu1 %v5996_v30 }
 0x729   :  { %3095 = vmatpush.msra.mxu2 %v5999_v54  ;;  %3115 = vmatpush.msra.mxu3 %v6002_v6 }
 0x72a   :  { %3056 = vmatpush.msra.mxu0 %v6005_v53  ;;  %3076 = vmatpush.msra.mxu1 %v6008_v10 }
 0x72b   :  { %3096 = vmatpush.msra.mxu2 %v6011_v29  ;;  %3116 = vmatpush.msra.mxu3 %v6014_v20 }
 0x72c   :  { %3057 = vmatpush.msra.mxu0 %v6017_v56  ;;  %3077 = vmatpush.msra.mxu1 %v6020_v16 }
 0x72d   :  { %3097 = vmatpush.msra.mxu2 %v6023_v17  ;;  %3117 = vmatpush.msra.mxu3 %v6026_v24 }
 0x72e   :  { %3058 = vmatpush.msra.mxu0 %v6029_v26  ;;  %3078 = vmatpush.msra.mxu1 %v6032_v9 }
 0x72f   :  { %3098 = vmatpush.msra.mxu2 %v6035_v47  ;;  %3118 = vmatpush.msra.mxu3 %v6038_v21 }
 0x730   :  { %3059 = vmatpush.msra.mxu0 %v6041_v23  ;;  %3079 = vmatpush.msra.mxu1 %v6044_v57 }
 0x731   :  { %3099 = vmatpush.msra.mxu2 %v6047_v14  ;;  %3119 = vmatpush.msra.mxu3 %v6050_v42 }
 0x732   :  { %3060 = vmatpush.msra.mxu0 %v6053_v49  ;;  %3080 = vmatpush.msra.mxu1 %v6056_v52 }
 0x733   :  { %3100 = vmatpush.msra.mxu2 %v6059_v35  ;;  %3120 = vmatpush.msra.mxu3 %v6062_v59 }
 0x734   :  { %3061 = vmatpush.msra.mxu0 %v6065_v39  ;;  %3081 = vmatpush.msra.mxu1 %v6068_v8 }
 0x735   :  { %3101 = vmatpush.msra.mxu2 %v6071_v28  ;;  %3121 = vmatpush.msra.mxu3 %v6074_v51 }
 0x736   :  { %3062 = vmatpush.msra.mxu0 %v6077_v5  ;;  %3082 = vmatpush.msra.mxu1 %v6080_v31 }
 0x737   :  { %3102 = vmatpush.msra.mxu2 %v6083_v37  ;;  %3122 = vmatpush.msra.mxu3 %v6086_v27 }
 0x738   :  { %3063 = vmatpush.msra.mxu0 %v6089_v41  ;;  %3083 = vmatpush.msra.mxu1 %v6092_v4 }
 0x739   :  { %3103 = vmatpush.msra.mxu2 %v6095_v43  ;;  %3123 = vmatpush.msra.mxu3 %v6098_v44 }
 0x73a   :  { %3064 = vmatpush.msra.mxu0 %v6101_v48  ;;  %3084 = vmatpush.msra.mxu1 %v6104_v32 }
 0x73b   :  { %3104 = vmatpush.msra.mxu2 %v6107_v33  ;;  %3124 = vmatpush.msra.mxu3 %v6110_v36 }
 0x73c   :  { %3065 = vmatpush.msra.mxu0 %v6113_v13  ;;  %3085 = vmatpush.msra.mxu1 %v6116_v34 }
 0x73d   :  { %3105 = vmatpush.msra.mxu2 %v6119_v3  ;;  %3125 = vmatpush.msra.mxu3 %v6122_v46  ;;  %v6943_v46 = vld [vmem:[#allocation34_spill] sm:$0xff] }
 0x73e   :  { %3066 = vmatpush.msra.mxu0 %v6125_v12  ;;  %3086 = vmatpush.msra.mxu1 %v6128_v61  ;;  %v6143_v12 = vld [vmem:[#allocation10 + $0x30] sm:$0xff]  ;;  %v6146_v61 = vld [vmem:[#allocation10 + $0x38] sm:$0xff] }
 0x73f   :  { %3106 = vmatpush.msra.mxu2 %v6131_v58  ;;  %3126 = vmatpush.msra.mxu3 %v6134_v2  ;;  %6937 = vst [vmem:[#allocation32_spill] sm:$0xff] %v6143_v12  ;;  %v6149_v58 = vld [vmem:[#allocation10] sm:$0xff]  ;;  %v6152_v2 = vld [vmem:[#allocation10 + $0x8] sm:$0xff] }
 0x740   :  { %3067 = vmatpush.msra.mxu0 %v6137_v63  ;;  %3087 = vmatpush.msra.mxu1 %v6140_v25  ;;  %6938 = vst [vmem:[#allocation42_spill] sm:$0xff] %v6146_v61  ;;  %v6156_v63 = vld [vmem:[#allocation10 + $0x18] sm:$0xff] }
 0x741   :  { %3107 = vmatpush.msra.mxu2 %v6143_v12  ;;  %3127 = vmatpush.msra.mxu3 %v6146_v61  ;;  %6939 = vst [vmem:[#allocation59_spill] sm:$0xff] %v6149_v58  ;;  %v6942_v12 = vld [vmem:[#allocation29_spill] sm:$0xff]  ;;  %v2250_v61 = vadd.f32 %v6943_v46, %v6911_v0 }
 0x742   :  { %3068 = vmatpush.msra.mxu0 %v6149_v58  ;;  %6940 = vst [vmem:[#allocation60_spill] sm:$0xff] %v6152_v2  ;;  %3088 = vmatpush.msra.mxu1 %v6152_v2  ;;  %v2209_v25 = vadd.f32 %v6942_v12, %v6909_v60  ;;  %v6944_v2 = vld [vmem:[#allocation40_spill] sm:$0xff] }
 0x743   :  { %3108 = vmatpush.msra.mxu2 %v6907_v11  ;;  %6941 = vst [vmem:[#allocation26_spill] sm:$0xff] %v6156_v63  ;;  %3128 = vmatpush.msra.mxu3 %v6156_v63  ;;  %v2332_v11 = vadd.f32 %v6944_v2, %v6913_v62 }
 0x79f   :  { %v2768_v3 = vpop.f32.mrf.mxu0  ;;  %v2788_v34 = vpop.f32.mrf.mxu1 }
 0x7a0   :  { %v2831_v13 = vadd.f32 %v2768_v3, %v2209_v25  ;;  %v2832_v58 = vadd.f32 %v2788_v34, %v2250_v61 }
 0x7a2   :  { %v3732_v36 = vmul.f32 -1.442695, %v2831_v13  ;;  %v3733_v33 = vmul.f32 -1.442695, %v2832_v58  ;;  %v6945_v13 = vld [vmem:[#allocation55_spill] sm:$0xff] }
 0x7a3   :  { %v2291_v34 = vadd.f32 %v6945_v13, %v6915_v38 }
 0x7a4   :  { %3918 = vpow2.f32 %v3732_v36 }
 0x7a5   :  { %3920 = vpow2.f32 %v3733_v33 }
 0x7a6   :  { %v2828_v32 = vpop.f32.mrf.mxu3  ;;  %v2808_v46 = vpop.f32.mrf.mxu2 }
 0x7a7   :  { %v2834_v48 = vadd.f32 %v2828_v32, %v2332_v11  ;;  %v2833_v58 = vadd.f32 %v2808_v46, %v2291_v34 }
 0x7a9   :  { %v3734_v63 = vmul.f32 -1.442695, %v2834_v48 }
 0x7aa   :  { %v3919_v44 = vpop.eup %3918 }
 0x7ab   :  { %v3921_v43 = vpop.eup %3920  ;;  %v2838_v12 = vadd.f32 1.0, %v3919_v44  ;;  %3922 = vpow2.f32 %v3734_v63 }
 0x7ac   :  { %v2857_v60 = vadd.f32 1.0, %v3921_v43 }
 0x7ad   :  { %3924 = vrcp.f32 %v2838_v12  ;;  %v2850_v11 = vand.u32 2147483648, %v2838_v12  ;;  %v2848_v63 = vand.u32 2147483647, %v2838_v12  ;;  %vm2844_vm10 = vweird.f32 %v2838_v12 }
 0x7ae   :  { %3926 = vrcp.f32 %v2857_v60  ;;  %v2869_v44 = vand.u32 2147483648, %v2857_v60  ;;  %v2867_v0 = vand.u32 2147483647, %v2857_v60  ;;  %vm2863_vm11 = vweird.f32 %v2857_v60 }
 0x7af   :  { %v2851_v46 = vor.u32 1.1754944e-38, %v2850_v11  ;;  %vm2849_vm14 = vcmp.eq.f32.partialorder %v2848_v63, 8.507059e+37 }
 0x7b0   :  { %vm2868_vm15 = vcmp.eq.f32.partialorder %v2867_v0, 8.507059e+37 }
 0x7b1   :  { %v3923_v3 = vpop.eup %3922 }
 0x7b2   :  { %v2877_v36 = vadd.f32 1.0, %v3923_v3 }
 0x7b3   :  { %v3925_v61 = vpop.eup %3924 }
 0x7b4   :  { %v3927_v2 = vpop.eup %3926  ;;  %v2840_v33 = vmul.f32 %v3925_v61, %v2838_v12  ;;  %3928 = vrcp.f32 %v2877_v36  ;;  %vm2845_vm8 = vweird.f32 %v3925_v61  ;;  %vm2883_vm1 = vweird.f32 %v2877_v36 }
 0x7b5   :  { %v2859_v32 = vmul.f32 %v3927_v2, %v2857_v60  ;;  %3930 = vtanh.f32 %v2833_v58  ;;  %vm2864_vm9 = vweird.f32 %v3927_v2  ;;  %vm2846_vm12 = vmor %vm2844_vm10, %vm2845_vm8 }
 0x7b6   :  { %v2841_v48 = vsub.f32 1.0, %v2840_v33  ;;  %vm2865_vm13 = vmor %vm2863_vm11, %vm2864_vm9  ;;  %v2870_v33 = vor.u32 1.1754944e-38, %v2869_v44 }
 0x7b7   :  { %v2860_v25 = vsub.f32 1.0, %v2859_v32 }
 0x7b8   :  { %v2842_v43 = vmul.f32 %v3925_v61, %v2841_v48 }
 0x7b9   :  { %v2861_v62 = vmul.f32 %v3927_v2, %v2860_v25 }
 0x7ba   :  { %v3929_v4 = vpop.eup %3928  ;;  %v2843_v13 = vadd.f32 %v3925_v61, %v2842_v43 }
 0x7bb   :  { %v2862_v3 = vadd.f32 %v3927_v2, %v2861_v62  ;;  %v2879_v34 = vmul.f32 %v3929_v4, %v2877_v36  ;;  %v3931_v58 = vpop.eup %3930  ;;  %vm2884_vm0 = vweird.f32 %v3929_v4  ;;  %v2889_v62 = vand.u32 2147483648, %v2877_v36 }
 0x7bc   :  { %v2847_v32 = vsel %vm2846_vm12, %v3925_v61, %v2843_v13  ;;  %v2887_v61 = vand.u32 2147483647, %v2877_v36  ;;  %vm2885_vm2 = vmor %vm2883_vm1, %vm2884_vm0  ;;  %v6952_v36 = vld [vmem:[#allocation16_spill] sm:$0xff]  ;;  %v6953_v13 = vld [vmem:[#allocation18_spill] sm:$0xff] }
 0x7bd   :  { %v2852_v38 = vsel %vm2849_vm14, %v2851_v46, %v2847_v32  ;;  %v2866_v48 = vsel %vm2865_vm13, %v3927_v2, %v2862_v3  ;;  %v2880_v41 = vsub.f32 1.0, %v2879_v34  ;;  %v2890_v44 = vor.u32 1.1754944e-38, %v2889_v62  ;;  %v6954_v46 = vld [vmem:[#allocation25_spill] sm:$0xff]  ;;  %v6955_v3 = vld [vmem:[#allocation38_spill] sm:$0xff]  ;;  %v6956_v34 = vld [vmem:[#allocation19_spill] sm:$0xff] }
 0x7be   :  { %v2871_v25 = vsel %vm2868_vm15, %v2870_v33, %v2866_v48  ;;  %v2894_v27 = vmul.f32 %v3931_v58, %v2852_v38  ;;  %vm2888_vm3 = vcmp.eq.f32.partialorder %v2887_v61, 8.507059e+37  ;;  %v6946_v38 = vld [vmem:[#allocation17_spill] sm:$0xff]  ;;  %v6957_v33 = vld [vmem:[#allocation20_spill] sm:$0xff]  ;;  %v6958_v32 = vld [vmem:[#allocation58_spill] sm:$0xff] }
 0x7bf   :  { %v2893_v37 = vmul.f32 %v2871_v25, %v5966_v40  ;;  %v2881_v43 = vmul.f32 %v3929_v4, %v2880_v41  ;;  %v6947_v40 = vld [vmem:[#allocation50_spill] sm:$0xff]  ;;  %v6950_v41 = vld [vmem:[#allocation21_spill] sm:$0xff]  ;;  %v6959_v58 = vld [vmem:[#allocation24_spill] sm:$0xff] }
 0x7c0   :  { %v6960_v48 = vld [vmem:[#allocation22_spill] sm:$0xff]  ;;  %v6961_v25 = vld [vmem:[#allocation23_spill] sm:$0xff]  ;;  %v6964_v62 = vld [vmem:[#allocation28_spill] sm:$0xff] }
 0x7c1   :  { %v6168_v12 = vadd.f32 %v2894_v27, %v2893_v37  ;;  %v2882_v60 = vadd.f32 %v3929_v4, %v2881_v43  ;;  %v6948_v37 = vld [vmem:[#allocation51_spill] sm:$0xff]  ;;  %v6949_v27 = vld [vmem:[#allocation52_spill] sm:$0xff]  ;;  %v6962_v43 = vld [vmem:[#allocation41_spill] sm:$0xff] }
 0x7c2   :  { %v6965_v61 = vld [vmem:[#allocation56_spill] sm:$0xff] }
 0x7c3   :  { %3932 = vtanh.f32 %v6168_v12  ;;  %v2886_v11 = vsel %vm2885_vm2, %v3929_v4, %v2882_v60  ;;  %v6951_v4 = vld [vmem:[#allocation15_spill] sm:$0xff]  ;;  %v6963_v60 = vld [vmem:[#allocation57_spill] sm:$0xff] }
 0x7c4   :  { %v2891_v2 = vsel %vm2888_vm3, %v2890_v44, %v2886_v11  ;;  %v6966_v11 = vld [vmem:[#allocation32_spill] sm:$0xff]  ;;  %v6967_v44 = vld [vmem:[#allocation42_spill] sm:$0xff] }
 0x7c9   :  { %v3933_v0 = vpop.eup %3932 }
 0x7ca   :  { %v2897_v63 = vmul.f32 %v3933_v0, %v2891_v2  ;;  %v6968_v0 = vld [vmem:[#allocation59_spill] sm:$0xff]  ;;  %v6969_v2 = vld [vmem:[#allocation60_spill] sm:$0xff] }
 0x7cc   :  { %2918 = vmatmul.f32.vlgmr.msrb.gmra.mxu0 %v2897_v63  ;;  %2938 = vmatmul.f32.vlgmr.msrb.gmra.mxu1 %v2897_v63 }
 0x7cd   :  { %2958 = vmatmul.f32.vlgmr.msrb.gmra.mxu2 %v2897_v63  ;;  %2978 = vmatmul.f32.vlgmr.msrb.gmra.mxu3 %v2897_v63  ;;  %v6233_v63 = vld [vmem:[#allocation10 + $0x10] sm:$0xff] }
 0x7ce   :  { %3204 = vmatpush.msrb.mxu0 %v5969_v50  ;;  %3224 = vmatpush.msrb.mxu1 %v5972_v15  ;;  %6970 = vst [vmem:[#allocation43_spill] sm:$0xff] %v6233_v63 }
 0x7cf   :  { %3244 = vmatpush.msrb.mxu2 %v5975_v18  ;;  %3264 = vmatpush.msrb.mxu3 %v5978_v45 }
 0x7d0   :  { %3205 = vmatpush.msrb.mxu0 %v5981_v22  ;;  %3225 = vmatpush.msrb.mxu1 %v5984_v55 }
 0x7d1   :  { %3245 = vmatpush.msrb.mxu2 %v5987_v1  ;;  %3265 = vmatpush.msrb.mxu3 %v5990_v19 }
 0x7d2   :  { %3206 = vmatpush.msrb.mxu0 %v5993_v7  ;;  %3226 = vmatpush.msrb.mxu1 %v5996_v30 }
 0x7d3   :  { %3246 = vmatpush.msrb.mxu2 %v5999_v54  ;;  %3266 = vmatpush.msrb.mxu3 %v6002_v6 }
 0x7d4   :  { %3207 = vmatpush.msrb.mxu0 %v6005_v53  ;;  %3227 = vmatpush.msrb.mxu1 %v6008_v10 }
 0x7d5   :  { %3247 = vmatpush.msrb.mxu2 %v6011_v29  ;;  %3267 = vmatpush.msrb.mxu3 %v6014_v20 }
 0x7d6   :  { %3208 = vmatpush.msrb.mxu0 %v6017_v56  ;;  %3228 = vmatpush.msrb.mxu1 %v6020_v16 }
 0x7d7   :  { %3248 = vmatpush.msrb.mxu2 %v6023_v17  ;;  %3268 = vmatpush.msrb.mxu3 %v6026_v24 }
 0x7d8   :  { %3209 = vmatpush.msrb.mxu0 %v6029_v26  ;;  %3229 = vmatpush.msrb.mxu1 %v6032_v9 }
 0x7d9   :  { %3249 = vmatpush.msrb.mxu2 %v6035_v47  ;;  %3269 = vmatpush.msrb.mxu3 %v6038_v21 }
 0x7da   :  { %3210 = vmatpush.msrb.mxu0 %v6041_v23  ;;  %3230 = vmatpush.msrb.mxu1 %v6044_v57 }
 0x7db   :  { %3250 = vmatpush.msrb.mxu2 %v6047_v14  ;;  %3270 = vmatpush.msrb.mxu3 %v6050_v42 }
 0x7dc   :  { %3211 = vmatpush.msrb.mxu0 %v6053_v49  ;;  %3231 = vmatpush.msrb.mxu1 %v6056_v52 }
 0x7dd   :  { %3251 = vmatpush.msrb.mxu2 %v6059_v35  ;;  %3271 = vmatpush.msrb.mxu3 %v6062_v59 }
 0x7de   :  { %3212 = vmatpush.msrb.mxu0 %v6065_v39  ;;  %3232 = vmatpush.msrb.mxu1 %v6068_v8 }
 0x7df   :  { %3252 = vmatpush.msrb.mxu2 %v6071_v28  ;;  %3272 = vmatpush.msrb.mxu3 %v6074_v51 }
 0x7e0   :  { %3213 = vmatpush.msrb.mxu0 %v6077_v5  ;;  %3233 = vmatpush.msrb.mxu1 %v6080_v31 }
 0x7e1   :  { %3253 = vmatpush.msrb.mxu2 %v6946_v38  ;;  %3273 = vmatpush.msrb.mxu3 %v6947_v40 }
 0x7e2   :  { %3214 = vmatpush.msrb.mxu0 %v6948_v37  ;;  %3234 = vmatpush.msrb.mxu1 %v6949_v27 }
 0x7e3   :  { %3254 = vmatpush.msrb.mxu2 %v6950_v41  ;;  %3274 = vmatpush.msrb.mxu3 %v6951_v4 }
 0x7e4   :  { %3215 = vmatpush.msrb.mxu0 %v6952_v36  ;;  %3235 = vmatpush.msrb.mxu1 %v6953_v13 }
 0x7e5   :  { %3255 = vmatpush.msrb.mxu2 %v6954_v46  ;;  %3275 = vmatpush.msrb.mxu3 %v6955_v3  ;;  %v6977_v3 = vld [vmem:[#allocation30_spill] sm:$0xff] }
 0x7e6   :  { %3216 = vmatpush.msrb.mxu0 %v6956_v34  ;;  %3236 = vmatpush.msrb.mxu1 %v6957_v33 }
 0x7e7   :  { %3256 = vmatpush.msrb.mxu2 %v6958_v32  ;;  %3276 = vmatpush.msrb.mxu3 %v6959_v58  ;;  %v6975_v58 = vld [vmem:[#allocation54_spill] sm:$0xff] }
 0x7e8   :  { %3217 = vmatpush.msrb.mxu0 %v6960_v48  ;;  %3237 = vmatpush.msrb.mxu1 %v6961_v25  ;;  %v6971_v25 = vld [vmem:[#allocation26_spill] sm:$0xff] }
 0x7e9   :  { %3257 = vmatpush.msrb.mxu2 %v6962_v43  ;;  %3277 = vmatpush.msrb.mxu3 %v6963_v60  ;;  %v6972_v43 = vld [vmem:[#allocation66_spill] sm:$0xff]  ;;  %v6973_v60 = vld [vmem:[#allocation53_spill] sm:$0xff] }
 0x7ea   :  { %3218 = vmatpush.msrb.mxu0 %v6964_v62  ;;  %3238 = vmatpush.msrb.mxu1 %v6965_v61  ;;  %v2212_v48 = vadd.f32 %v6973_v60, %v6972_v43  ;;  %v6974_v62 = vld [vmem:[#allocation67_spill] sm:$0xff] }
 0x7eb   :  { %3258 = vmatpush.msrb.mxu2 %v6966_v11  ;;  %3278 = vmatpush.msrb.mxu3 %v6967_v44  ;;  %v2253_v61 = vadd.f32 %v6975_v58, %v6974_v62 }
 0x7ec   :  { %3219 = vmatpush.msrb.mxu0 %v6968_v0  ;;  %3239 = vmatpush.msrb.mxu1 %v6969_v2  ;;  %v6976_v2 = vld [vmem:[#allocation70_spill] sm:$0xff] }
 0x7ed   :  { %3259 = vmatpush.msrb.mxu2 %v6233_v63  ;;  %3279 = vmatpush.msrb.mxu3 %v6971_v25  ;;  %v2335_v46 = vadd.f32 %v6977_v3, %v6976_v2 }
 0x849   :  { %v2919_v32 = vpop.f32.mrf.mxu0  ;;  %v2939_v11 = vpop.f32.mrf.mxu1 }
 0x84a   :  { %v2982_v33 = vadd.f32 %v2919_v32, %v2212_v48  ;;  %v2983_v44 = vadd.f32 %v2939_v11, %v2253_v61  ;;  %v6978_v48 = vld [vmem:[#allocation72_spill] sm:$0xff] }
 0x84c   :  { %v3735_v34 = vmul.f32 -1.442695, %v2982_v33  ;;  %v3736_v0 = vmul.f32 -1.442695, %v2983_v44  ;;  %v6979_v33 = vld [vmem:[#allocation37_spill] sm:$0xff] }
 0x84d   :  { %v2294_v61 = vadd.f32 %v6979_v33, %v6978_v48 }
 0x84e   :  { %3934 = vpow2.f32 %v3735_v34 }
 0x84f   :  { %3936 = vpow2.f32 %v3736_v0 }
 0x850   :  { %v2979_v63 = vpop.f32.mrf.mxu3  ;;  %v2959_v58 = vpop.f32.mrf.mxu2 }
 0x851   :  { %v2985_v13 = vadd.f32 %v2979_v63, %v2335_v46  ;;  %v2984_v44 = vadd.f32 %v2959_v58, %v2294_v61 }
 0x853   :  { %v3737_v25 = vmul.f32 -1.442695, %v2985_v13 }
 0x854   :  { %v3935_v36 = vpop.eup %3934 }
 0x855   :  { %v3937_v4 = vpop.eup %3936  ;;  %v2989_v60 = vadd.f32 1.0, %v3935_v36  ;;  %3938 = vpow2.f32 %v3737_v25 }
 0x856   :  { %v3008_v43 = vadd.f32 1.0, %v3937_v4 }
 0x857   :  { %3940 = vrcp.f32 %v2989_v60  ;;  %v3001_v2 = vand.u32 2147483648, %v2989_v60  ;;  %v2999_v25 = vand.u32 2147483647, %v2989_v60  ;;  %vm2995_vm6 = vweird.f32 %v2989_v60 }
 0x858   :  { %3942 = vrcp.f32 %v3008_v43  ;;  %v3020_v36 = vand.u32 2147483648, %v3008_v43  ;;  %v3018_v41 = vand.u32 2147483647, %v3008_v43  ;;  %vm3014_vm7 = vweird.f32 %v3008_v43 }
 0x859   :  { %v3002_v58 = vor.u32 1.1754944e-38, %v3001_v2  ;;  %vm3000_vm10 = vcmp.eq.f32.partialorder %v2999_v25, 8.507059e+37 }
 0x85a   :  { %vm3019_vm11 = vcmp.eq.f32.partialorder %v3018_v41, 8.507059e+37 }
 0x85b   :  { %v3939_v32 = vpop.eup %3938 }
 0x85c   :  { %v3028_v34 = vadd.f32 1.0, %v3939_v32 }
 0x85d   :  { %v3941_v11 = vpop.eup %3940 }
 0x85e   :  { %v3943_v3 = vpop.eup %3942  ;;  %v2991_v0 = vmul.f32 %v3941_v11, %v2989_v60  ;;  %3944 = vrcp.f32 %v3028_v34  ;;  %vm2996_vm4 = vweird.f32 %v3941_v11  ;;  %vm3034_vm13 = vweird.f32 %v3028_v34 }
 0x85f   :  { %v3010_v46 = vmul.f32 %v3943_v3, %v3008_v43  ;;  %3946 = vtanh.f32 %v2984_v44  ;;  %vm3015_vm5 = vweird.f32 %v3943_v3  ;;  %vm2997_vm8 = vmor %vm2995_vm6, %vm2996_vm4  ;;  %v3038_v2 = vand.u32 2147483647, %v3028_v34 }
 0x860   :  { %v2992_v13 = vsub.f32 1.0, %v2991_v0  ;;  %vm3016_vm9 = vmor %vm3014_vm7, %vm3015_vm5  ;;  %v3021_v0 = vor.u32 1.1754944e-38, %v3020_v36 }
 0x861   :  { %v3011_v63 = vsub.f32 1.0, %v3010_v46  ;;  %vm3039_vm15 = vcmp.eq.f32.partialorder %v3038_v2, 8.507059e+37  ;;  %v6999_v2 = vld [vmem:[#allocation56_spill] sm:$0xff] }
 0x862   :  { %v2993_v4 = vmul.f32 %v3941_v11, %v2992_v13 }
 0x863   :  { %v3012_v62 = vmul.f32 %v3943_v3, %v3011_v63 }
 0x864   :  { %v3945_v27 = vpop.eup %3944  ;;  %v2994_v33 = vadd.f32 %v3941_v11, %v2993_v4 }
 0x865   :  { %v3013_v32 = vadd.f32 %v3943_v3, %v3012_v62  ;;  %v3030_v61 = vmul.f32 %v3945_v27, %v3028_v34  ;;  %v3947_v44 = vpop.eup %3946  ;;  %vm3035_vm12 = vweird.f32 %v3945_v27  ;;  %v3040_v62 = vand.u32 2147483648, %v3028_v34  ;;  %v6986_v34 = vld [vmem:[#allocation16_spill] sm:$0xff] }
 0x866   :  { %v2998_v46 = vsel %vm2997_vm8, %v3941_v11, %v2994_v33  ;;  %vm3036_vm14 = vmor %vm3034_vm13, %vm3035_vm12  ;;  %v6987_v33 = vld [vmem:[#allocation18_spill] sm:$0xff] }
 0x867   :  { %v3003_v48 = vsel %vm3000_vm10, %v3002_v58, %v2998_v46  ;;  %v3017_v13 = vsel %vm3016_vm9, %v3943_v3, %v3013_v32  ;;  %v3031_v37 = vsub.f32 1.0, %v3030_v61  ;;  %v3041_v36 = vor.u32 1.1754944e-38, %v3040_v62  ;;  %v6988_v58 = vld [vmem:[#allocation25_spill] sm:$0xff]  ;;  %v6989_v32 = vld [vmem:[#allocation38_spill] sm:$0xff]  ;;  %v6990_v61 = vld [vmem:[#allocation19_spill] sm:$0xff] }
 0x868   :  { %v3022_v63 = vsel %vm3019_vm11, %v3021_v0, %v3017_v13  ;;  %v3045_v40 = vmul.f32 %v3947_v44, %v3003_v48  ;;  %v6985_v48 = vld [vmem:[#allocation15_spill] sm:$0xff]  ;;  %v6991_v0 = vld [vmem:[#allocation20_spill] sm:$0xff]  ;;  %v6992_v46 = vld [vmem:[#allocation58_spill] sm:$0xff] }
 0x869   :  { %v3044_v38 = vmul.f32 %v3022_v63, %v6168_v12  ;;  %v3032_v4 = vmul.f32 %v3945_v27, %v3031_v37  ;;  %v6980_v12 = vld [vmem:[#allocation17_spill] sm:$0xff]  ;;  %v6983_v37 = vld [vmem:[#allocation52_spill] sm:$0xff]  ;;  %v6994_v13 = vld [vmem:[#allocation22_spill] sm:$0xff] }
 0x86a   :  { %v6993_v44 = vld [vmem:[#allocation24_spill] sm:$0xff]  ;;  %v6995_v63 = vld [vmem:[#allocation23_spill] sm:$0xff] }
 0x86b   :  { %v6246_v60 = vadd.f32 %v3045_v40, %v3044_v38  ;;  %v3033_v43 = vadd.f32 %v3945_v27, %v3032_v4  ;;  %v6981_v38 = vld [vmem:[#allocation50_spill] sm:$0xff]  ;;  %v6982_v40 = vld [vmem:[#allocation51_spill] sm:$0xff]  ;;  %v6996_v4 = vld [vmem:[#allocation41_spill] sm:$0xff] }
 0x86c   :  { %v6998_v62 = vld [vmem:[#allocation28_spill] sm:$0xff] }
 0x86d   :  { %3948 = vtanh.f32 %v6246_v60  ;;  %v3037_v11 = vsel %vm3036_vm14, %v3945_v27, %v3033_v43  ;;  %v6984_v27 = vld [vmem:[#allocation21_spill] sm:$0xff] }
 0x86e   :  { %v3042_v3 = vsel %vm3039_vm15, %v3041_v36, %v3037_v11  ;;  %v6997_v43 = vld [vmem:[#allocation57_spill] sm:$0xff]  ;;  %v7000_v11 = vld [vmem:[#allocation32_spill] sm:$0xff]  ;;  %v7001_v36 = vld [vmem:[#allocation42_spill] sm:$0xff] }
 0x873   :  { %v3949_v41 = vpop.eup %3948 }
 0x874   :  { %v3048_v25 = vmul.f32 %v3949_v41, %v3042_v3  ;;  %v7002_v41 = vld [vmem:[#allocation59_spill] sm:$0xff]  ;;  %v7003_v3 = vld [vmem:[#allocation60_spill] sm:$0xff] }
 0x876   :  { %3069 = vmatmul.f32.vlgmr.msra.gmra.mxu0 %v3048_v25  ;;  %3089 = vmatmul.f32.vlgmr.msra.gmra.mxu1 %v3048_v25 }
 0x877   :  { %3109 = vmatmul.f32.vlgmr.msra.gmra.mxu2 %v3048_v25  ;;  %3129 = vmatmul.f32.vlgmr.msra.gmra.mxu3 %v3048_v25  ;;  %v7004_v25 = vld [vmem:[#allocation43_spill] sm:$0xff] }
 0x878   :  { %3355 = vmatpush.msra.mxu0 %v5969_v50  ;;  %3375 = vmatpush.msra.mxu1 %v5972_v15 }
 0x879   :  { %3395 = vmatpush.msra.mxu2 %v5975_v18  ;;  %3415 = vmatpush.msra.mxu3 %v5978_v45 }
 0x87a   :  { %3356 = vmatpush.msra.mxu0 %v5981_v22  ;;  %3376 = vmatpush.msra.mxu1 %v5984_v55 }
 0x87b   :  { %3396 = vmatpush.msra.mxu2 %v5987_v1  ;;  %3416 = vmatpush.msra.mxu3 %v5990_v19 }
 0x87c   :  { %3357 = vmatpush.msra.mxu0 %v5993_v7  ;;  %3377 = vmatpush.msra.mxu1 %v5996_v30 }
 0x87d   :  { %3397 = vmatpush.msra.mxu2 %v5999_v54  ;;  %3417 = vmatpush.msra.mxu3 %v6002_v6 }
 0x87e   :  { %3358 = vmatpush.msra.mxu0 %v6005_v53  ;;  %3378 = vmatpush.msra.mxu1 %v6008_v10 }
 0x87f   :  { %3398 = vmatpush.msra.mxu2 %v6011_v29  ;;  %3418 = vmatpush.msra.mxu3 %v6014_v20 }
 0x880   :  { %3359 = vmatpush.msra.mxu0 %v6017_v56  ;;  %3379 = vmatpush.msra.mxu1 %v6020_v16 }
 0x881   :  { %3399 = vmatpush.msra.mxu2 %v6023_v17  ;;  %3419 = vmatpush.msra.mxu3 %v6026_v24 }
 0x882   :  { %3360 = vmatpush.msra.mxu0 %v6029_v26  ;;  %3380 = vmatpush.msra.mxu1 %v6032_v9 }
 0x883   :  { %3400 = vmatpush.msra.mxu2 %v6035_v47  ;;  %3420 = vmatpush.msra.mxu3 %v6038_v21 }
 0x884   :  { %3361 = vmatpush.msra.mxu0 %v6041_v23  ;;  %3381 = vmatpush.msra.mxu1 %v6044_v57 }
 0x885   :  { %3401 = vmatpush.msra.mxu2 %v6047_v14  ;;  %3421 = vmatpush.msra.mxu3 %v6050_v42 }
 0x886   :  { %3362 = vmatpush.msra.mxu0 %v6053_v49  ;;  %3382 = vmatpush.msra.mxu1 %v6056_v52 }
 0x887   :  { %3402 = vmatpush.msra.mxu2 %v6059_v35  ;;  %3422 = vmatpush.msra.mxu3 %v6062_v59 }
 0x888   :  { %3363 = vmatpush.msra.mxu0 %v6065_v39  ;;  %3383 = vmatpush.msra.mxu1 %v6068_v8 }
 0x889   :  { %3403 = vmatpush.msra.mxu2 %v6071_v28  ;;  %3423 = vmatpush.msra.mxu3 %v6074_v51 }
 0x88a   :  { %3364 = vmatpush.msra.mxu0 %v6077_v5  ;;  %3384 = vmatpush.msra.mxu1 %v6080_v31 }
 0x88b   :  { %3404 = vmatpush.msra.mxu2 %v6980_v12  ;;  %3424 = vmatpush.msra.mxu3 %v6981_v38 }
 0x88c   :  { %3365 = vmatpush.msra.mxu0 %v6982_v40  ;;  %3385 = vmatpush.msra.mxu1 %v6983_v37 }
 0x88d   :  { %3405 = vmatpush.msra.mxu2 %v6984_v27  ;;  %3425 = vmatpush.msra.mxu3 %v6985_v48 }
 0x88e   :  { %3366 = vmatpush.msra.mxu0 %v6986_v34  ;;  %3386 = vmatpush.msra.mxu1 %v6987_v33 }
 0x88f   :  { %3406 = vmatpush.msra.mxu2 %v6988_v58  ;;  %3426 = vmatpush.msra.mxu3 %v6989_v32  ;;  %v7011_v58 = vld [vmem:[#allocation44_spill] sm:$0xff] }
 0x890   :  { %3367 = vmatpush.msra.mxu0 %v6990_v61  ;;  %3387 = vmatpush.msra.mxu1 %v6991_v0 }
 0x891   :  { %3407 = vmatpush.msra.mxu2 %v6992_v46  ;;  %3427 = vmatpush.msra.mxu3 %v6993_v44  ;;  %v7009_v46 = vld [vmem:[#allocation35_spill] sm:$0xff] }
 0x892   :  { %3368 = vmatpush.msra.mxu0 %v6994_v13  ;;  %3388 = vmatpush.msra.mxu1 %v6995_v63  ;;  %v7005_v13 = vld [vmem:[#allocation26_spill] sm:$0xff] }
 0x893   :  { %3408 = vmatpush.msra.mxu2 %v6996_v4  ;;  %3428 = vmatpush.msra.mxu3 %v6997_v43  ;;  %v7006_v63 = vld [vmem:[#allocation66_spill] sm:$0xff]  ;;  %v7007_v4 = vld [vmem:[#allocation31_spill] sm:$0xff] }
 0x894   :  { %3369 = vmatpush.msra.mxu0 %v6998_v62  ;;  %3389 = vmatpush.msra.mxu1 %v6999_v2  ;;  %v2215_v44 = vadd.f32 %v7007_v4, %v7006_v63  ;;  %v7008_v43 = vld [vmem:[#allocation67_spill] sm:$0xff] }
 0x895   :  { %3409 = vmatpush.msra.mxu2 %v7000_v11  ;;  %3429 = vmatpush.msra.mxu3 %v7001_v36  ;;  %v2256_v62 = vadd.f32 %v7009_v46, %v7008_v43 }
 0x896   :  { %3370 = vmatpush.msra.mxu0 %v7002_v41  ;;  %3390 = vmatpush.msra.mxu1 %v7003_v3  ;;  %v7010_v41 = vld [vmem:[#allocation70_spill] sm:$0xff] }
 0x897   :  { %3410 = vmatpush.msra.mxu2 %v7004_v25  ;;  %3430 = vmatpush.msra.mxu3 %v7005_v13  ;;  %v2338_v3 = vadd.f32 %v7011_v58, %v7010_v41 }
 0x8f3   :  { %v3070_v0 = vpop.f32.mrf.mxu0  ;;  %v3090_v2 = vpop.f32.mrf.mxu1 }
 0x8f4   :  { %v3133_v61 = vadd.f32 %v3070_v0, %v2215_v44  ;;  %v3134_v11 = vadd.f32 %v3090_v2, %v2256_v62  ;;  %v7012_v44 = vld [vmem:[#allocation72_spill] sm:$0xff] }
 0x8f6   :  { %v3738_v32 = vmul.f32 -1.442695, %v3133_v61  ;;  %v3739_v36 = vmul.f32 -1.442695, %v3134_v11  ;;  %v7013_v61 = vld [vmem:[#allocation46_spill] sm:$0xff] }
 0x8f7   :  { %v2297_v62 = vadd.f32 %v7013_v61, %v7012_v44 }
 0x8f8   :  { %3950 = vpow2.f32 %v3738_v32 }
 0x8f9   :  { %3952 = vpow2.f32 %v3739_v36 }
 0x8fa   :  { %v3130_v25 = vpop.f32.mrf.mxu3  ;;  %v3110_v46 = vpop.f32.mrf.mxu2 }
 0x8fb   :  { %v3136_v33 = vadd.f32 %v3130_v25, %v2338_v3  ;;  %v3135_v11 = vadd.f32 %v3110_v46, %v2297_v62 }
 0x8fd   :  { %v3740_v13 = vmul.f32 -1.442695, %v3136_v33 }
 0x8fe   :  { %v3951_v34 = vpop.eup %3950 }
 0x8ff   :  { %v3953_v48 = vpop.eup %3952  ;;  %v3140_v4 = vadd.f32 1.0, %v3951_v34  ;;  %3954 = vpow2.f32 %v3740_v13 }
 0x900   :  { %v3159_v63 = vadd.f32 1.0, %v3953_v48 }
 0x901   :  { %3956 = vrcp.f32 %v3140_v4  ;;  %v3152_v41 = vand.u32 2147483648, %v3140_v4  ;;  %v3150_v13 = vand.u32 2147483647, %v3140_v4  ;;  %vm3146_vm2 = vweird.f32 %v3140_v4 }
 0x902   :  { %3958 = vrcp.f32 %v3159_v63  ;;  %v3171_v34 = vand.u32 2147483648, %v3159_v63  ;;  %v3169_v27 = vand.u32 2147483647, %v3159_v63  ;;  %vm3165_vm3 = vweird.f32 %v3159_v63 }
 0x903   :  { %v3153_v46 = vor.u32 1.1754944e-38, %v3152_v41  ;;  %vm3151_vm6 = vcmp.eq.f32.partialorder %v3150_v13, 8.507059e+37 }
 0x904   :  { %vm3170_vm7 = vcmp.eq.f32.partialorder %v3169_v27, 8.507059e+37 }
 0x905   :  { %v3955_v0 = vpop.eup %3954 }
 0x906   :  { %v3179_v32 = vadd.f32 1.0, %v3955_v0 }
 0x907   :  { %v3957_v2 = vpop.eup %3956 }
 0x908   :  { %v3959_v58 = vpop.eup %3958  ;;  %v3142_v36 = vmul.f32 %v3957_v2, %v3140_v4  ;;  %3960 = vrcp.f32 %v3179_v32  ;;  %vm3147_vm0 = vweird.f32 %v3957_v2  ;;  %vm3185_vm9 = vweird.f32 %v3179_v32 }
 0x909   :  { %v3161_v3 = vmul.f32 %v3959_v58, %v3159_v63  ;;  %3962 = vtanh.f32 %v3135_v11  ;;  %vm3166_vm1 = vweird.f32 %v3959_v58  ;;  %vm3148_vm4 = vmor %vm3146_vm2, %vm3147_vm0  ;;  %v3189_v41 = vand.u32 2147483647, %v3179_v32 }
 0x90a   :  { %v3143_v33 = vsub.f32 1.0, %v3142_v36  ;;  %vm3167_vm5 = vmor %vm3165_vm3, %vm3166_vm1  ;;  %v3172_v36 = vor.u32 1.1754944e-38, %v3171_v34 }
 0x90b   :  { %v3162_v25 = vsub.f32 1.0, %v3161_v3  ;;  %vm3190_vm11 = vcmp.eq.f32.partialorder %v3189_v41, 8.507059e+37 }
 0x90c   :  { %v3144_v48 = vmul.f32 %v3957_v2, %v3143_v33 }
 0x90d   :  { %v3163_v43 = vmul.f32 %v3959_v58, %v3162_v25 }
 0x90e   :  { %v3961_v37 = vpop.eup %3960  ;;  %v3145_v61 = vadd.f32 %v3957_v2, %v3144_v48 }
 0x90f   :  { %v3164_v0 = vadd.f32 %v3959_v58, %v3163_v43  ;;  %v3181_v62 = vmul.f32 %v3961_v37, %v3179_v32  ;;  %v3963_v11 = vpop.eup %3962  ;;  %vm3186_vm8 = vweird.f32 %v3961_v37  ;;  %v3191_v43 = vand.u32 2147483648, %v3179_v32 }
 0x910   :  { %v3149_v3 = vsel %vm3148_vm4, %v3957_v2, %v3145_v61  ;;  %vm3187_vm10 = vmor %vm3185_vm9, %vm3186_vm8 }
 0x911   :  { %v3154_v44 = vsel %vm3151_vm6, %v3153_v46, %v3149_v3  ;;  %v3168_v33 = vsel %vm3167_vm5, %v3959_v58, %v3164_v0  ;;  %v3182_v40 = vsub.f32 1.0, %v3181_v62  ;;  %v3192_v34 = vor.u32 1.1754944e-38, %v3191_v43  ;;  %v7046_v3 = vld [vmem:[#allocation72_spill] sm:$0xff] }
 0x912   :  { %v3173_v25 = vsel %vm3170_vm7, %v3172_v36, %v3168_v33  ;;  %v3196_v38 = vmul.f32 %v3963_v11, %v3154_v44  ;;  %v7047_v11 = vld [vmem:[#allocation62_spill] sm:$0xff] }
 0x913   :  { %v3195_v12 = vmul.f32 %v3173_v25, %v6246_v60  ;;  %v3183_v48 = vmul.f32 %v3961_v37, %v3182_v40  ;;  %v7044_v60 = vld [vmem:[#allocation70_spill] sm:$0xff]  ;;  %v2300_v33 = vadd.f32 %v7047_v11, %v7046_v3 }
 0x915   :  { %v6322_v4 = vadd.f32 %v3196_v38, %v3195_v12  ;;  %v3184_v63 = vadd.f32 %v3961_v37, %v3183_v48  ;;  %v7045_v12 = vld [vmem:[#allocation48_spill] sm:$0xff] }
 0x916   :  { %v2341_v38 = vadd.f32 %v7045_v12, %v7044_v60 }
 0x917   :  { %3964 = vtanh.f32 %v6322_v4  ;;  %v3188_v2 = vsel %vm3187_vm10, %v3961_v37, %v3184_v63 }
 0x918   :  { %v3193_v58 = vsel %vm3190_vm11, %v3192_v34, %v3188_v2 }
 0x91d   :  { %v3965_v27 = vpop.eup %3964 }
 0x91e   :  { %v3199_v13 = vmul.f32 %v3965_v27, %v3193_v58 }
 0x920   :  { %3220 = vmatmul.f32.vlgmr.msrb.gmra.mxu0 %v3199_v13  ;;  %3240 = vmatmul.f32.vlgmr.msrb.gmra.mxu1 %v3199_v13 }
 0x921   :  { %3260 = vmatmul.f32.vlgmr.msrb.gmra.mxu2 %v3199_v13  ;;  %3280 = vmatmul.f32.vlgmr.msrb.gmra.mxu3 %v3199_v13 }
 0x922   :  { %3506 = vmatpush.msrb.mxu0 %v5969_v50  ;;  %3526 = vmatpush.msrb.mxu1 %v5972_v15  ;;  %v7014_v50 = vld [vmem:[#allocation17_spill] sm:$0xff]  ;;  %v7015_v15 = vld [vmem:[#allocation50_spill] sm:$0xff] }
 0x923   :  { %3546 = vmatpush.msrb.mxu2 %v5975_v18  ;;  %3566 = vmatpush.msrb.mxu3 %v5978_v45  ;;  %v7016_v18 = vld [vmem:[#allocation51_spill] sm:$0xff]  ;;  %v7017_v45 = vld [vmem:[#allocation52_spill] sm:$0xff] }
 0x924   :  { %3507 = vmatpush.msrb.mxu0 %v5981_v22  ;;  %3527 = vmatpush.msrb.mxu1 %v5984_v55  ;;  %v7018_v22 = vld [vmem:[#allocation21_spill] sm:$0xff]  ;;  %v7019_v55 = vld [vmem:[#allocation15_spill] sm:$0xff] }
 0x925   :  { %3547 = vmatpush.msrb.mxu2 %v5987_v1  ;;  %3567 = vmatpush.msrb.mxu3 %v5990_v19  ;;  %v7020_v1 = vld [vmem:[#allocation16_spill] sm:$0xff]  ;;  %v7021_v19 = vld [vmem:[#allocation18_spill] sm:$0xff] }
 0x926   :  { %3508 = vmatpush.msrb.mxu0 %v5993_v7  ;;  %3528 = vmatpush.msrb.mxu1 %v5996_v30  ;;  %v7022_v7 = vld [vmem:[#allocation25_spill] sm:$0xff]  ;;  %v7023_v30 = vld [vmem:[#allocation38_spill] sm:$0xff] }
 0x927   :  { %3548 = vmatpush.msrb.mxu2 %v5999_v54  ;;  %3568 = vmatpush.msrb.mxu3 %v6002_v6  ;;  %v7024_v54 = vld [vmem:[#allocation19_spill] sm:$0xff]  ;;  %v7025_v6 = vld [vmem:[#allocation20_spill] sm:$0xff] }
 0x928   :  { %3509 = vmatpush.msrb.mxu0 %v6005_v53  ;;  %3529 = vmatpush.msrb.mxu1 %v6008_v10  ;;  %v7026_v53 = vld [vmem:[#allocation58_spill] sm:$0xff]  ;;  %v7027_v10 = vld [vmem:[#allocation24_spill] sm:$0xff] }
 0x929   :  { %3549 = vmatpush.msrb.mxu2 %v6011_v29  ;;  %3569 = vmatpush.msrb.mxu3 %v6014_v20  ;;  %v7028_v29 = vld [vmem:[#allocation22_spill] sm:$0xff]  ;;  %v7029_v20 = vld [vmem:[#allocation23_spill] sm:$0xff] }
 0x92a   :  { %3510 = vmatpush.msrb.mxu0 %v6017_v56  ;;  %3530 = vmatpush.msrb.mxu1 %v6020_v16  ;;  %v7030_v56 = vld [vmem:[#allocation41_spill] sm:$0xff] }
 0x92b   :  { %3550 = vmatpush.msrb.mxu2 %v6023_v17  ;;  %3570 = vmatpush.msrb.mxu3 %v6026_v24  ;;  %v7031_v16 = vld [vmem:[#allocation57_spill] sm:$0xff]  ;;  %v7032_v17 = vld [vmem:[#allocation28_spill] sm:$0xff] }
 0x92c   :  { %3511 = vmatpush.msrb.mxu0 %v6029_v26  ;;  %3531 = vmatpush.msrb.mxu1 %v6032_v9  ;;  %v7033_v24 = vld [vmem:[#allocation56_spill] sm:$0xff]  ;;  %v7035_v9 = vld [vmem:[#allocation42_spill] sm:$0xff] }
 0x92d   :  { %3551 = vmatpush.msrb.mxu2 %v6035_v47  ;;  %3571 = vmatpush.msrb.mxu3 %v6038_v21  ;;  %v7034_v26 = vld [vmem:[#allocation32_spill] sm:$0xff]  ;;  %v7036_v47 = vld [vmem:[#allocation59_spill] sm:$0xff] }
 0x92e   :  { %3512 = vmatpush.msrb.mxu0 %v6041_v23  ;;  %3532 = vmatpush.msrb.mxu1 %v6044_v57  ;;  %v7037_v21 = vld [vmem:[#allocation60_spill] sm:$0xff]  ;;  %v7038_v23 = vld [vmem:[#allocation43_spill] sm:$0xff]  ;;  %v7039_v57 = vld [vmem:[#allocation26_spill] sm:$0xff] }
 0x92f   :  { %3552 = vmatpush.msrb.mxu2 %v6047_v14  ;;  %3572 = vmatpush.msrb.mxu3 %v6050_v42  ;;  %v7040_v14 = vld [vmem:[#allocation66_spill] sm:$0xff]  ;;  %v7041_v42 = vld [vmem:[#allocation45_spill] sm:$0xff] }
 0x930   :  { %3513 = vmatpush.msrb.mxu0 %v6053_v49  ;;  %3533 = vmatpush.msrb.mxu1 %v6056_v52  ;;  %v2218_v49 = vadd.f32 %v7041_v42, %v7040_v14  ;;  %v7042_v52 = vld [vmem:[#allocation67_spill] sm:$0xff] }
 0x931   :  { %3553 = vmatpush.msrb.mxu2 %v6059_v35  ;;  %3573 = vmatpush.msrb.mxu3 %v6062_v59  ;;  %v7043_v35 = vld [vmem:[#allocation47_spill] sm:$0xff] }
 0x932   :  { %3514 = vmatpush.msrb.mxu0 %v6065_v39  ;;  %3534 = vmatpush.msrb.mxu1 %v6068_v8  ;;  %v2259_v59 = vadd.f32 %v7043_v35, %v7042_v52 }
 0x933   :  { %3554 = vmatpush.msrb.mxu2 %v6071_v28  ;;  %3574 = vmatpush.msrb.mxu3 %v6074_v51 }
 0x934   :  { %3515 = vmatpush.msrb.mxu0 %v6077_v5  ;;  %3535 = vmatpush.msrb.mxu1 %v6080_v31 }
 0x935   :  { %3555 = vmatpush.msrb.mxu2 %v7014_v50  ;;  %3575 = vmatpush.msrb.mxu3 %v7015_v15 }
 0x936   :  { %3516 = vmatpush.msrb.mxu0 %v7016_v18  ;;  %3536 = vmatpush.msrb.mxu1 %v7017_v45 }
 0x937   :  { %3556 = vmatpush.msrb.mxu2 %v7018_v22  ;;  %3576 = vmatpush.msrb.mxu3 %v7019_v55 }
 0x938   :  { %3517 = vmatpush.msrb.mxu0 %v7020_v1  ;;  %3537 = vmatpush.msrb.mxu1 %v7021_v19 }
 0x939   :  { %3557 = vmatpush.msrb.mxu2 %v7022_v7  ;;  %3577 = vmatpush.msrb.mxu3 %v7023_v30 }
 0x93a   :  { %3518 = vmatpush.msrb.mxu0 %v7024_v54  ;;  %3538 = vmatpush.msrb.mxu1 %v7025_v6 }
 0x93b   :  { %3558 = vmatpush.msrb.mxu2 %v7026_v53  ;;  %3578 = vmatpush.msrb.mxu3 %v7027_v10 }
 0x93c   :  { %3519 = vmatpush.msrb.mxu0 %v7028_v29  ;;  %3539 = vmatpush.msrb.mxu1 %v7029_v20 }
 0x93d   :  { %3559 = vmatpush.msrb.mxu2 %v7030_v56  ;;  %3579 = vmatpush.msrb.mxu3 %v7031_v16 }
 0x93e   :  { %3520 = vmatpush.msrb.mxu0 %v7032_v17  ;;  %3540 = vmatpush.msrb.mxu1 %v7033_v24 }
 0x93f   :  { %3560 = vmatpush.msrb.mxu2 %v7034_v26  ;;  %3580 = vmatpush.msrb.mxu3 %v7035_v9 }
 0x940   :  { %3521 = vmatpush.msrb.mxu0 %v7036_v47  ;;  %3541 = vmatpush.msrb.mxu1 %v7037_v21 }
 0x941   :  { %3561 = vmatpush.msrb.mxu2 %v7038_v23  ;;  %3581 = vmatpush.msrb.mxu3 %v7039_v57 }
 0x99d   :  { %v3221_v39 = vpop.f32.mrf.mxu0  ;;  %v3241_v8 = vpop.f32.mrf.mxu1 }
 0x99e   :  { %v3284_v28 = vadd.f32 %v3221_v39, %v2218_v49  ;;  %v3285_v51 = vadd.f32 %v3241_v8, %v2259_v59  ;;  %v7049_v59 = vld [vmem:[#allocation61_spill] sm:$0xff] }
 0x99f   :  { %v2262_v39 = vadd.f32 %v7049_v59, %v7042_v52  ;;  %v3667_v59 = vld [vmem:[%s6480_s7 + $0x70] sm:$0xff] }
 0x9a0   :  { %v3741_v5 = vmul.f32 -1.442695, %v3284_v28  ;;  %v3742_v31 = vmul.f32 -1.442695, %v3285_v51 }
 0x9a2   :  { %3966 = vpow2.f32 %v3741_v5 }
 0x9a3   :  { %3968 = vpow2.f32 %v3742_v31 }
 0x9a4   :  { %v3281_v40 = vpop.f32.mrf.mxu3  ;;  %v3261_v62 = vpop.f32.mrf.mxu2 }
 0x9a5   :  { %v3287_v37 = vadd.f32 %v3281_v40, %v2341_v38  ;;  %v3286_v63 = vadd.f32 %v3261_v62, %v2300_v33  ;;  %v7050_v38 = vld [vmem:[#allocation63_spill] sm:$0xff]  ;;  %v7051_v33 = vld [vmem:[#allocation68_spill] sm:$0xff] }
 0x9a6   :  { %v2344_v40 = vadd.f32 %v7050_v38, %v7044_v60  ;;  %v7052_v38 = vld [vmem:[#allocation64_spill] sm:$0xff] }
 0x9a7   :  { %v3743_v44 = vmul.f32 -1.442695, %v3287_v37 }
 0x9a8   :  { %v3967_v32 = vpop.eup %3966 }
 0x9a9   :  { %v3969_v61 = vpop.eup %3968  ;;  %v3291_v46 = vadd.f32 1.0, %v3967_v32  ;;  %3970 = vpow2.f32 %v3743_v44 }
 0x9aa   :  { %v3310_v0 = vadd.f32 1.0, %v3969_v61 }
 0x9ab   :  { %3972 = vrcp.f32 %v3291_v46  ;;  %v3303_v58 = vand.u32 2147483648, %v3291_v46  ;;  %v3301_v15 = vand.u32 2147483647, %v3291_v46  ;;  %vm3297_vm14 = vweird.f32 %v3291_v46 }
 0x9ac   :  { %3974 = vrcp.f32 %v3310_v0  ;;  %v3322_v13 = vand.u32 2147483648, %v3310_v0  ;;  %v3320_v45 = vand.u32 2147483647, %v3310_v0  ;;  %vm3316_vm15 = vweird.f32 %v3310_v0 }
 0x9ad   :  { %v3304_v1 = vor.u32 1.1754944e-38, %v3303_v58  ;;  %vm3302_vm2 = vcmp.eq.f32.partialorder %v3301_v15, 8.507059e+37 }
 0x9ae   :  { %v3323_v30 = vor.u32 1.1754944e-38, %v3322_v13  ;;  %vm3321_vm3 = vcmp.eq.f32.partialorder %v3320_v45, 8.507059e+37 }
 0x9af   :  { %v3971_v36 = vpop.eup %3970 }
 0x9b0   :  { %v3330_v25 = vadd.f32 1.0, %v3971_v36 }
 0x9b1   :  { %v3973_v48 = vpop.eup %3972 }
 0x9b2   :  { %v3975_v43 = vpop.eup %3974  ;;  %v3293_v41 = vmul.f32 %v3973_v48, %v3291_v46  ;;  %3976 = vrcp.f32 %v3330_v25  ;;  %vm3298_vm12 = vweird.f32 %v3973_v48  ;;  %v3342_v9 = vand.u32 2147483648, %v3330_v25 }
 0x9b3   :  { %v3312_v2 = vmul.f32 %v3975_v43, %v3310_v0  ;;  %3978 = vtanh.f32 %v3286_v63  ;;  %vm3317_vm13 = vweird.f32 %v3975_v43  ;;  %vm3299_vm0 = vmor %vm3297_vm14, %vm3298_vm12  ;;  %vm3336_vm5 = vweird.f32 %v3330_v25 }
 0x9b4   :  { %v3294_v34 = vsub.f32 1.0, %v3293_v41  ;;  %vm3318_vm1 = vmor %vm3316_vm15, %vm3317_vm13  ;;  %v3340_v47 = vand.u32 2147483647, %v3330_v25  ;;  %v3343_v23 = vor.u32 1.1754944e-38, %v3342_v9 }
 0x9b5   :  { %v3313_v27 = vsub.f32 1.0, %v3312_v2 }
 0x9b6   :  { %v3295_v50 = vmul.f32 %v3973_v48, %v3294_v34  ;;  %vm3341_vm7 = vcmp.eq.f32.partialorder %v3340_v47, 8.507059e+37 }
 0x9b7   :  { %v3314_v18 = vmul.f32 %v3975_v43, %v3313_v27 }
 0x9b8   :  { %v3977_v22 = vpop.eup %3976  ;;  %v3296_v55 = vadd.f32 %v3973_v48, %v3295_v50 }
 0x9b9   :  { %v3315_v19 = vadd.f32 %v3975_v43, %v3314_v18  ;;  %v3332_v7 = vmul.f32 %v3977_v22, %v3330_v25  ;;  %v3979_v6 = vpop.eup %3978  ;;  %vm3337_vm4 = vweird.f32 %v3977_v22  ;;  %v2303_v25 = vadd.f32 %v7051_v33, %v7046_v3 }
 0x9ba   :  { %v3300_v54 = vsel %vm3299_vm0, %v3973_v48, %v3296_v55  ;;  %vm3338_vm6 = vmor %vm3336_vm5, %vm3337_vm4 }
 0x9bb   :  { %v3305_v53 = vsel %vm3302_vm2, %v3304_v1, %v3300_v54  ;;  %v3319_v10 = vsel %vm3318_vm1, %v3975_v43, %v3315_v19  ;;  %v3333_v29 = vsub.f32 1.0, %v3332_v7 }
 0x9bc   :  { %v3324_v20 = vsel %vm3321_vm3, %v3323_v30, %v3319_v10  ;;  %v3347_v56 = vmul.f32 %v3979_v6, %v3305_v53 }
 0x9bd   :  { %v3346_v16 = vmul.f32 %v3324_v20, %v6322_v4  ;;  %v3334_v17 = vmul.f32 %v3977_v22, %v3333_v29  ;;  %v7048_v4 = vld [vmem:[#allocation49_spill] sm:$0xff] }
 0x9be   :  { %v2221_v35 = vadd.f32 %v7048_v4, %v7040_v14 }
 0x9bf   :  { %v6398_v24 = vadd.f32 %v3347_v56, %v3346_v16  ;;  %v3335_v26 = vadd.f32 %v3977_v22, %v3334_v17 }
 0x9c1   :  { %3980 = vtanh.f32 %v6398_v24  ;;  %v3339_v21 = vsel %vm3338_vm6, %v3977_v22, %v3335_v26 }
 0x9c2   :  { %v3344_v42 = vsel %vm3341_vm7, %v3343_v23, %v3339_v21 }
 0x9c7   :  { %v3981_v57 = vpop.eup %3980 }
 0x9c8   :  { %v3350_v49 = vmul.f32 %v3981_v57, %v3344_v42 }
 0x9ca   :  { %3371 = vmatmul.f32.vlgmr.msra.gmra.mxu0 %v3350_v49  ;;  %3391 = vmatmul.f32.vlgmr.msra.gmra.mxu1 %v3350_v49 }
 0x9cb   :  { %3411 = vmatmul.f32.vlgmr.msra.gmra.mxu2 %v3350_v49  ;;  %3431 = vmatmul.f32.vlgmr.msra.gmra.mxu3 %v3350_v49 }
 0xa47   :  { %v3372_v8 = vpop.f32.mrf.mxu0  ;;  %v3392_v28 = vpop.f32.mrf.mxu1 }
 0xa48   :  { %v3435_v51 = vadd.f32 %v3372_v8, %v2221_v35  ;;  %v3436_v5 = vadd.f32 %v3392_v28, %v2262_v39  ;;  %v3666_v39 = vld [vmem:[%s6480_s7 + $0x68] sm:$0xff]  ;;  %v3665_v8 = vld [vmem:[%s6480_s7 + $0x60] sm:$0xff]  ;;  %v3664_v28 = vld [vmem:[%s6480_s7 + $0x58] sm:$0xff] }
 0xa4a   :  { %v3744_v31 = vmul.f32 -1.442695, %v3435_v51  ;;  %v3745_v12 = vmul.f32 -1.442695, %v3436_v5  ;;  %v3663_v51 = vld [vmem:[%s6480_s7 + $0x50] sm:$0xff]  ;;  %v3662_v5 = vld [vmem:[%s6480_s7 + $0x48] sm:$0xff] }
 0xa4c   :  { %3982 = vpow2.f32 %v3744_v31  ;;  %v3661_v31 = vld [vmem:[%s6480_s7 + $0x40] sm:$0xff] }
 0xa4d   :  { %3984 = vpow2.f32 %v3745_v12  ;;  %v3660_v12 = vld [vmem:[%s6480_s7 + $0x38] sm:$0xff] }
 0xa4e   :  { %v3432_v37 = vpop.f32.mrf.mxu3  ;;  %v3412_v36 = vpop.f32.mrf.mxu2 }
 0xa4f   :  { %v3438_v44 = vadd.f32 %v3432_v37, %v2344_v40  ;;  %v3437_v43 = vadd.f32 %v3412_v36, %v2303_v25  ;;  %v2224_v40 = vadd.f32 %v7052_v38, %v7040_v14  ;;  %v7053_v37 = vld [vmem:[#allocation65_spill] sm:$0xff]  ;;  %v3658_v36 = vld [vmem:[%s6480_s7 + $0x28] sm:$0xff]  ;;  %v3657_v14 = vld [vmem:[%s6480_s7 + $0x20] sm:$0xff] }
 0xa50   :  { %v7054_v25 = vld [vmem:[#allocation69_spill] sm:$0xff] }
 0xa51   :  { %v3746_v32 = vmul.f32 -1.442695, %v3438_v44  ;;  %v2265_v44 = vadd.f32 %v7053_v37, %v7042_v52  ;;  %v3656_v52 = vld [vmem:[%s6480_s7 + $0x18] sm:$0xff] }
 0xa52   :  { %v3983_v61 = vpop.eup %3982 }
 0xa53   :  { %v3985_v46 = vpop.eup %3984  ;;  %v3442_v0 = vadd.f32 1.0, %v3983_v61  ;;  %3986 = vpow2.f32 %v3746_v32 }
 0xa54   :  { %v3461_v62 = vadd.f32 1.0, %v3985_v46  ;;  %v3659_v46 = vld [vmem:[%s6480_s7 + $0x30] sm:$0xff] }
 0xa55   :  { %3988 = vrcp.f32 %v3442_v0  ;;  %v3454_v13 = vand.u32 2147483648, %v3442_v0  ;;  %v3452_v18 = vand.u32 2147483647, %v3442_v0  ;;  %vm3448_vm10 = vweird.f32 %v3442_v0 }
 0xa56   :  { %3990 = vrcp.f32 %v3461_v62  ;;  %v3473_v50 = vand.u32 2147483648, %v3461_v62  ;;  %v3471_v22 = vand.u32 2147483647, %v3461_v62  ;;  %vm3467_vm11 = vweird.f32 %v3461_v62 }
 0xa57   :  { %v3455_v19 = vor.u32 1.1754944e-38, %v3454_v13  ;;  %vm3453_vm14 = vcmp.eq.f32.partialorder %v3452_v18, 8.507059e+37 }
 0xa58   :  { %v3474_v54 = vor.u32 1.1754944e-38, %v3473_v50  ;;  %vm3472_vm15 = vcmp.eq.f32.partialorder %v3471_v22, 8.507059e+37 }
 0xa59   :  { %v3987_v11 = vpop.eup %3986 }
 0xa5a   :  { %v3481_v48 = vadd.f32 1.0, %v3987_v11 }
 0xa5b   :  { %v3989_v63 = vpop.eup %3988 }
 0xa5c   :  { %v3991_v41 = vpop.eup %3990  ;;  %v3444_v2 = vmul.f32 %v3989_v63, %v3442_v0  ;;  %3992 = vrcp.f32 %v3481_v48  ;;  %vm3449_vm8 = vweird.f32 %v3989_v63  ;;  %v3493_v21 = vand.u32 2147483648, %v3481_v48 }
 0xa5d   :  { %v3463_v34 = vmul.f32 %v3991_v41, %v3461_v62  ;;  %3994 = vtanh.f32 %v3437_v43  ;;  %vm3468_vm9 = vweird.f32 %v3991_v41  ;;  %vm3450_vm12 = vmor %vm3448_vm10, %vm3449_vm8  ;;  %vm3487_vm1 = vweird.f32 %v3481_v48 }
 0xa5e   :  { %v3445_v27 = vsub.f32 1.0, %v3444_v2  ;;  %vm3469_vm13 = vmor %vm3467_vm11, %vm3468_vm9  ;;  %v3491_v23 = vand.u32 2147483647, %v3481_v48  ;;  %v3494_v42 = vor.u32 1.1754944e-38, %v3493_v21  ;;  %v3654_v2 = vld [vmem:[%s6480_s7 + $0x8] sm:$0xff] }
 0xa5f   :  { %v3464_v58 = vsub.f32 1.0, %v3463_v34 }
 0xa60   :  { %v3446_v15 = vmul.f32 %v3989_v63, %v3445_v27  ;;  %vm3492_vm3 = vcmp.eq.f32.partialorder %v3491_v23, 8.507059e+37  ;;  %v3653_v27 = vld [vmem:[%s6480_s7] sm:$0xff] }
 0xa61   :  { %v3465_v45 = vmul.f32 %v3991_v41, %v3464_v58 }
 0xa62   :  { %v3993_v55 = vpop.eup %3992  ;;  %v3447_v1 = vadd.f32 %v3989_v63, %v3446_v15 }
 0xa63   :  { %v3466_v7 = vadd.f32 %v3991_v41, %v3465_v45  ;;  %v3483_v30 = vmul.f32 %v3993_v55, %v3481_v48  ;;  %v3995_v53 = vpop.eup %3994  ;;  %vm3488_vm0 = vweird.f32 %v3993_v55  ;;  %v2347_v48 = vadd.f32 %v7054_v25, %v7044_v60  ;;  %v7055_v45 = vld [vmem:[#allocation71_spill] sm:$0xff] }
 0xa64   :  { %v3451_v6 = vsel %vm3450_vm12, %v3989_v63, %v3447_v1  ;;  %vm3489_vm2 = vmor %vm3487_vm1, %vm3488_vm0  ;;  %v3655_v63 = vld [vmem:[%s6480_s7 + $0x10] sm:$0xff]  ;;  %v2306_v22 = vadd.f32 %v7055_v45, %v7046_v3  ;;  %vm3693_vm0 = vcmask 7168  }
 0xa65   :  { %v3456_v10 = vsel %vm3453_vm14, %v3455_v19, %v3451_v6  ;;  %v3470_v29 = vsel %vm3469_vm13, %v3991_v41, %v3466_v7  ;;  %v3484_v20 = vsub.f32 1.0, %v3483_v30 }
 0xa66   :  { %v3475_v56 = vsel %vm3472_vm15, %v3474_v54, %v3470_v29  ;;  %v3498_v16 = vmul.f32 %v3995_v53, %v3456_v10 }
 0xa67   :  { %v3497_v17 = vmul.f32 %v3475_v56, %v6398_v24  ;;  %v3485_v26 = vmul.f32 %v3993_v55, %v3484_v20  ;;  %v3668_v24 = vld [vmem:[%s6480_s7 + $0x78] sm:$0xff] }
 0xa68   :  { %3673 = vmatpush.msra.mxu0 %v3668_v24 }
 0xa69   :  { %v6410_v9 = vadd.f32 %v3498_v16, %v3497_v17  ;;  %v3486_v47 = vadd.f32 %v3993_v55, %v3485_v26 }
 0xa6a   :  { %3674 = vmatpush.msra.mxu0 %v3667_v59 }
 0xa6b   :  { %3996 = vtanh.f32 %v6410_v9  ;;  %v3490_v57 = vsel %vm3489_vm2, %v3993_v55, %v3486_v47 }
 0xa6c   :  { %v3495_v4 = vsel %vm3492_vm3, %v3494_v42, %v3490_v57  ;;  %3675 = vmatpush.msra.mxu0 %v3666_v39 }
 0xa6e   :  { %3676 = vmatpush.msra.mxu0 %v3665_v8 }
 0xa70   :  { %3677 = vmatpush.msra.mxu0 %v3664_v28 }
 0xa71   :  { %v3997_v49 = vpop.eup %3996 }
 0xa72   :  { %v3501_v35 = vmul.f32 %v3997_v49, %v3495_v4  ;;  %3678 = vmatpush.msra.mxu0 %v3663_v51 }
 0xa74   :  { %3522 = vmatmul.f32.vlgmr.msrb.gmra.mxu0 %v3501_v35  ;;  %3542 = vmatmul.f32.vlgmr.msrb.gmra.mxu1 %v3501_v35 }
 0xa75   :  { %3562 = vmatmul.f32.vlgmr.msrb.gmra.mxu2 %v3501_v35  ;;  %3582 = vmatmul.f32.vlgmr.msrb.gmra.mxu3 %v3501_v35 }
 0xa76   :  { %3679 = vmatpush.msra.mxu0 %v3662_v5 }
 0xa78   :  { %3680 = vmatpush.msra.mxu0 %v3661_v31 }
 0xa7a   :  { %3681 = vmatpush.msra.mxu0 %v3660_v12 }
 0xa7c   :  { %3682 = vmatpush.msra.mxu0 %v3659_v46 }
 0xa7e   :  { %3683 = vmatpush.msra.mxu0 %v3658_v36 }
 0xa80   :  { %3684 = vmatpush.msra.mxu0 %v3657_v14 }
 0xa82   :  { %3685 = vmatpush.msra.mxu0 %v3656_v52 }
 0xa84   :  { %3686 = vmatpush.msra.mxu0 %v3655_v63 }
 0xa86   :  { %3687 = vmatpush.msra.mxu0 %v3654_v2 }
 0xa88   :  { %3688 = vmatpush.msra.mxu0 %v3653_v27 }
 0xaf1   :  { %v3523_v32 = vpop.f32.mrf.mxu0  ;;  %v3543_v61 = vpop.f32.mrf.mxu1 }
 0xaf2   :  { %v3586_v0 = vadd.f32 %v3523_v32, %v2224_v40  ;;  %v3587_v62 = vadd.f32 %v3543_v61, %v2265_v44  ;;  %v3757_v61 = vld [vmem:[#allocation4] ss:$0 sm:$0xff] }
 0xaf4   :  { %v3747_v11 = vmul.f32 -1.442695, %v3586_v0  ;;  %v3748_v33 = vmul.f32 -1.442695, %v3587_v62 }
 0xaf6   :  { %3998 = vpow2.f32 %v3747_v11 }
 0xaf7   :  { %4000 = vpow2.f32 %v3748_v33 }
 0xaf8   :  { %v3583_v43 = vpop.f32.mrf.mxu3  ;;  %v3563_v15 = vpop.f32.mrf.mxu2 }
 0xaf9   :  { %v3589_v41 = vadd.f32 %v3583_v43, %v2347_v48  ;;  %v3588_v19 = vadd.f32 %v3563_v15, %v2306_v22 }
 0xafb   :  { %v3749_v34 = vmul.f32 -1.442695, %v3589_v41 }
 0xafc   :  { %v3999_v58 = vpop.eup %3998 }
 0xafd   :  { %v4001_v60 = vpop.eup %4000  ;;  %v3593_v13 = vadd.f32 1.0, %v3999_v58  ;;  %4002 = vpow2.f32 %v3749_v34 }
 0xafe   :  { %v3612_v50 = vadd.f32 1.0, %v4001_v60 }
 0xaff   :  { %4004 = vrcp.f32 %v3593_v13  ;;  %v3605_v10 = vand.u32 2147483648, %v3593_v13  ;;  %v3603_v56 = vand.u32 2147483647, %v3593_v13  ;;  %vm3599_vm6 = vweird.f32 %v3593_v13 }
 0xb00   :  { %4006 = vrcp.f32 %v3612_v50  ;;  %v3624_v29 = vand.u32 2147483648, %v3612_v50  ;;  %v3622_v17 = vand.u32 2147483647, %v3612_v50  ;;  %vm3618_vm7 = vweird.f32 %v3612_v50 }
 0xb01   :  { %v3606_v47 = vor.u32 1.1754944e-38, %v3605_v10  ;;  %vm3604_vm10 = vcmp.eq.f32.partialorder %v3603_v56, 8.507059e+37 }
 0xb02   :  { %v3625_v57 = vor.u32 1.1754944e-38, %v3624_v29  ;;  %vm3623_vm11 = vcmp.eq.f32.partialorder %v3622_v17, 8.507059e+37 }
 0xb03   :  { %v4003_v18 = vpop.eup %4002 }
 0xb04   :  { %v3632_v55 = vadd.f32 1.0, %v4003_v18 }
 0xb05   :  { %v4005_v1 = vpop.eup %4004 }
 0xb06   :  { %v4007_v7 = vpop.eup %4006  ;;  %v3595_v30 = vmul.f32 %v4005_v1, %v3593_v13  ;;  %4008 = vrcp.f32 %v3632_v55  ;;  %vm3600_vm4 = vweird.f32 %v4005_v1  ;;  %v3644_v31 = vand.u32 2147483648, %v3632_v55 }
 0xb07   :  { %v3614_v54 = vmul.f32 %v4007_v7, %v3612_v50  ;;  %4010 = vtanh.f32 %v3588_v19  ;;  %vm3619_vm5 = vweird.f32 %v4007_v7  ;;  %vm3601_vm8 = vmor %vm3599_vm6, %vm3600_vm4  ;;  %vm3638_vm13 = vweird.f32 %v3632_v55 }
 0xb08   :  { %v3596_v6 = vsub.f32 1.0, %v3595_v30  ;;  %vm3620_vm9 = vmor %vm3618_vm7, %vm3619_vm5  ;;  %v3642_v12 = vand.u32 2147483647, %v3632_v55  ;;  %v3645_v40 = vor.u32 1.1754944e-38, %v3644_v31 }
 0xb09   :  { %v3615_v53 = vsub.f32 1.0, %v3614_v54 }
 0xb0a   :  { %v3597_v20 = vmul.f32 %v4005_v1, %v3596_v6  ;;  %vm3643_vm15 = vcmp.eq.f32.partialorder %v3642_v12, 8.507059e+37 }
 0xb0b   :  { %v3616_v16 = vmul.f32 %v4007_v7, %v3615_v53 }
 0xb0c   :  { %v4009_v26 = vpop.eup %4008  ;;  %v3598_v3 = vadd.f32 %v4005_v1, %v3597_v20 }
 0xb0d   :  { %v3617_v21 = vadd.f32 %v4007_v7, %v3616_v16  ;;  %v3634_v23 = vmul.f32 %v4009_v26, %v3632_v55  ;;  %v4011_v49 = vpop.eup %4010  ;;  %vm3639_vm12 = vweird.f32 %v4009_v26 }
 0xb0e   :  { %v3602_v42 = vsel %vm3601_vm8, %v4005_v1, %v3598_v3  ;;  %vm3640_vm14 = vmor %vm3638_vm13, %vm3639_vm12 }
 0xb0f   :  { %v3607_v4 = vsel %vm3604_vm10, %v3606_v47, %v3602_v42  ;;  %v3621_v35 = vsel %vm3620_vm9, %v4007_v7, %v3617_v21  ;;  %v3635_v24 = vsub.f32 1.0, %v3634_v23 }
 0xb10   :  { %v3626_v59 = vsel %vm3623_vm11, %v3625_v57, %v3621_v35  ;;  %v3649_v39 = vmul.f32 %v4011_v49, %v3607_v4 }
 0xb11   :  { %v3648_v8 = vmul.f32 %v3626_v59, %v6410_v9  ;;  %v3636_v28 = vmul.f32 %v4009_v26, %v3635_v24 }
 0xb13   :  { %v3650_v51 = vadd.f32 %v3649_v39, %v3648_v8  ;;  %v3637_v5 = vadd.f32 %v4009_v26, %v3636_v28 }
 0xb15   :  { %4012 = vtanh.f32 %v3650_v51  ;;  %v3641_v38 = vsel %vm3640_vm14, %v4009_v26, %v3637_v5 }
 0xb16   :  { %v3646_v44 = vsel %vm3643_vm15, %v3645_v40, %v3641_v38 }
 0xb1b   :  { %v4013_v37 = vpop.eup %4012 }
 0xb1c   :  { %v3652_v32 = vmul.f32 %v4013_v37, %v3646_v44 }
 0xb1e   :  { %3689 = vmatmul.f32.vlgmr.msra.gmra.mxu0 %v3652_v32 }
 0xb9b   :  { %v3690_v46 = vpop.f32.mrf.mxu0 }
 0xb9c   :  { %v3691_v9 = vadd.f32 %v3757_v61, %v3690_v46 }
 0xb9e   :  { %3694 = vst.msk [vmem:[%s6482_s9] sm:$0xff] %vm3693_vm0, %v3691_v9 }
 0xb9f   :  { %3699 = vsyncpa [#allocation6], 1 }
 0xba0   :  { %3700 = vsyncpa [#allocation8], 1 }
 0xba1   :  { %3701 = vsyncpa [#allocation11], 1 }

</bundles_post_ra>
